<compile_context>
chip_gen: v7x
topology: tpu7x:2x2x1
jax: 0.10.0
libtpu: 0.0.40
codegen_flags: <defaults>
</compile_context>

<pallas_src>
import functools

import jax
import jax.numpy as jnp
import numpy as np
from jax.experimental import pallas as pl
from jax.experimental.pallas import tpu as pltpu

NUM_HEADS = 4
LN_EPS = 1e-5


def _layer_norm(v):
    # F.layer_norm(x, [E]) -> no learnable affine, eps=1e-5
    mu = jnp.mean(v, axis=-1, keepdims=True)
    var = jnp.mean(jnp.square(v - mu), axis=-1, keepdims=True)
    return (v - mu) * jax.lax.rsqrt(var + LN_EPS)


def _vit_kernel(x_ref, inw_ref, inb_ref, outw_ref, outb_ref, fcw_ref, fcb_ref, o_ref,
                *, batch, seq, embed, num_layers):
    """All transformer blocks in one invocation; weights indexed statically per layer."""
    n_rows = batch * seq
    head_dim = embed // NUM_HEADS

    x = x_ref[...]                                   # (batch*seq, embed) f32 running state

    for layer in range(num_layers):                  # static unrolled layer loop
        in_w = inw_ref[layer]                        # (E, 3E)  (Q cols pre-scaled by 1/sqrt(d))
        in_b = inb_ref[layer]                        # (1, 3E)  (Q part pre-scaled)
        out_w = outw_ref[layer]                      # (E, E)
        out_b = outb_ref[layer]                      # (1, E)
        fc_w = fcw_ref[layer]                        # (E, E)
        fc_b = fcb_ref[layer]                        # (1, E)

        # ---- pre-attention LayerNorm + fused QKV projection --------------------
        x1 = _layer_norm(x)
        qkv = jnp.dot(x1, in_w, preferred_element_type=jnp.float32) + in_b   # (rows, 3E)

        # ---- multi-head self attention: batched (over N) einsums per head ------
        head_outs = []
        for h in range(NUM_HEADS):
            lo = h * head_dim
            q_h = qkv[:, lo:lo + head_dim].reshape(batch, seq, head_dim)
            k_h = qkv[:, embed + lo:embed + lo + head_dim].reshape(batch, seq, head_dim)
            v_h = qkv[:, 2 * embed + lo:2 * embed + lo + head_dim].reshape(batch, seq, head_dim)

            s = jnp.einsum('bqd,bkd->bqk', q_h, k_h,
                           preferred_element_type=jnp.float32)               # (N, L, L)
            s = s - jnp.max(s, axis=-1, keepdims=True)
            p = jnp.exp(s)
            denom = jnp.sum(p, axis=-1, keepdims=True)                       # (N, L, 1)
            o_h = jnp.einsum('bqk,bkd->bqd', p, v_h,
                             preferred_element_type=jnp.float32)             # (N, L, d)
            # normalize after P.V; reciprocal goes to the (otherwise idle) EUP slot
            o_h = o_h * pl.reciprocal(denom, approx=True)
            head_outs.append(o_h.reshape(n_rows, head_dim))

        attn = jnp.concatenate(head_outs, axis=-1)                           # (rows, E)
        attn = jnp.dot(attn, out_w, preferred_element_type=jnp.float32) + out_b

        # ---- residual, LayerNorm, FC + ReLU, residual with ORIGINAL x ----------
        x2 = _layer_norm(x + attn)
        x2 = jnp.dot(x2, fc_w, preferred_element_type=jnp.float32) + fc_b
        x = jnp.maximum(x2, 0.0) + x

    o_ref[...] = x.astype(o_ref.dtype)


def vision_transformer_forward(x_lne, stacked_params):
    """x_lne: (L, N, E) float32, same axis convention as the PyTorch module."""
    L, N, E = x_lne.shape
    in_w_t, in_b, out_w_t, out_b, fc_w_t, fc_b = stacked_params
    num_layers = in_w_t.shape[0]

    x2d = jnp.transpose(x_lne, (1, 0, 2)).reshape(N * L, E).astype(jnp.float32)
    kernel = functools.partial(_vit_kernel, batch=N, seq=L, embed=E, num_layers=num_layers)

    vmem = pl.BlockSpec(memory_space=pltpu.MemorySpace.VMEM)   # whole array, VMEM-resident
    out2d = pl.pallas_call(
        kernel,
        out_shape=jax.ShapeDtypeStruct((N * L, E), jnp.float32),
        in_specs=[vmem] * 7,
        out_specs=vmem,
    )(x2d, in_w_t, in_b, out_w_t, out_b, fc_w_t, fc_b)

    return out2d.reshape(N, L, E).transpose(1, 0, 2)


def init_params(key, num_layers, E):
    """Deterministic synthetic params; returns (per-layer raw list, stacked-for-kernel)."""
    head_dim = E // NUM_HEADS
    scale = 1.0 / float(np.sqrt(head_dim))
    keys = jax.random.split(key, num_layers * 6)
    raw = []
    for i in range(num_layers):
        k = keys[i * 6:(i + 1) * 6]
        in_w = jax.random.normal(k[0], (3 * E, E), jnp.float32) * 0.05   # MHA in_proj_weight
        in_b = jax.random.normal(k[1], (3 * E,), jnp.float32) * 0.05     # MHA in_proj_bias
        out_w = jax.random.normal(k[2], (E, E), jnp.float32) * 0.05      # MHA out_proj.weight
        out_b = jax.random.normal(k[3], (E,), jnp.float32) * 0.05        # MHA out_proj.bias
        fc_w = jax.random.normal(k[4], (E, E), jnp.float32) * 0.05       # nn.Linear weight
        fc_b = jax.random.normal(k[5], (E,), jnp.float32) * 0.05         # nn.Linear bias
        raw.append((in_w, in_b, out_w, out_b, fc_w, fc_b))

    def fold_scale_w(in_w):         # (3E, E) -> (E, 3E) with Q columns pre-scaled
        w_t = in_w.T
        return w_t.at[:, :E].multiply(scale)

    def fold_scale_b(in_b):         # (3E,) -> (1, 3E) with Q part pre-scaled
        b = in_b.reshape(1, -1)
        return b.at[:, :E].multiply(scale)

    stacked = (
        jnp.stack([fold_scale_w(p[0]) for p in raw]),      # (layers, E, 3E)
        jnp.stack([fold_scale_b(p[1]) for p in raw]),      # (layers, 1, 3E)
        jnp.stack([p[2].T for p in raw]),                  # (layers, E, E)
        jnp.stack([p[3].reshape(1, -1) for p in raw]),     # (layers, 1, E)
        jnp.stack([p[4].T for p in raw]),                  # (layers, E, E)
        jnp.stack([p[5].reshape(1, -1) for p in raw]),     # (layers, 1, E)
    )
    return raw, stacked


def reference_forward(x_lne, raw_params):
    """Pure-JAX mirror of the PyTorch forward, on (L, N, E)."""
    x = x_lne.astype(jnp.float32)
    L, N, E = x.shape
    H, Dh = NUM_HEADS, E // NUM_HEADS
    for (in_w, in_b, out_w, out_b, fc_w, fc_b) in raw_params:
        x1 = _layer_norm(x)
        qkv = jnp.einsum('lne,fe->lnf', x1, in_w) + in_b
        q, k, v = jnp.split(qkv, 3, axis=-1)

        def heads(t):  # (L, N, E) -> (N, H, L, Dh)
            return t.reshape(L, N, H, Dh).transpose(1, 2, 0, 3)

        qh, kh, vh = heads(q), heads(k), heads(v)
        s = jnp.einsum('nhld,nhmd->nhlm', qh, kh) / jnp.sqrt(float(Dh))
        p = jax.nn.softmax(s, axis=-1)
        o = jnp.einsum('nhlm,nhmd->nhld', p, vh).transpose(2, 0, 1, 3).reshape(L, N, E)
        attn = jnp.einsum('lne,fe->lnf', o, out_w) + out_b
        x2 = _layer_norm(x + attn)
        x2 = jax.nn.relu(jnp.einsum('lne,fe->lnf', x2, fc_w) + fc_b)
        x = x2 + x
    return x


if __name__ == "__main__":
    # Small shapes consistent with the module: seq(=num_patches)=8, batch=2,
    # projection_dim=32, 4 heads, 4 transformer layers.
    L, N, E = 8, 2, 32
    num_layers = 4

    key = jax.random.PRNGKey(0)
    kx, kp = jax.random.split(key)
    x = jax.random.normal(kx, (L, N, E), jnp.float32)
    raw_params, stacked_params = init_params(kp, num_layers, E)

    out = vision_transformer_forward(x, stacked_params)
    out = jax.block_until_ready(out)

    ref = reference_forward(x, raw_params)
    assert out.shape == (L, N, E)
    # tolerance loosened slightly vs f32-exact to absorb pl.reciprocal(approx=True)
    np.testing.assert_allclose(np.asarray(out), np.asarray(ref), rtol=5e-3, atol=5e-3)
    print("KERNEL_OK")
</pallas_src>

<mosaic_0001>
module attributes {stable_mosaic.version = 11 : i64} {
  func.func @_vit_kernel(%arg0: memref<16x32xf32, #tpu.memory_space<vmem>>, %arg1: memref<4x32x96xf32, #tpu.memory_space<vmem>>, %arg2: memref<4x1x96xf32, #tpu.memory_space<vmem>>, %arg3: memref<4x32x32xf32, #tpu.memory_space<vmem>>, %arg4: memref<4x1x32xf32, #tpu.memory_space<vmem>>, %arg5: memref<4x32x32xf32, #tpu.memory_space<vmem>>, %arg6: memref<4x1x32xf32, #tpu.memory_space<vmem>>, %arg7: memref<16x32xf32, #tpu.memory_space<vmem>>) attributes {dimension_semantics = [], scalar_prefetch = 0 : i64, scratch_operands = 0 : i64, tpu.core_type = #tpu.core_type<tc>} {
    %c0 = arith.constant 0 : index
    %c0_0 = arith.constant 0 : index
    %0 = vector.load %arg0[%c0, %c0_0] : memref<16x32xf32, #tpu.memory_space<vmem>>, vector<16x32xf32>
    %c0_1 = arith.constant 0 : index
    %c0_2 = arith.constant 0 : index
    %c0_3 = arith.constant 0 : index
    %1 = vector.load %arg1[%c0_1, %c0_2, %c0_3] : memref<4x32x96xf32, #tpu.memory_space<vmem>>, vector<1x32x96xf32>
    %2 = vector.shape_cast %1 : vector<1x32x96xf32> to vector<32x96xf32>
    %c0_4 = arith.constant 0 : index
    %c0_5 = arith.constant 0 : index
    %c0_6 = arith.constant 0 : index
    %3 = vector.load %arg2[%c0_4, %c0_5, %c0_6] : memref<4x1x96xf32, #tpu.memory_space<vmem>>, vector<1x1x96xf32>
    %4 = vector.shape_cast %3 : vector<1x1x96xf32> to vector<1x96xf32>
    %c0_7 = arith.constant 0 : index
    %c0_8 = arith.constant 0 : index
    %c0_9 = arith.constant 0 : index
    %5 = vector.load %arg3[%c0_7, %c0_8, %c0_9] : memref<4x32x32xf32, #tpu.memory_space<vmem>>, vector<1x32x32xf32>
    %6 = vector.shape_cast %5 : vector<1x32x32xf32> to vector<32x32xf32>
    %c0_10 = arith.constant 0 : index
    %c0_11 = arith.constant 0 : index
    %c0_12 = arith.constant 0 : index
    %7 = vector.load %arg4[%c0_10, %c0_11, %c0_12] : memref<4x1x32xf32, #tpu.memory_space<vmem>>, vector<1x1x32xf32>
    %8 = vector.shape_cast %7 : vector<1x1x32xf32> to vector<1x32xf32>
    %c0_13 = arith.constant 0 : index
    %c0_14 = arith.constant 0 : index
    %c0_15 = arith.constant 0 : index
    %9 = vector.load %arg5[%c0_13, %c0_14, %c0_15] : memref<4x32x32xf32, #tpu.memory_space<vmem>>, vector<1x32x32xf32>
    %10 = vector.shape_cast %9 : vector<1x32x32xf32> to vector<32x32xf32>
    %c0_16 = arith.constant 0 : index
    %c0_17 = arith.constant 0 : index
    %c0_18 = arith.constant 0 : index
    %11 = vector.load %arg6[%c0_16, %c0_17, %c0_18] : memref<4x1x32xf32, #tpu.memory_space<vmem>>, vector<1x1x32xf32>
    %12 = vector.shape_cast %11 : vector<1x1x32xf32> to vector<1x32xf32>
    %cst = arith.constant dense<0.000000e+00> : vector<16xf32>
    %13 = vector.multi_reduction <add>, %0, %cst [1] : vector<16x32xf32> to vector<16xf32>
    %14 = vector.shape_cast %13 : vector<16xf32> to vector<16x1xf32>
    %cst_19 = arith.constant 3.200000e+01 : f32
    %15 = vector.broadcast %cst_19 : f32 to vector<16x1xf32>
    %16 = arith.divf %14, %15 : vector<16x1xf32>
    %17 = vector.broadcast %16 : vector<16x1xf32> to vector<16x32xf32>
    %18 = arith.subf %0, %17 : vector<16x32xf32>
    %19 = arith.mulf %18, %18 : vector<16x32xf32>
    %cst_20 = arith.constant dense<0.000000e+00> : vector<16xf32>
    %20 = vector.multi_reduction <add>, %19, %cst_20 [1] : vector<16x32xf32> to vector<16xf32>
    %21 = vector.shape_cast %20 : vector<16xf32> to vector<16x1xf32>
    %cst_21 = arith.constant 3.200000e+01 : f32
    %22 = vector.broadcast %cst_21 : f32 to vector<16x1xf32>
    %23 = arith.divf %21, %22 : vector<16x1xf32>
    %24 = vector.broadcast %16 : vector<16x1xf32> to vector<16x32xf32>
    %25 = arith.subf %0, %24 : vector<16x32xf32>
    %cst_22 = arith.constant 9.99999974E-6 : f32
    %26 = vector.broadcast %cst_22 : f32 to vector<16x1xf32>
    %27 = arith.addf %23, %26 : vector<16x1xf32>
    %28 = math.rsqrt %27 : vector<16x1xf32>
    %29 = vector.broadcast %28 : vector<16x1xf32> to vector<16x32xf32>
    %30 = arith.mulf %25, %29 : vector<16x32xf32>
    %cst_23 = arith.constant dense<0.000000e+00> : vector<16x96xf32>
    %31 = tpu.matmul %30, %2, %cst_23 {dimension_numbers = #tpu.dot_dimension_numbers<[1], [0], [0], [1], [0, 0, 1, 1], [], []>} : vector<16x32xf32>, vector<32x96xf32>, vector<16x96xf32> -> vector<16x96xf32>
    %32 = vector.broadcast %4 : vector<1x96xf32> to vector<16x96xf32>
    %33 = arith.addf %31, %32 : vector<16x96xf32>
    %34 = vector.extract_strided_slice %33 {offsets = [0, 0], sizes = [16, 8], strides = [1, 1]} : vector<16x96xf32> to vector<16x8xf32>
    %35 = vector.shape_cast %34 : vector<16x8xf32> to vector<2x8x8xf32>
    %36 = vector.extract_strided_slice %33 {offsets = [0, 32], sizes = [16, 8], strides = [1, 1]} : vector<16x96xf32> to vector<16x8xf32>
    %37 = vector.shape_cast %36 : vector<16x8xf32> to vector<2x8x8xf32>
    %38 = vector.extract_strided_slice %33 {offsets = [0, 64], sizes = [16, 8], strides = [1, 1]} : vector<16x96xf32> to vector<16x8xf32>
    %39 = vector.shape_cast %38 : vector<16x8xf32> to vector<2x8x8xf32>
    "tpu.trace_start"() <{level = 10 : i32, message = "bqd,bkd->bqk"}> : () -> ()
    %cst_24 = arith.constant dense<0.000000e+00> : vector<2x8x8xf32>
    %40 = tpu.matmul %35, %37, %cst_24 {dimension_numbers = #tpu.dot_dimension_numbers<[2], [2], [1], [1], [0, 0, 0, 1, 1, 1], [0], [0]>} : vector<2x8x8xf32>, vector<2x8x8xf32>, vector<2x8x8xf32> -> vector<2x8x8xf32>
    "tpu.trace_stop"() : () -> ()
    %cst_25 = arith.constant dense<0xFF800000> : vector<2x8xf32>
    %41 = vector.multi_reduction <maximumf>, %40, %cst_25 [2] : vector<2x8x8xf32> to vector<2x8xf32>
    %42 = vector.shape_cast %41 : vector<2x8xf32> to vector<2x8x1xf32>
    %43 = vector.broadcast %42 : vector<2x8x1xf32> to vector<2x8x8xf32>
    %44 = arith.subf %40, %43 : vector<2x8x8xf32>
    %45 = math.exp %44 : vector<2x8x8xf32>
    %cst_26 = arith.constant dense<0.000000e+00> : vector<2x8xf32>
    %46 = vector.multi_reduction <add>, %45, %cst_26 [2] : vector<2x8x8xf32> to vector<2x8xf32>
    %47 = vector.shape_cast %46 : vector<2x8xf32> to vector<2x8x1xf32>
    "tpu.trace_start"() <{level = 10 : i32, message = "bqk,bkd->bqd"}> : () -> ()
    %cst_27 = arith.constant dense<0.000000e+00> : vector<2x8x8xf32>
    %48 = tpu.matmul %45, %39, %cst_27 {dimension_numbers = #tpu.dot_dimension_numbers<[2], [1], [1], [2], [0, 0, 0, 1, 1, 2], [0], [0]>} : vector<2x8x8xf32>, vector<2x8x8xf32>, vector<2x8x8xf32> -> vector<2x8x8xf32>
    "tpu.trace_stop"() : () -> ()
    %49 = tpu.reciprocal %47 {approx = true} : vector<2x8x1xf32> -> vector<2x8x1xf32>
    %50 = vector.broadcast %49 : vector<2x8x1xf32> to vector<2x8x8xf32>
    %51 = arith.mulf %48, %50 : vector<2x8x8xf32>
    %52 = vector.shape_cast %51 : vector<2x8x8xf32> to vector<16x8xf32>
    %53 = vector.extract_strided_slice %33 {offsets = [0, 8], sizes = [16, 8], strides = [1, 1]} : vector<16x96xf32> to vector<16x8xf32>
    %54 = vector.shape_cast %53 : vector<16x8xf32> to vector<2x8x8xf32>
    %55 = vector.extract_strided_slice %33 {offsets = [0, 40], sizes = [16, 8], strides = [1, 1]} : vector<16x96xf32> to vector<16x8xf32>
    %56 = vector.shape_cast %55 : vector<16x8xf32> to vector<2x8x8xf32>
    %57 = vector.extract_strided_slice %33 {offsets = [0, 72], sizes = [16, 8], strides = [1, 1]} : vector<16x96xf32> to vector<16x8xf32>
    %58 = vector.shape_cast %57 : vector<16x8xf32> to vector<2x8x8xf32>
    "tpu.trace_start"() <{level = 10 : i32, message = "bqd,bkd->bqk"}> : () -> ()
    %cst_28 = arith.constant dense<0.000000e+00> : vector<2x8x8xf32>
    %59 = tpu.matmul %54, %56, %cst_28 {dimension_numbers = #tpu.dot_dimension_numbers<[2], [2], [1], [1], [0, 0, 0, 1, 1, 1], [0], [0]>} : vector<2x8x8xf32>, vector<2x8x8xf32>, vector<2x8x8xf32> -> vector<2x8x8xf32>
    "tpu.trace_stop"() : () -> ()
    %cst_29 = arith.constant dense<0xFF800000> : vector<2x8xf32>
    %60 = vector.multi_reduction <maximumf>, %59, %cst_29 [2] : vector<2x8x8xf32> to vector<2x8xf32>
    %61 = vector.shape_cast %60 : vector<2x8xf32> to vector<2x8x1xf32>
    %62 = vector.broadcast %61 : vector<2x8x1xf32> to vector<2x8x8xf32>
    %63 = arith.subf %59, %62 : vector<2x8x8xf32>
    %64 = math.exp %63 : vector<2x8x8xf32>
    %cst_30 = arith.constant dense<0.000000e+00> : vector<2x8xf32>
    %65 = vector.multi_reduction <add>, %64, %cst_30 [2] : vector<2x8x8xf32> to vector<2x8xf32>
    %66 = vector.shape_cast %65 : vector<2x8xf32> to vector<2x8x1xf32>
    "tpu.trace_start"() <{level = 10 : i32, message = "bqk,bkd->bqd"}> : () -> ()
    %cst_31 = arith.constant dense<0.000000e+00> : vector<2x8x8xf32>
    %67 = tpu.matmul %64, %58, %cst_31 {dimension_numbers = #tpu.dot_dimension_numbers<[2], [1], [1], [2], [0, 0, 0, 1, 1, 2], [0], [0]>} : vector<2x8x8xf32>, vector<2x8x8xf32>, vector<2x8x8xf32> -> vector<2x8x8xf32>
    "tpu.trace_stop"() : () -> ()
    %68 = tpu.reciprocal %66 {approx = true} : vector<2x8x1xf32> -> vector<2x8x1xf32>
    %69 = vector.broadcast %68 : vector<2x8x1xf32> to vector<2x8x8xf32>
    %70 = arith.mulf %67, %69 : vector<2x8x8xf32>
    %71 = vector.shape_cast %70 : vector<2x8x8xf32> to vector<16x8xf32>
    %72 = vector.extract_strided_slice %33 {offsets = [0, 16], sizes = [16, 8], strides = [1, 1]} : vector<16x96xf32> to vector<16x8xf32>
    %73 = vector.shape_cast %72 : vector<16x8xf32> to vector<2x8x8xf32>
    %74 = vector.extract_strided_slice %33 {offsets = [0, 48], sizes = [16, 8], strides = [1, 1]} : vector<16x96xf32> to vector<16x8xf32>
    %75 = vector.shape_cast %74 : vector<16x8xf32> to vector<2x8x8xf32>
    %76 = vector.extract_strided_slice %33 {offsets = [0, 80], sizes = [16, 8], strides = [1, 1]} : vector<16x96xf32> to vector<16x8xf32>
    %77 = vector.shape_cast %76 : vector<16x8xf32> to vector<2x8x8xf32>
    "tpu.trace_start"() <{level = 10 : i32, message = "bqd,bkd->bqk"}> : () -> ()
    %cst_32 = arith.constant dense<0.000000e+00> : vector<2x8x8xf32>
    %78 = tpu.matmul %73, %75, %cst_32 {dimension_numbers = #tpu.dot_dimension_numbers<[2], [2], [1], [1], [0, 0, 0, 1, 1, 1], [0], [0]>} : vector<2x8x8xf32>, vector<2x8x8xf32>, vector<2x8x8xf32> -> vector<2x8x8xf32>
    "tpu.trace_stop"() : () -> ()
    %cst_33 = arith.constant dense<0xFF800000> : vector<2x8xf32>
    %79 = vector.multi_reduction <maximumf>, %78, %cst_33 [2] : vector<2x8x8xf32> to vector<2x8xf32>
    %80 = vector.shape_cast %79 : vector<2x8xf32> to vector<2x8x1xf32>
    %81 = vector.broadcast %80 : vector<2x8x1xf32> to vector<2x8x8xf32>
    %82 = arith.subf %78, %81 : vector<2x8x8xf32>
    %83 = math.exp %82 : vector<2x8x8xf32>
    %cst_34 = arith.constant dense<0.000000e+00> : vector<2x8xf32>
    %84 = vector.multi_reduction <add>, %83, %cst_34 [2] : vector<2x8x8xf32> to vector<2x8xf32>
    %85 = vector.shape_cast %84 : vector<2x8xf32> to vector<2x8x1xf32>
    "tpu.trace_start"() <{level = 10 : i32, message = "bqk,bkd->bqd"}> : () -> ()
    %cst_35 = arith.constant dense<0.000000e+00> : vector<2x8x8xf32>
    %86 = tpu.matmul %83, %77, %cst_35 {dimension_numbers = #tpu.dot_dimension_numbers<[2], [1], [1], [2], [0, 0, 0, 1, 1, 2], [0], [0]>} : vector<2x8x8xf32>, vector<2x8x8xf32>, vector<2x8x8xf32> -> vector<2x8x8xf32>
    "tpu.trace_stop"() : () -> ()
    %87 = tpu.reciprocal %85 {approx = true} : vector<2x8x1xf32> -> vector<2x8x1xf32>
    %88 = vector.broadcast %87 : vector<2x8x1xf32> to vector<2x8x8xf32>
    %89 = arith.mulf %86, %88 : vector<2x8x8xf32>
    %90 = vector.shape_cast %89 : vector<2x8x8xf32> to vector<16x8xf32>
    %91 = vector.extract_strided_slice %33 {offsets = [0, 24], sizes = [16, 8], strides = [1, 1]} : vector<16x96xf32> to vector<16x8xf32>
    %92 = vector.shape_cast %91 : vector<16x8xf32> to vector<2x8x8xf32>
    %93 = vector.extract_strided_slice %33 {offsets = [0, 56], sizes = [16, 8], strides = [1, 1]} : vector<16x96xf32> to vector<16x8xf32>
    %94 = vector.shape_cast %93 : vector<16x8xf32> to vector<2x8x8xf32>
    %95 = vector.extract_strided_slice %33 {offsets = [0, 88], sizes = [16, 8], strides = [1, 1]} : vector<16x96xf32> to vector<16x8xf32>
    %96 = vector.shape_cast %95 : vector<16x8xf32> to vector<2x8x8xf32>
    "tpu.trace_start"() <{level = 10 : i32, message = "bqd,bkd->bqk"}> : () -> ()
    %cst_36 = arith.constant dense<0.000000e+00> : vector<2x8x8xf32>
    %97 = tpu.matmul %92, %94, %cst_36 {dimension_numbers = #tpu.dot_dimension_numbers<[2], [2], [1], [1], [0, 0, 0, 1, 1, 1], [0], [0]>} : vector<2x8x8xf32>, vector<2x8x8xf32>, vector<2x8x8xf32> -> vector<2x8x8xf32>
    "tpu.trace_stop"() : () -> ()
    %cst_37 = arith.constant dense<0xFF800000> : vector<2x8xf32>
    %98 = vector.multi_reduction <maximumf>, %97, %cst_37 [2] : vector<2x8x8xf32> to vector<2x8xf32>
    %99 = vector.shape_cast %98 : vector<2x8xf32> to vector<2x8x1xf32>
    %100 = vector.broadcast %99 : vector<2x8x1xf32> to vector<2x8x8xf32>
    %101 = arith.subf %97, %100 : vector<2x8x8xf32>
    %102 = math.exp %101 : vector<2x8x8xf32>
    %cst_38 = arith.constant dense<0.000000e+00> : vector<2x8xf32>
    %103 = vector.multi_reduction <add>, %102, %cst_38 [2] : vector<2x8x8xf32> to vector<2x8xf32>
    %104 = vector.shape_cast %103 : vector<2x8xf32> to vector<2x8x1xf32>
    "tpu.trace_start"() <{level = 10 : i32, message = "bqk,bkd->bqd"}> : () -> ()
    %cst_39 = arith.constant dense<0.000000e+00> : vector<2x8x8xf32>
    %105 = tpu.matmul %102, %96, %cst_39 {dimension_numbers = #tpu.dot_dimension_numbers<[2], [1], [1], [2], [0, 0, 0, 1, 1, 2], [0], [0]>} : vector<2x8x8xf32>, vector<2x8x8xf32>, vector<2x8x8xf32> -> vector<2x8x8xf32>
    "tpu.trace_stop"() : () -> ()
    %106 = tpu.reciprocal %104 {approx = true} : vector<2x8x1xf32> -> vector<2x8x1xf32>
    %107 = vector.broadcast %106 : vector<2x8x1xf32> to vector<2x8x8xf32>
    %108 = arith.mulf %105, %107 : vector<2x8x8xf32>
    %109 = vector.shape_cast %108 : vector<2x8x8xf32> to vector<16x8xf32>
    %110 = tpu.concatenate %52, %71, %90, %109 in 1 : vector<16x8xf32>, vector<16x8xf32>, vector<16x8xf32>, vector<16x8xf32> -> vector<16x32xf32>
    %cst_40 = arith.constant dense<0.000000e+00> : vector<16x32xf32>
    %111 = tpu.matmul %110, %6, %cst_40 {dimension_numbers = #tpu.dot_dimension_numbers<[1], [0], [0], [1], [0, 0, 1, 1], [], []>} : vector<16x32xf32>, vector<32x32xf32>, vector<16x32xf32> -> vector<16x32xf32>
    %112 = vector.broadcast %8 : vector<1x32xf32> to vector<16x32xf32>
    %113 = arith.addf %111, %112 : vector<16x32xf32>
    %114 = arith.addf %0, %113 : vector<16x32xf32>
    %cst_41 = arith.constant dense<0.000000e+00> : vector<16xf32>
    %115 = vector.multi_reduction <add>, %114, %cst_41 [1] : vector<16x32xf32> to vector<16xf32>
    %116 = vector.shape_cast %115 : vector<16xf32> to vector<16x1xf32>
    %cst_42 = arith.constant 3.200000e+01 : f32
    %117 = vector.broadcast %cst_42 : f32 to vector<16x1xf32>
    %118 = arith.divf %116, %117 : vector<16x1xf32>
    %119 = vector.broadcast %118 : vector<16x1xf32> to vector<16x32xf32>
    %120 = arith.subf %114, %119 : vector<16x32xf32>
    %121 = arith.mulf %120, %120 : vector<16x32xf32>
    %cst_43 = arith.constant dense<0.000000e+00> : vector<16xf32>
    %122 = vector.multi_reduction <add>, %121, %cst_43 [1] : vector<16x32xf32> to vector<16xf32>
    %123 = vector.shape_cast %122 : vector<16xf32> to vector<16x1xf32>
    %cst_44 = arith.constant 3.200000e+01 : f32
    %124 = vector.broadcast %cst_44 : f32 to vector<16x1xf32>
    %125 = arith.divf %123, %124 : vector<16x1xf32>
    %126 = vector.broadcast %118 : vector<16x1xf32> to vector<16x32xf32>
    %127 = arith.subf %114, %126 : vector<16x32xf32>
    %cst_45 = arith.constant 9.99999974E-6 : f32
    %128 = vector.broadcast %cst_45 : f32 to vector<16x1xf32>
    %129 = arith.addf %125, %128 : vector<16x1xf32>
    %130 = math.rsqrt %129 : vector<16x1xf32>
    %131 = vector.broadcast %130 : vector<16x1xf32> to vector<16x32xf32>
    %132 = arith.mulf %127, %131 : vector<16x32xf32>
    %cst_46 = arith.constant dense<0.000000e+00> : vector<16x32xf32>
    %133 = tpu.matmul %132, %10, %cst_46 {dimension_numbers = #tpu.dot_dimension_numbers<[1], [0], [0], [1], [0, 0, 1, 1], [], []>} : vector<16x32xf32>, vector<32x32xf32>, vector<16x32xf32> -> vector<16x32xf32>
    %134 = vector.broadcast %12 : vector<1x32xf32> to vector<16x32xf32>
    %135 = arith.addf %133, %134 : vector<16x32xf32>
    %cst_47 = arith.constant 0.000000e+00 : f32
    %136 = vector.broadcast %cst_47 : f32 to vector<16x32xf32>
    %137 = arith.maximumf %135, %136 : vector<16x32xf32>
    %138 = arith.addf %137, %0 : vector<16x32xf32>
    %c1 = arith.constant 1 : index
    %c0_48 = arith.constant 0 : index
    %c0_49 = arith.constant 0 : index
    %139 = vector.load %arg1[%c1, %c0_48, %c0_49] : memref<4x32x96xf32, #tpu.memory_space<vmem>>, vector<1x32x96xf32>
    %140 = vector.shape_cast %139 : vector<1x32x96xf32> to vector<32x96xf32>
    %c1_50 = arith.constant 1 : index
    %c0_51 = arith.constant 0 : index
    %c0_52 = arith.constant 0 : index
    %141 = vector.load %arg2[%c1_50, %c0_51, %c0_52] : memref<4x1x96xf32, #tpu.memory_space<vmem>>, vector<1x1x96xf32>
    %142 = vector.shape_cast %141 : vector<1x1x96xf32> to vector<1x96xf32>
    %c1_53 = arith.constant 1 : index
    %c0_54 = arith.constant 0 : index
    %c0_55 = arith.constant 0 : index
    %143 = vector.load %arg3[%c1_53, %c0_54, %c0_55] : memref<4x32x32xf32, #tpu.memory_space<vmem>>, vector<1x32x32xf32>
    %144 = vector.shape_cast %143 : vector<1x32x32xf32> to vector<32x32xf32>
    %c1_56 = arith.constant 1 : index
    %c0_57 = arith.constant 0 : index
    %c0_58 = arith.constant 0 : index
    %145 = vector.load %arg4[%c1_56, %c0_57, %c0_58] : memref<4x1x32xf32, #tpu.memory_space<vmem>>, vector<1x1x32xf32>
    %146 = vector.shape_cast %145 : vector<1x1x32xf32> to vector<1x32xf32>
    %c1_59 = arith.constant 1 : index
    %c0_60 = arith.constant 0 : index
    %c0_61 = arith.constant 0 : index
    %147 = vector.load %arg5[%c1_59, %c0_60, %c0_61] : memref<4x32x32xf32, #tpu.memory_space<vmem>>, vector<1x32x32xf32>
    %148 = vector.shape_cast %147 : vector<1x32x32xf32> to vector<32x32xf32>
    %c1_62 = arith.constant 1 : index
    %c0_63 = arith.constant 0 : index
    %c0_64 = arith.constant 0 : index
    %149 = vector.load %arg6[%c1_62, %c0_63, %c0_64] : memref<4x1x32xf32, #tpu.memory_space<vmem>>, vector<1x1x32xf32>
    %150 = vector.shape_cast %149 : vector<1x1x32xf32> to vector<1x32xf32>
    %cst_65 = arith.constant dense<0.000000e+00> : vector<16xf32>
    %151 = vector.multi_reduction <add>, %138, %cst_65 [1] : vector<16x32xf32> to vector<16xf32>
    %152 = vector.shape_cast %151 : vector<16xf32> to vector<16x1xf32>
    %cst_66 = arith.constant 3.200000e+01 : f32
    %153 = vector.broadcast %cst_66 : f32 to vector<16x1xf32>
    %154 = arith.divf %152, %153 : vector<16x1xf32>
    %155 = vector.broadcast %154 : vector<16x1xf32> to vector<16x32xf32>
    %156 = arith.subf %138, %155 : vector<16x32xf32>
    %157 = arith.mulf %156, %156 : vector<16x32xf32>
    %cst_67 = arith.constant dense<0.000000e+00> : vector<16xf32>
    %158 = vector.multi_reduction <add>, %157, %cst_67 [1] : vector<16x32xf32> to vector<16xf32>
    %159 = vector.shape_cast %158 : vector<16xf32> to vector<16x1xf32>
    %cst_68 = arith.constant 3.200000e+01 : f32
    %160 = vector.broadcast %cst_68 : f32 to vector<16x1xf32>
    %161 = arith.divf %159, %160 : vector<16x1xf32>
    %162 = vector.broadcast %154 : vector<16x1xf32> to vector<16x32xf32>
    %163 = arith.subf %138, %162 : vector<16x32xf32>
    %cst_69 = arith.constant 9.99999974E-6 : f32
    %164 = vector.broadcast %cst_69 : f32 to vector<16x1xf32>
    %165 = arith.addf %161, %164 : vector<16x1xf32>
    %166 = math.rsqrt %165 : vector<16x1xf32>
    %167 = vector.broadcast %166 : vector<16x1xf32> to vector<16x32xf32>
    %168 = arith.mulf %163, %167 : vector<16x32xf32>
    %cst_70 = arith.constant dense<0.000000e+00> : vector<16x96xf32>
    %169 = tpu.matmul %168, %140, %cst_70 {dimension_numbers = #tpu.dot_dimension_numbers<[1], [0], [0], [1], [0, 0, 1, 1], [], []>} : vector<16x32xf32>, vector<32x96xf32>, vector<16x96xf32> -> vector<16x96xf32>
    %170 = vector.broadcast %142 : vector<1x96xf32> to vector<16x96xf32>
    %171 = arith.addf %169, %170 : vector<16x96xf32>
    %172 = vector.extract_strided_slice %171 {offsets = [0, 0], sizes = [16, 8], strides = [1, 1]} : vector<16x96xf32> to vector<16x8xf32>
    %173 = vector.shape_cast %172 : vector<16x8xf32> to vector<2x8x8xf32>
    %174 = vector.extract_strided_slice %171 {offsets = [0, 32], sizes = [16, 8], strides = [1, 1]} : vector<16x96xf32> to vector<16x8xf32>
    %175 = vector.shape_cast %174 : vector<16x8xf32> to vector<2x8x8xf32>
    %176 = vector.extract_strided_slice %171 {offsets = [0, 64], sizes = [16, 8], strides = [1, 1]} : vector<16x96xf32> to vector<16x8xf32>
    %177 = vector.shape_cast %176 : vector<16x8xf32> to vector<2x8x8xf32>
    "tpu.trace_start"() <{level = 10 : i32, message = "bqd,bkd->bqk"}> : () -> ()
    %cst_71 = arith.constant dense<0.000000e+00> : vector<2x8x8xf32>
    %178 = tpu.matmul %173, %175, %cst_71 {dimension_numbers = #tpu.dot_dimension_numbers<[2], [2], [1], [1], [0, 0, 0, 1, 1, 1], [0], [0]>} : vector<2x8x8xf32>, vector<2x8x8xf32>, vector<2x8x8xf32> -> vector<2x8x8xf32>
    "tpu.trace_stop"() : () -> ()
    %cst_72 = arith.constant dense<0xFF800000> : vector<2x8xf32>
    %179 = vector.multi_reduction <maximumf>, %178, %cst_72 [2] : vector<2x8x8xf32> to vector<2x8xf32>
    %180 = vector.shape_cast %179 : vector<2x8xf32> to vector<2x8x1xf32>
    %181 = vector.broadcast %180 : vector<2x8x1xf32> to vector<2x8x8xf32>
    %182 = arith.subf %178, %181 : vector<2x8x8xf32>
    %183 = math.exp %182 : vector<2x8x8xf32>
    %cst_73 = arith.constant dense<0.000000e+00> : vector<2x8xf32>
    %184 = vector.multi_reduction <add>, %183, %cst_73 [2] : vector<2x8x8xf32> to vector<2x8xf32>
    %185 = vector.shape_cast %184 : vector<2x8xf32> to vector<2x8x1xf32>
    "tpu.trace_start"() <{level = 10 : i32, message = "bqk,bkd->bqd"}> : () -> ()
    %cst_74 = arith.constant dense<0.000000e+00> : vector<2x8x8xf32>
    %186 = tpu.matmul %183, %177, %cst_74 {dimension_numbers = #tpu.dot_dimension_numbers<[2], [1], [1], [2], [0, 0, 0, 1, 1, 2], [0], [0]>} : vector<2x8x8xf32>, vector<2x8x8xf32>, vector<2x8x8xf32> -> vector<2x8x8xf32>
    "tpu.trace_stop"() : () -> ()
    %187 = tpu.reciprocal %185 {approx = true} : vector<2x8x1xf32> -> vector<2x8x1xf32>
    %188 = vector.broadcast %187 : vector<2x8x1xf32> to vector<2x8x8xf32>
    %189 = arith.mulf %186, %188 : vector<2x8x8xf32>
    %190 = vector.shape_cast %189 : vector<2x8x8xf32> to vector<16x8xf32>
    %191 = vector.extract_strided_slice %171 {offsets = [0, 8], sizes = [16, 8], strides = [1, 1]} : vector<16x96xf32> to vector<16x8xf32>
    %192 = vector.shape_cast %191 : vector<16x8xf32> to vector<2x8x8xf32>
    %193 = vector.extract_strided_slice %171 {offsets = [0, 40], sizes = [16, 8], strides = [1, 1]} : vector<16x96xf32> to vector<16x8xf32>
    %194 = vector.shape_cast %193 : vector<16x8xf32> to vector<2x8x8xf32>
    %195 = vector.extract_strided_slice %171 {offsets = [0, 72], sizes = [16, 8], strides = [1, 1]} : vector<16x96xf32> to vector<16x8xf32>
    %196 = vector.shape_cast %195 : vector<16x8xf32> to vector<2x8x8xf32>
    "tpu.trace_start"() <{level = 10 : i32, message = "bqd,bkd->bqk"}> : () -> ()
    %cst_75 = arith.constant dense<0.000000e+00> : vector<2x8x8xf32>
    %197 = tpu.matmul %192, %194, %cst_75 {dimension_numbers = #tpu.dot_dimension_numbers<[2], [2], [1], [1], [0, 0, 0, 1, 1, 1], [0], [0]>} : vector<2x8x8xf32>, vector<2x8x8xf32>, vector<2x8x8xf32> -> vector<2x8x8xf32>
    "tpu.trace_stop"() : () -> ()
    %cst_76 = arith.constant dense<0xFF800000> : vector<2x8xf32>
    %198 = vector.multi_reduction <maximumf>, %197, %cst_76 [2] : vector<2x8x8xf32> to vector<2x8xf32>
    %199 = vector.shape_cast %198 : vector<2x8xf32> to vector<2x8x1xf32>
    %200 = vector.broadcast %199 : vector<2x8x1xf32> to vector<2x8x8xf32>
    %201 = arith.subf %197, %200 : vector<2x8x8xf32>
    %202 = math.exp %201 : vector<2x8x8xf32>
    %cst_77 = arith.constant dense<0.000000e+00> : vector<2x8xf32>
    %203 = vector.multi_reduction <add>, %202, %cst_77 [2] : vector<2x8x8xf32> to vector<2x8xf32>
    %204 = vector.shape_cast %203 : vector<2x8xf32> to vector<2x8x1xf32>
    "tpu.trace_start"() <{level = 10 : i32, message = "bqk,bkd->bqd"}> : () -> ()
    %cst_78 = arith.constant dense<0.000000e+00> : vector<2x8x8xf32>
    %205 = tpu.matmul %202, %196, %cst_78 {dimension_numbers = #tpu.dot_dimension_numbers<[2], [1], [1], [2], [0, 0, 0, 1, 1, 2], [0], [0]>} : vector<2x8x8xf32>, vector<2x8x8xf32>, vector<2x8x8xf32> -> vector<2x8x8xf32>
    "tpu.trace_stop"() : () -> ()
    %206 = tpu.reciprocal %204 {approx = true} : vector<2x8x1xf32> -> vector<2x8x1xf32>
    %207 = vector.broadcast %206 : vector<2x8x1xf32> to vector<2x8x8xf32>
    %208 = arith.mulf %205, %207 : vector<2x8x8xf32>
    %209 = vector.shape_cast %208 : vector<2x8x8xf32> to vector<16x8xf32>
    %210 = vector.extract_strided_slice %171 {offsets = [0, 16], sizes = [16, 8], strides = [1, 1]} : vector<16x96xf32> to vector<16x8xf32>
    %211 = vector.shape_cast %210 : vector<16x8xf32> to vector<2x8x8xf32>
    %212 = vector.extract_strided_slice %171 {offsets = [0, 48], sizes = [16, 8], strides = [1, 1]} : vector<16x96xf32> to vector<16x8xf32>
    %213 = vector.shape_cast %212 : vector<16x8xf32> to vector<2x8x8xf32>
    %214 = vector.extract_strided_slice %171 {offsets = [0, 80], sizes = [16, 8], strides = [1, 1]} : vector<16x96xf32> to vector<16x8xf32>
    %215 = vector.shape_cast %214 : vector<16x8xf32> to vector<2x8x8xf32>
    "tpu.trace_start"() <{level = 10 : i32, message = "bqd,bkd->bqk"}> : () -> ()
    %cst_79 = arith.constant dense<0.000000e+00> : vector<2x8x8xf32>
    %216 = tpu.matmul %211, %213, %cst_79 {dimension_numbers = #tpu.dot_dimension_numbers<[2], [2], [1], [1], [0, 0, 0, 1, 1, 1], [0], [0]>} : vector<2x8x8xf32>, vector<2x8x8xf32>, vector<2x8x8xf32> -> vector<2x8x8xf32>
    "tpu.trace_stop"() : () -> ()
    %cst_80 = arith.constant dense<0xFF800000> : vector<2x8xf32>
    %217 = vector.multi_reduction <maximumf>, %216, %cst_80 [2] : vector<2x8x8xf32> to vector<2x8xf32>
    %218 = vector.shape_cast %217 : vector<2x8xf32> to vector<2x8x1xf32>
    %219 = vector.broadcast %218 : vector<2x8x1xf32> to vector<2x8x8xf32>
    %220 = arith.subf %216, %219 : vector<2x8x8xf32>
    %221 = math.exp %220 : vector<2x8x8xf32>
    %cst_81 = arith.constant dense<0.000000e+00> : vector<2x8xf32>
    %222 = vector.multi_reduction <add>, %221, %cst_81 [2] : vector<2x8x8xf32> to vector<2x8xf32>
    %223 = vector.shape_cast %222 : vector<2x8xf32> to vector<2x8x1xf32>
    "tpu.trace_start"() <{level = 10 : i32, message = "bqk,bkd->bqd"}> : () -> ()
    %cst_82 = arith.constant dense<0.000000e+00> : vector<2x8x8xf32>
    %224 = tpu.matmul %221, %215, %cst_82 {dimension_numbers = #tpu.dot_dimension_numbers<[2], [1], [1], [2], [0, 0, 0, 1, 1, 2], [0], [0]>} : vector<2x8x8xf32>, vector<2x8x8xf32>, vector<2x8x8xf32> -> vector<2x8x8xf32>
    "tpu.trace_stop"() : () -> ()
    %225 = tpu.reciprocal %223 {approx = true} : vector<2x8x1xf32> -> vector<2x8x1xf32>
    %226 = vector.broadcast %225 : vector<2x8x1xf32> to vector<2x8x8xf32>
    %227 = arith.mulf %224, %226 : vector<2x8x8xf32>
    %228 = vector.shape_cast %227 : vector<2x8x8xf32> to vector<16x8xf32>
    %229 = vector.extract_strided_slice %171 {offsets = [0, 24], sizes = [16, 8], strides = [1, 1]} : vector<16x96xf32> to vector<16x8xf32>
    %230 = vector.shape_cast %229 : vector<16x8xf32> to vector<2x8x8xf32>
    %231 = vector.extract_strided_slice %171 {offsets = [0, 56], sizes = [16, 8], strides = [1, 1]} : vector<16x96xf32> to vector<16x8xf32>
    %232 = vector.shape_cast %231 : vector<16x8xf32> to vector<2x8x8xf32>
    %233 = vector.extract_strided_slice %171 {offsets = [0, 88], sizes = [16, 8], strides = [1, 1]} : vector<16x96xf32> to vector<16x8xf32>
    %234 = vector.shape_cast %233 : vector<16x8xf32> to vector<2x8x8xf32>
    "tpu.trace_start"() <{level = 10 : i32, message = "bqd,bkd->bqk"}> : () -> ()
    %cst_83 = arith.constant dense<0.000000e+00> : vector<2x8x8xf32>
    %235 = tpu.matmul %230, %232, %cst_83 {dimension_numbers = #tpu.dot_dimension_numbers<[2], [2], [1], [1], [0, 0, 0, 1, 1, 1], [0], [0]>} : vector<2x8x8xf32>, vector<2x8x8xf32>, vector<2x8x8xf32> -> vector<2x8x8xf32>
    "tpu.trace_stop"() : () -> ()
    %cst_84 = arith.constant dense<0xFF800000> : vector<2x8xf32>
    %236 = vector.multi_reduction <maximumf>, %235, %cst_84 [2] : vector<2x8x8xf32> to vector<2x8xf32>
    %237 = vector.shape_cast %236 : vector<2x8xf32> to vector<2x8x1xf32>
    %238 = vector.broadcast %237 : vector<2x8x1xf32> to vector<2x8x8xf32>
    %239 = arith.subf %235, %238 : vector<2x8x8xf32>
    %240 = math.exp %239 : vector<2x8x8xf32>
    %cst_85 = arith.constant dense<0.000000e+00> : vector<2x8xf32>
    %241 = vector.multi_reduction <add>, %240, %cst_85 [2] : vector<2x8x8xf32> to vector<2x8xf32>
    %242 = vector.shape_cast %241 : vector<2x8xf32> to vector<2x8x1xf32>
    "tpu.trace_start"() <{level = 10 : i32, message = "bqk,bkd->bqd"}> : () -> ()
    %cst_86 = arith.constant dense<0.000000e+00> : vector<2x8x8xf32>
    %243 = tpu.matmul %240, %234, %cst_86 {dimension_numbers = #tpu.dot_dimension_numbers<[2], [1], [1], [2], [0, 0, 0, 1, 1, 2], [0], [0]>} : vector<2x8x8xf32>, vector<2x8x8xf32>, vector<2x8x8xf32> -> vector<2x8x8xf32>
    "tpu.trace_stop"() : () -> ()
    %244 = tpu.reciprocal %242 {approx = true} : vector<2x8x1xf32> -> vector<2x8x1xf32>
    %245 = vector.broadcast %244 : vector<2x8x1xf32> to vector<2x8x8xf32>
    %246 = arith.mulf %243, %245 : vector<2x8x8xf32>
    %247 = vector.shape_cast %246 : vector<2x8x8xf32> to vector<16x8xf32>
    %248 = tpu.concatenate %190, %209, %228, %247 in 1 : vector<16x8xf32>, vector<16x8xf32>, vector<16x8xf32>, vector<16x8xf32> -> vector<16x32xf32>
    %cst_87 = arith.constant dense<0.000000e+00> : vector<16x32xf32>
    %249 = tpu.matmul %248, %144, %cst_87 {dimension_numbers = #tpu.dot_dimension_numbers<[1], [0], [0], [1], [0, 0, 1, 1], [], []>} : vector<16x32xf32>, vector<32x32xf32>, vector<16x32xf32> -> vector<16x32xf32>
    %250 = vector.broadcast %146 : vector<1x32xf32> to vector<16x32xf32>
    %251 = arith.addf %249, %250 : vector<16x32xf32>
    %252 = arith.addf %138, %251 : vector<16x32xf32>
    %cst_88 = arith.constant dense<0.000000e+00> : vector<16xf32>
    %253 = vector.multi_reduction <add>, %252, %cst_88 [1] : vector<16x32xf32> to vector<16xf32>
    %254 = vector.shape_cast %253 : vector<16xf32> to vector<16x1xf32>
    %cst_89 = arith.constant 3.200000e+01 : f32
    %255 = vector.broadcast %cst_89 : f32 to vector<16x1xf32>
    %256 = arith.divf %254, %255 : vector<16x1xf32>
    %257 = vector.broadcast %256 : vector<16x1xf32> to vector<16x32xf32>
    %258 = arith.subf %252, %257 : vector<16x32xf32>
    %259 = arith.mulf %258, %258 : vector<16x32xf32>
    %cst_90 = arith.constant dense<0.000000e+00> : vector<16xf32>
    %260 = vector.multi_reduction <add>, %259, %cst_90 [1] : vector<16x32xf32> to vector<16xf32>
    %261 = vector.shape_cast %260 : vector<16xf32> to vector<16x1xf32>
    %cst_91 = arith.constant 3.200000e+01 : f32
    %262 = vector.broadcast %cst_91 : f32 to vector<16x1xf32>
    %263 = arith.divf %261, %262 : vector<16x1xf32>
    %264 = vector.broadcast %256 : vector<16x1xf32> to vector<16x32xf32>
    %265 = arith.subf %252, %264 : vector<16x32xf32>
    %cst_92 = arith.constant 9.99999974E-6 : f32
    %266 = vector.broadcast %cst_92 : f32 to vector<16x1xf32>
    %267 = arith.addf %263, %266 : vector<16x1xf32>
    %268 = math.rsqrt %267 : vector<16x1xf32>
    %269 = vector.broadcast %268 : vector<16x1xf32> to vector<16x32xf32>
    %270 = arith.mulf %265, %269 : vector<16x32xf32>
    %cst_93 = arith.constant dense<0.000000e+00> : vector<16x32xf32>
    %271 = tpu.matmul %270, %148, %cst_93 {dimension_numbers = #tpu.dot_dimension_numbers<[1], [0], [0], [1], [0, 0, 1, 1], [], []>} : vector<16x32xf32>, vector<32x32xf32>, vector<16x32xf32> -> vector<16x32xf32>
    %272 = vector.broadcast %150 : vector<1x32xf32> to vector<16x32xf32>
    %273 = arith.addf %271, %272 : vector<16x32xf32>
    %cst_94 = arith.constant 0.000000e+00 : f32
    %274 = vector.broadcast %cst_94 : f32 to vector<16x32xf32>
    %275 = arith.maximumf %273, %274 : vector<16x32xf32>
    %276 = arith.addf %275, %138 : vector<16x32xf32>
    %c2 = arith.constant 2 : index
    %c0_95 = arith.constant 0 : index
    %c0_96 = arith.constant 0 : index
    %277 = vector.load %arg1[%c2, %c0_95, %c0_96] : memref<4x32x96xf32, #tpu.memory_space<vmem>>, vector<1x32x96xf32>
    %278 = vector.shape_cast %277 : vector<1x32x96xf32> to vector<32x96xf32>
    %c2_97 = arith.constant 2 : index
    %c0_98 = arith.constant 0 : index
    %c0_99 = arith.constant 0 : index
    %279 = vector.load %arg2[%c2_97, %c0_98, %c0_99] : memref<4x1x96xf32, #tpu.memory_space<vmem>>, vector<1x1x96xf32>
    %280 = vector.shape_cast %279 : vector<1x1x96xf32> to vector<1x96xf32>
    %c2_100 = arith.constant 2 : index
    %c0_101 = arith.constant 0 : index
    %c0_102 = arith.constant 0 : index
    %281 = vector.load %arg3[%c2_100, %c0_101, %c0_102] : memref<4x32x32xf32, #tpu.memory_space<vmem>>, vector<1x32x32xf32>
    %282 = vector.shape_cast %281 : vector<1x32x32xf32> to vector<32x32xf32>
    %c2_103 = arith.constant 2 : index
    %c0_104 = arith.constant 0 : index
    %c0_105 = arith.constant 0 : index
    %283 = vector.load %arg4[%c2_103, %c0_104, %c0_105] : memref<4x1x32xf32, #tpu.memory_space<vmem>>, vector<1x1x32xf32>
    %284 = vector.shape_cast %283 : vector<1x1x32xf32> to vector<1x32xf32>
    %c2_106 = arith.constant 2 : index
    %c0_107 = arith.constant 0 : index
    %c0_108 = arith.constant 0 : index
    %285 = vector.load %arg5[%c2_106, %c0_107, %c0_108] : memref<4x32x32xf32, #tpu.memory_space<vmem>>, vector<1x32x32xf32>
    %286 = vector.shape_cast %285 : vector<1x32x32xf32> to vector<32x32xf32>
    %c2_109 = arith.constant 2 : index
    %c0_110 = arith.constant 0 : index
    %c0_111 = arith.constant 0 : index
    %287 = vector.load %arg6[%c2_109, %c0_110, %c0_111] : memref<4x1x32xf32, #tpu.memory_space<vmem>>, vector<1x1x32xf32>
    %288 = vector.shape_cast %287 : vector<1x1x32xf32> to vector<1x32xf32>
    %cst_112 = arith.constant dense<0.000000e+00> : vector<16xf32>
    %289 = vector.multi_reduction <add>, %276, %cst_112 [1] : vector<16x32xf32> to vector<16xf32>
    %290 = vector.shape_cast %289 : vector<16xf32> to vector<16x1xf32>
    %cst_113 = arith.constant 3.200000e+01 : f32
    %291 = vector.broadcast %cst_113 : f32 to vector<16x1xf32>
    %292 = arith.divf %290, %291 : vector<16x1xf32>
    %293 = vector.broadcast %292 : vector<16x1xf32> to vector<16x32xf32>
    %294 = arith.subf %276, %293 : vector<16x32xf32>
    %295 = arith.mulf %294, %294 : vector<16x32xf32>
    %cst_114 = arith.constant dense<0.000000e+00> : vector<16xf32>
    %296 = vector.multi_reduction <add>, %295, %cst_114 [1] : vector<16x32xf32> to vector<16xf32>
    %297 = vector.shape_cast %296 : vector<16xf32> to vector<16x1xf32>
    %cst_115 = arith.constant 3.200000e+01 : f32
    %298 = vector.broadcast %cst_115 : f32 to vector<16x1xf32>
    %299 = arith.divf %297, %298 : vector<16x1xf32>
    %300 = vector.broadcast %292 : vector<16x1xf32> to vector<16x32xf32>
    %301 = arith.subf %276, %300 : vector<16x32xf32>
    %cst_116 = arith.constant 9.99999974E-6 : f32
    %302 = vector.broadcast %cst_116 : f32 to vector<16x1xf32>
    %303 = arith.addf %299, %302 : vector<16x1xf32>
    %304 = math.rsqrt %303 : vector<16x1xf32>
    %305 = vector.broadcast %304 : vector<16x1xf32> to vector<16x32xf32>
    %306 = arith.mulf %301, %305 : vector<16x32xf32>
    %cst_117 = arith.constant dense<0.000000e+00> : vector<16x96xf32>
    %307 = tpu.matmul %306, %278, %cst_117 {dimension_numbers = #tpu.dot_dimension_numbers<[1], [0], [0], [1], [0, 0, 1, 1], [], []>} : vector<16x32xf32>, vector<32x96xf32>, vector<16x96xf32> -> vector<16x96xf32>
    %308 = vector.broadcast %280 : vector<1x96xf32> to vector<16x96xf32>
    %309 = arith.addf %307, %308 : vector<16x96xf32>
    %310 = vector.extract_strided_slice %309 {offsets = [0, 0], sizes = [16, 8], strides = [1, 1]} : vector<16x96xf32> to vector<16x8xf32>
    %311 = vector.shape_cast %310 : vector<16x8xf32> to vector<2x8x8xf32>
    %312 = vector.extract_strided_slice %309 {offsets = [0, 32], sizes = [16, 8], strides = [1, 1]} : vector<16x96xf32> to vector<16x8xf32>
    %313 = vector.shape_cast %312 : vector<16x8xf32> to vector<2x8x8xf32>
    %314 = vector.extract_strided_slice %309 {offsets = [0, 64], sizes = [16, 8], strides = [1, 1]} : vector<16x96xf32> to vector<16x8xf32>
    %315 = vector.shape_cast %314 : vector<16x8xf32> to vector<2x8x8xf32>
    "tpu.trace_start"() <{level = 10 : i32, message = "bqd,bkd->bqk"}> : () -> ()
    %cst_118 = arith.constant dense<0.000000e+00> : vector<2x8x8xf32>
    %316 = tpu.matmul %311, %313, %cst_118 {dimension_numbers = #tpu.dot_dimension_numbers<[2], [2], [1], [1], [0, 0, 0, 1, 1, 1], [0], [0]>} : vector<2x8x8xf32>, vector<2x8x8xf32>, vector<2x8x8xf32> -> vector<2x8x8xf32>
    "tpu.trace_stop"() : () -> ()
    %cst_119 = arith.constant dense<0xFF800000> : vector<2x8xf32>
    %317 = vector.multi_reduction <maximumf>, %316, %cst_119 [2] : vector<2x8x8xf32> to vector<2x8xf32>
    %318 = vector.shape_cast %317 : vector<2x8xf32> to vector<2x8x1xf32>
    %319 = vector.broadcast %318 : vector<2x8x1xf32> to vector<2x8x8xf32>
    %320 = arith.subf %316, %319 : vector<2x8x8xf32>
    %321 = math.exp %320 : vector<2x8x8xf32>
    %cst_120 = arith.constant dense<0.000000e+00> : vector<2x8xf32>
    %322 = vector.multi_reduction <add>, %321, %cst_120 [2] : vector<2x8x8xf32> to vector<2x8xf32>
    %323 = vector.shape_cast %322 : vector<2x8xf32> to vector<2x8x1xf32>
    "tpu.trace_start"() <{level = 10 : i32, message = "bqk,bkd->bqd"}> : () -> ()
    %cst_121 = arith.constant dense<0.000000e+00> : vector<2x8x8xf32>
    %324 = tpu.matmul %321, %315, %cst_121 {dimension_numbers = #tpu.dot_dimension_numbers<[2], [1], [1], [2], [0, 0, 0, 1, 1, 2], [0], [0]>} : vector<2x8x8xf32>, vector<2x8x8xf32>, vector<2x8x8xf32> -> vector<2x8x8xf32>
    "tpu.trace_stop"() : () -> ()
    %325 = tpu.reciprocal %323 {approx = true} : vector<2x8x1xf32> -> vector<2x8x1xf32>
    %326 = vector.broadcast %325 : vector<2x8x1xf32> to vector<2x8x8xf32>
    %327 = arith.mulf %324, %326 : vector<2x8x8xf32>
    %328 = vector.shape_cast %327 : vector<2x8x8xf32> to vector<16x8xf32>
    %329 = vector.extract_strided_slice %309 {offsets = [0, 8], sizes = [16, 8], strides = [1, 1]} : vector<16x96xf32> to vector<16x8xf32>
    %330 = vector.shape_cast %329 : vector<16x8xf32> to vector<2x8x8xf32>
    %331 = vector.extract_strided_slice %309 {offsets = [0, 40], sizes = [16, 8], strides = [1, 1]} : vector<16x96xf32> to vector<16x8xf32>
    %332 = vector.shape_cast %331 : vector<16x8xf32> to vector<2x8x8xf32>
    %333 = vector.extract_strided_slice %309 {offsets = [0, 72], sizes = [16, 8], strides = [1, 1]} : vector<16x96xf32> to vector<16x8xf32>
    %334 = vector.shape_cast %333 : vector<16x8xf32> to vector<2x8x8xf32>
    "tpu.trace_start"() <{level = 10 : i32, message = "bqd,bkd->bqk"}> : () -> ()
    %cst_122 = arith.constant dense<0.000000e+00> : vector<2x8x8xf32>
    %335 = tpu.matmul %330, %332, %cst_122 {dimension_numbers = #tpu.dot_dimension_numbers<[2], [2], [1], [1], [0, 0, 0, 1, 1, 1], [0], [0]>} : vector<2x8x8xf32>, vector<2x8x8xf32>, vector<2x8x8xf32> -> vector<2x8x8xf32>
    "tpu.trace_stop"() : () -> ()
    %cst_123 = arith.constant dense<0xFF800000> : vector<2x8xf32>
    %336 = vector.multi_reduction <maximumf>, %335, %cst_123 [2] : vector<2x8x8xf32> to vector<2x8xf32>
    %337 = vector.shape_cast %336 : vector<2x8xf32> to vector<2x8x1xf32>
    %338 = vector.broadcast %337 : vector<2x8x1xf32> to vector<2x8x8xf32>
    %339 = arith.subf %335, %338 : vector<2x8x8xf32>
    %340 = math.exp %339 : vector<2x8x8xf32>
    %cst_124 = arith.constant dense<0.000000e+00> : vector<2x8xf32>
    %341 = vector.multi_reduction <add>, %340, %cst_124 [2] : vector<2x8x8xf32> to vector<2x8xf32>
    %342 = vector.shape_cast %341 : vector<2x8xf32> to vector<2x8x1xf32>
    "tpu.trace_start"() <{level = 10 : i32, message = "bqk,bkd->bqd"}> : () -> ()
    %cst_125 = arith.constant dense<0.000000e+00> : vector<2x8x8xf32>
    %343 = tpu.matmul %340, %334, %cst_125 {dimension_numbers = #tpu.dot_dimension_numbers<[2], [1], [1], [2], [0, 0, 0, 1, 1, 2], [0], [0]>} : vector<2x8x8xf32>, vector<2x8x8xf32>, vector<2x8x8xf32> -> vector<2x8x8xf32>
    "tpu.trace_stop"() : () -> ()
    %344 = tpu.reciprocal %342 {approx = true} : vector<2x8x1xf32> -> vector<2x8x1xf32>
    %345 = vector.broadcast %344 : vector<2x8x1xf32> to vector<2x8x8xf32>
    %346 = arith.mulf %343, %345 : vector<2x8x8xf32>
    %347 = vector.shape_cast %346 : vector<2x8x8xf32> to vector<16x8xf32>
    %348 = vector.extract_strided_slice %309 {offsets = [0, 16], sizes = [16, 8], strides = [1, 1]} : vector<16x96xf32> to vector<16x8xf32>
    %349 = vector.shape_cast %348 : vector<16x8xf32> to vector<2x8x8xf32>
    %350 = vector.extract_strided_slice %309 {offsets = [0, 48], sizes = [16, 8], strides = [1, 1]} : vector<16x96xf32> to vector<16x8xf32>
    %351 = vector.shape_cast %350 : vector<16x8xf32> to vector<2x8x8xf32>
    %352 = vector.extract_strided_slice %309 {offsets = [0, 80], sizes = [16, 8], strides = [1, 1]} : vector<16x96xf32> to vector<16x8xf32>
    %353 = vector.shape_cast %352 : vector<16x8xf32> to vector<2x8x8xf32>
    "tpu.trace_start"() <{level = 10 : i32, message = "bqd,bkd->bqk"}> : () -> ()
    %cst_126 = arith.constant dense<0.000000e+00> : vector<2x8x8xf32>
    %354 = tpu.matmul %349, %351, %cst_126 {dimension_numbers = #tpu.dot_dimension_numbers<[2], [2], [1], [1], [0, 0, 0, 1, 1, 1], [0], [0]>} : vector<2x8x8xf32>, vector<2x8x8xf32>, vector<2x8x8xf32> -> vector<2x8x8xf32>
    "tpu.trace_stop"() : () -> ()
    %cst_127 = arith.constant dense<0xFF800000> : vector<2x8xf32>
    %355 = vector.multi_reduction <maximumf>, %354, %cst_127 [2] : vector<2x8x8xf32> to vector<2x8xf32>
    %356 = vector.shape_cast %355 : vector<2x8xf32> to vector<2x8x1xf32>
    %357 = vector.broadcast %356 : vector<2x8x1xf32> to vector<2x8x8xf32>
    %358 = arith.subf %354, %357 : vector<2x8x8xf32>
    %359 = math.exp %358 : vector<2x8x8xf32>
    %cst_128 = arith.constant dense<0.000000e+00> : vector<2x8xf32>
    %360 = vector.multi_reduction <add>, %359, %cst_128 [2] : vector<2x8x8xf32> to vector<2x8xf32>
    %361 = vector.shape_cast %360 : vector<2x8xf32> to vector<2x8x1xf32>
    "tpu.trace_start"() <{level = 10 : i32, message = "bqk,bkd->bqd"}> : () -> ()
    %cst_129 = arith.constant dense<0.000000e+00> : vector<2x8x8xf32>
    %362 = tpu.matmul %359, %353, %cst_129 {dimension_numbers = #tpu.dot_dimension_numbers<[2], [1], [1], [2], [0, 0, 0, 1, 1, 2], [0], [0]>} : vector<2x8x8xf32>, vector<2x8x8xf32>, vector<2x8x8xf32> -> vector<2x8x8xf32>
    "tpu.trace_stop"() : () -> ()
    %363 = tpu.reciprocal %361 {approx = true} : vector<2x8x1xf32> -> vector<2x8x1xf32>
    %364 = vector.broadcast %363 : vector<2x8x1xf32> to vector<2x8x8xf32>
    %365 = arith.mulf %362, %364 : vector<2x8x8xf32>
    %366 = vector.shape_cast %365 : vector<2x8x8xf32> to vector<16x8xf32>
    %367 = vector.extract_strided_slice %309 {offsets = [0, 24], sizes = [16, 8], strides = [1, 1]} : vector<16x96xf32> to vector<16x8xf32>
    %368 = vector.shape_cast %367 : vector<16x8xf32> to vector<2x8x8xf32>
    %369 = vector.extract_strided_slice %309 {offsets = [0, 56], sizes = [16, 8], strides = [1, 1]} : vector<16x96xf32> to vector<16x8xf32>
    %370 = vector.shape_cast %369 : vector<16x8xf32> to vector<2x8x8xf32>
    %371 = vector.extract_strided_slice %309 {offsets = [0, 88], sizes = [16, 8], strides = [1, 1]} : vector<16x96xf32> to vector<16x8xf32>
    %372 = vector.shape_cast %371 : vector<16x8xf32> to vector<2x8x8xf32>
    "tpu.trace_start"() <{level = 10 : i32, message = "bqd,bkd->bqk"}> : () -> ()
    %cst_130 = arith.constant dense<0.000000e+00> : vector<2x8x8xf32>
    %373 = tpu.matmul %368, %370, %cst_130 {dimension_numbers = #tpu.dot_dimension_numbers<[2], [2], [1], [1], [0, 0, 0, 1, 1, 1], [0], [0]>} : vector<2x8x8xf32>, vector<2x8x8xf32>, vector<2x8x8xf32> -> vector<2x8x8xf32>
    "tpu.trace_stop"() : () -> ()
    %cst_131 = arith.constant dense<0xFF800000> : vector<2x8xf32>
    %374 = vector.multi_reduction <maximumf>, %373, %cst_131 [2] : vector<2x8x8xf32> to vector<2x8xf32>
    %375 = vector.shape_cast %374 : vector<2x8xf32> to vector<2x8x1xf32>
    %376 = vector.broadcast %375 : vector<2x8x1xf32> to vector<2x8x8xf32>
    %377 = arith.subf %373, %376 : vector<2x8x8xf32>
    %378 = math.exp %377 : vector<2x8x8xf32>
    %cst_132 = arith.constant dense<0.000000e+00> : vector<2x8xf32>
    %379 = vector.multi_reduction <add>, %378, %cst_132 [2] : vector<2x8x8xf32> to vector<2x8xf32>
    %380 = vector.shape_cast %379 : vector<2x8xf32> to vector<2x8x1xf32>
    "tpu.trace_start"() <{level = 10 : i32, message = "bqk,bkd->bqd"}> : () -> ()
    %cst_133 = arith.constant dense<0.000000e+00> : vector<2x8x8xf32>
    %381 = tpu.matmul %378, %372, %cst_133 {dimension_numbers = #tpu.dot_dimension_numbers<[2], [1], [1], [2], [0, 0, 0, 1, 1, 2], [0], [0]>} : vector<2x8x8xf32>, vector<2x8x8xf32>, vector<2x8x8xf32> -> vector<2x8x8xf32>
    "tpu.trace_stop"() : () -> ()
    %382 = tpu.reciprocal %380 {approx = true} : vector<2x8x1xf32> -> vector<2x8x1xf32>
    %383 = vector.broadcast %382 : vector<2x8x1xf32> to vector<2x8x8xf32>
    %384 = arith.mulf %381, %383 : vector<2x8x8xf32>
    %385 = vector.shape_cast %384 : vector<2x8x8xf32> to vector<16x8xf32>
    %386 = tpu.concatenate %328, %347, %366, %385 in 1 : vector<16x8xf32>, vector<16x8xf32>, vector<16x8xf32>, vector<16x8xf32> -> vector<16x32xf32>
    %cst_134 = arith.constant dense<0.000000e+00> : vector<16x32xf32>
    %387 = tpu.matmul %386, %282, %cst_134 {dimension_numbers = #tpu.dot_dimension_numbers<[1], [0], [0], [1], [0, 0, 1, 1], [], []>} : vector<16x32xf32>, vector<32x32xf32>, vector<16x32xf32> -> vector<16x32xf32>
    %388 = vector.broadcast %284 : vector<1x32xf32> to vector<16x32xf32>
    %389 = arith.addf %387, %388 : vector<16x32xf32>
    %390 = arith.addf %276, %389 : vector<16x32xf32>
    %cst_135 = arith.constant dense<0.000000e+00> : vector<16xf32>
    %391 = vector.multi_reduction <add>, %390, %cst_135 [1] : vector<16x32xf32> to vector<16xf32>
    %392 = vector.shape_cast %391 : vector<16xf32> to vector<16x1xf32>
    %cst_136 = arith.constant 3.200000e+01 : f32
    %393 = vector.broadcast %cst_136 : f32 to vector<16x1xf32>
    %394 = arith.divf %392, %393 : vector<16x1xf32>
    %395 = vector.broadcast %394 : vector<16x1xf32> to vector<16x32xf32>
    %396 = arith.subf %390, %395 : vector<16x32xf32>
    %397 = arith.mulf %396, %396 : vector<16x32xf32>
    %cst_137 = arith.constant dense<0.000000e+00> : vector<16xf32>
    %398 = vector.multi_reduction <add>, %397, %cst_137 [1] : vector<16x32xf32> to vector<16xf32>
    %399 = vector.shape_cast %398 : vector<16xf32> to vector<16x1xf32>
    %cst_138 = arith.constant 3.200000e+01 : f32
    %400 = vector.broadcast %cst_138 : f32 to vector<16x1xf32>
    %401 = arith.divf %399, %400 : vector<16x1xf32>
    %402 = vector.broadcast %394 : vector<16x1xf32> to vector<16x32xf32>
    %403 = arith.subf %390, %402 : vector<16x32xf32>
    %cst_139 = arith.constant 9.99999974E-6 : f32
    %404 = vector.broadcast %cst_139 : f32 to vector<16x1xf32>
    %405 = arith.addf %401, %404 : vector<16x1xf32>
    %406 = math.rsqrt %405 : vector<16x1xf32>
    %407 = vector.broadcast %406 : vector<16x1xf32> to vector<16x32xf32>
    %408 = arith.mulf %403, %407 : vector<16x32xf32>
    %cst_140 = arith.constant dense<0.000000e+00> : vector<16x32xf32>
    %409 = tpu.matmul %408, %286, %cst_140 {dimension_numbers = #tpu.dot_dimension_numbers<[1], [0], [0], [1], [0, 0, 1, 1], [], []>} : vector<16x32xf32>, vector<32x32xf32>, vector<16x32xf32> -> vector<16x32xf32>
    %410 = vector.broadcast %288 : vector<1x32xf32> to vector<16x32xf32>
    %411 = arith.addf %409, %410 : vector<16x32xf32>
    %cst_141 = arith.constant 0.000000e+00 : f32
    %412 = vector.broadcast %cst_141 : f32 to vector<16x32xf32>
    %413 = arith.maximumf %411, %412 : vector<16x32xf32>
    %414 = arith.addf %413, %276 : vector<16x32xf32>
    %c3 = arith.constant 3 : index
    %c0_142 = arith.constant 0 : index
    %c0_143 = arith.constant 0 : index
    %415 = vector.load %arg1[%c3, %c0_142, %c0_143] : memref<4x32x96xf32, #tpu.memory_space<vmem>>, vector<1x32x96xf32>
    %416 = vector.shape_cast %415 : vector<1x32x96xf32> to vector<32x96xf32>
    %c3_144 = arith.constant 3 : index
    %c0_145 = arith.constant 0 : index
    %c0_146 = arith.constant 0 : index
    %417 = vector.load %arg2[%c3_144, %c0_145, %c0_146] : memref<4x1x96xf32, #tpu.memory_space<vmem>>, vector<1x1x96xf32>
    %418 = vector.shape_cast %417 : vector<1x1x96xf32> to vector<1x96xf32>
    %c3_147 = arith.constant 3 : index
    %c0_148 = arith.constant 0 : index
    %c0_149 = arith.constant 0 : index
    %419 = vector.load %arg3[%c3_147, %c0_148, %c0_149] : memref<4x32x32xf32, #tpu.memory_space<vmem>>, vector<1x32x32xf32>
    %420 = vector.shape_cast %419 : vector<1x32x32xf32> to vector<32x32xf32>
    %c3_150 = arith.constant 3 : index
    %c0_151 = arith.constant 0 : index
    %c0_152 = arith.constant 0 : index
    %421 = vector.load %arg4[%c3_150, %c0_151, %c0_152] : memref<4x1x32xf32, #tpu.memory_space<vmem>>, vector<1x1x32xf32>
    %422 = vector.shape_cast %421 : vector<1x1x32xf32> to vector<1x32xf32>
    %c3_153 = arith.constant 3 : index
    %c0_154 = arith.constant 0 : index
    %c0_155 = arith.constant 0 : index
    %423 = vector.load %arg5[%c3_153, %c0_154, %c0_155] : memref<4x32x32xf32, #tpu.memory_space<vmem>>, vector<1x32x32xf32>
    %424 = vector.shape_cast %423 : vector<1x32x32xf32> to vector<32x32xf32>
    %c3_156 = arith.constant 3 : index
    %c0_157 = arith.constant 0 : index
    %c0_158 = arith.constant 0 : index
    %425 = vector.load %arg6[%c3_156, %c0_157, %c0_158] : memref<4x1x32xf32, #tpu.memory_space<vmem>>, vector<1x1x32xf32>
    %426 = vector.shape_cast %425 : vector<1x1x32xf32> to vector<1x32xf32>
    %cst_159 = arith.constant dense<0.000000e+00> : vector<16xf32>
    %427 = vector.multi_reduction <add>, %414, %cst_159 [1] : vector<16x32xf32> to vector<16xf32>
    %428 = vector.shape_cast %427 : vector<16xf32> to vector<16x1xf32>
    %cst_160 = arith.constant 3.200000e+01 : f32
    %429 = vector.broadcast %cst_160 : f32 to vector<16x1xf32>
    %430 = arith.divf %428, %429 : vector<16x1xf32>
    %431 = vector.broadcast %430 : vector<16x1xf32> to vector<16x32xf32>
    %432 = arith.subf %414, %431 : vector<16x32xf32>
    %433 = arith.mulf %432, %432 : vector<16x32xf32>
    %cst_161 = arith.constant dense<0.000000e+00> : vector<16xf32>
    %434 = vector.multi_reduction <add>, %433, %cst_161 [1] : vector<16x32xf32> to vector<16xf32>
    %435 = vector.shape_cast %434 : vector<16xf32> to vector<16x1xf32>
    %cst_162 = arith.constant 3.200000e+01 : f32
    %436 = vector.broadcast %cst_162 : f32 to vector<16x1xf32>
    %437 = arith.divf %435, %436 : vector<16x1xf32>
    %438 = vector.broadcast %430 : vector<16x1xf32> to vector<16x32xf32>
    %439 = arith.subf %414, %438 : vector<16x32xf32>
    %cst_163 = arith.constant 9.99999974E-6 : f32
    %440 = vector.broadcast %cst_163 : f32 to vector<16x1xf32>
    %441 = arith.addf %437, %440 : vector<16x1xf32>
    %442 = math.rsqrt %441 : vector<16x1xf32>
    %443 = vector.broadcast %442 : vector<16x1xf32> to vector<16x32xf32>
    %444 = arith.mulf %439, %443 : vector<16x32xf32>
    %cst_164 = arith.constant dense<0.000000e+00> : vector<16x96xf32>
    %445 = tpu.matmul %444, %416, %cst_164 {dimension_numbers = #tpu.dot_dimension_numbers<[1], [0], [0], [1], [0, 0, 1, 1], [], []>} : vector<16x32xf32>, vector<32x96xf32>, vector<16x96xf32> -> vector<16x96xf32>
    %446 = vector.broadcast %418 : vector<1x96xf32> to vector<16x96xf32>
    %447 = arith.addf %445, %446 : vector<16x96xf32>
    %448 = vector.extract_strided_slice %447 {offsets = [0, 0], sizes = [16, 8], strides = [1, 1]} : vector<16x96xf32> to vector<16x8xf32>
    %449 = vector.shape_cast %448 : vector<16x8xf32> to vector<2x8x8xf32>
    %450 = vector.extract_strided_slice %447 {offsets = [0, 32], sizes = [16, 8], strides = [1, 1]} : vector<16x96xf32> to vector<16x8xf32>
    %451 = vector.shape_cast %450 : vector<16x8xf32> to vector<2x8x8xf32>
    %452 = vector.extract_strided_slice %447 {offsets = [0, 64], sizes = [16, 8], strides = [1, 1]} : vector<16x96xf32> to vector<16x8xf32>
    %453 = vector.shape_cast %452 : vector<16x8xf32> to vector<2x8x8xf32>
    "tpu.trace_start"() <{level = 10 : i32, message = "bqd,bkd->bqk"}> : () -> ()
    %cst_165 = arith.constant dense<0.000000e+00> : vector<2x8x8xf32>
    %454 = tpu.matmul %449, %451, %cst_165 {dimension_numbers = #tpu.dot_dimension_numbers<[2], [2], [1], [1], [0, 0, 0, 1, 1, 1], [0], [0]>} : vector<2x8x8xf32>, vector<2x8x8xf32>, vector<2x8x8xf32> -> vector<2x8x8xf32>
    "tpu.trace_stop"() : () -> ()
    %cst_166 = arith.constant dense<0xFF800000> : vector<2x8xf32>
    %455 = vector.multi_reduction <maximumf>, %454, %cst_166 [2] : vector<2x8x8xf32> to vector<2x8xf32>
    %456 = vector.shape_cast %455 : vector<2x8xf32> to vector<2x8x1xf32>
    %457 = vector.broadcast %456 : vector<2x8x1xf32> to vector<2x8x8xf32>
    %458 = arith.subf %454, %457 : vector<2x8x8xf32>
    %459 = math.exp %458 : vector<2x8x8xf32>
    %cst_167 = arith.constant dense<0.000000e+00> : vector<2x8xf32>
    %460 = vector.multi_reduction <add>, %459, %cst_167 [2] : vector<2x8x8xf32> to vector<2x8xf32>
    %461 = vector.shape_cast %460 : vector<2x8xf32> to vector<2x8x1xf32>
    "tpu.trace_start"() <{level = 10 : i32, message = "bqk,bkd->bqd"}> : () -> ()
    %cst_168 = arith.constant dense<0.000000e+00> : vector<2x8x8xf32>
    %462 = tpu.matmul %459, %453, %cst_168 {dimension_numbers = #tpu.dot_dimension_numbers<[2], [1], [1], [2], [0, 0, 0, 1, 1, 2], [0], [0]>} : vector<2x8x8xf32>, vector<2x8x8xf32>, vector<2x8x8xf32> -> vector<2x8x8xf32>
    "tpu.trace_stop"() : () -> ()
    %463 = tpu.reciprocal %461 {approx = true} : vector<2x8x1xf32> -> vector<2x8x1xf32>
    %464 = vector.broadcast %463 : vector<2x8x1xf32> to vector<2x8x8xf32>
    %465 = arith.mulf %462, %464 : vector<2x8x8xf32>
    %466 = vector.shape_cast %465 : vector<2x8x8xf32> to vector<16x8xf32>
    %467 = vector.extract_strided_slice %447 {offsets = [0, 8], sizes = [16, 8], strides = [1, 1]} : vector<16x96xf32> to vector<16x8xf32>
    %468 = vector.shape_cast %467 : vector<16x8xf32> to vector<2x8x8xf32>
    %469 = vector.extract_strided_slice %447 {offsets = [0, 40], sizes = [16, 8], strides = [1, 1]} : vector<16x96xf32> to vector<16x8xf32>
    %470 = vector.shape_cast %469 : vector<16x8xf32> to vector<2x8x8xf32>
    %471 = vector.extract_strided_slice %447 {offsets = [0, 72], sizes = [16, 8], strides = [1, 1]} : vector<16x96xf32> to vector<16x8xf32>
    %472 = vector.shape_cast %471 : vector<16x8xf32> to vector<2x8x8xf32>
    "tpu.trace_start"() <{level = 10 : i32, message = "bqd,bkd->bqk"}> : () -> ()
    %cst_169 = arith.constant dense<0.000000e+00> : vector<2x8x8xf32>
    %473 = tpu.matmul %468, %470, %cst_169 {dimension_numbers = #tpu.dot_dimension_numbers<[2], [2], [1], [1], [0, 0, 0, 1, 1, 1], [0], [0]>} : vector<2x8x8xf32>, vector<2x8x8xf32>, vector<2x8x8xf32> -> vector<2x8x8xf32>
    "tpu.trace_stop"() : () -> ()
    %cst_170 = arith.constant dense<0xFF800000> : vector<2x8xf32>
    %474 = vector.multi_reduction <maximumf>, %473, %cst_170 [2] : vector<2x8x8xf32> to vector<2x8xf32>
    %475 = vector.shape_cast %474 : vector<2x8xf32> to vector<2x8x1xf32>
    %476 = vector.broadcast %475 : vector<2x8x1xf32> to vector<2x8x8xf32>
    %477 = arith.subf %473, %476 : vector<2x8x8xf32>
    %478 = math.exp %477 : vector<2x8x8xf32>
    %cst_171 = arith.constant dense<0.000000e+00> : vector<2x8xf32>
    %479 = vector.multi_reduction <add>, %478, %cst_171 [2] : vector<2x8x8xf32> to vector<2x8xf32>
    %480 = vector.shape_cast %479 : vector<2x8xf32> to vector<2x8x1xf32>
    "tpu.trace_start"() <{level = 10 : i32, message = "bqk,bkd->bqd"}> : () -> ()
    %cst_172 = arith.constant dense<0.000000e+00> : vector<2x8x8xf32>
    %481 = tpu.matmul %478, %472, %cst_172 {dimension_numbers = #tpu.dot_dimension_numbers<[2], [1], [1], [2], [0, 0, 0, 1, 1, 2], [0], [0]>} : vector<2x8x8xf32>, vector<2x8x8xf32>, vector<2x8x8xf32> -> vector<2x8x8xf32>
    "tpu.trace_stop"() : () -> ()
    %482 = tpu.reciprocal %480 {approx = true} : vector<2x8x1xf32> -> vector<2x8x1xf32>
    %483 = vector.broadcast %482 : vector<2x8x1xf32> to vector<2x8x8xf32>
    %484 = arith.mulf %481, %483 : vector<2x8x8xf32>
    %485 = vector.shape_cast %484 : vector<2x8x8xf32> to vector<16x8xf32>
    %486 = vector.extract_strided_slice %447 {offsets = [0, 16], sizes = [16, 8], strides = [1, 1]} : vector<16x96xf32> to vector<16x8xf32>
    %487 = vector.shape_cast %486 : vector<16x8xf32> to vector<2x8x8xf32>
    %488 = vector.extract_strided_slice %447 {offsets = [0, 48], sizes = [16, 8], strides = [1, 1]} : vector<16x96xf32> to vector<16x8xf32>
    %489 = vector.shape_cast %488 : vector<16x8xf32> to vector<2x8x8xf32>
    %490 = vector.extract_strided_slice %447 {offsets = [0, 80], sizes = [16, 8], strides = [1, 1]} : vector<16x96xf32> to vector<16x8xf32>
    %491 = vector.shape_cast %490 : vector<16x8xf32> to vector<2x8x8xf32>
    "tpu.trace_start"() <{level = 10 : i32, message = "bqd,bkd->bqk"}> : () -> ()
    %cst_173 = arith.constant dense<0.000000e+00> : vector<2x8x8xf32>
    %492 = tpu.matmul %487, %489, %cst_173 {dimension_numbers = #tpu.dot_dimension_numbers<[2], [2], [1], [1], [0, 0, 0, 1, 1, 1], [0], [0]>} : vector<2x8x8xf32>, vector<2x8x8xf32>, vector<2x8x8xf32> -> vector<2x8x8xf32>
    "tpu.trace_stop"() : () -> ()
    %cst_174 = arith.constant dense<0xFF800000> : vector<2x8xf32>
    %493 = vector.multi_reduction <maximumf>, %492, %cst_174 [2] : vector<2x8x8xf32> to vector<2x8xf32>
    %494 = vector.shape_cast %493 : vector<2x8xf32> to vector<2x8x1xf32>
    %495 = vector.broadcast %494 : vector<2x8x1xf32> to vector<2x8x8xf32>
    %496 = arith.subf %492, %495 : vector<2x8x8xf32>
    %497 = math.exp %496 : vector<2x8x8xf32>
    %cst_175 = arith.constant dense<0.000000e+00> : vector<2x8xf32>
    %498 = vector.multi_reduction <add>, %497, %cst_175 [2] : vector<2x8x8xf32> to vector<2x8xf32>
    %499 = vector.shape_cast %498 : vector<2x8xf32> to vector<2x8x1xf32>
    "tpu.trace_start"() <{level = 10 : i32, message = "bqk,bkd->bqd"}> : () -> ()
    %cst_176 = arith.constant dense<0.000000e+00> : vector<2x8x8xf32>
    %500 = tpu.matmul %497, %491, %cst_176 {dimension_numbers = #tpu.dot_dimension_numbers<[2], [1], [1], [2], [0, 0, 0, 1, 1, 2], [0], [0]>} : vector<2x8x8xf32>, vector<2x8x8xf32>, vector<2x8x8xf32> -> vector<2x8x8xf32>
    "tpu.trace_stop"() : () -> ()
    %501 = tpu.reciprocal %499 {approx = true} : vector<2x8x1xf32> -> vector<2x8x1xf32>
    %502 = vector.broadcast %501 : vector<2x8x1xf32> to vector<2x8x8xf32>
    %503 = arith.mulf %500, %502 : vector<2x8x8xf32>
    %504 = vector.shape_cast %503 : vector<2x8x8xf32> to vector<16x8xf32>
    %505 = vector.extract_strided_slice %447 {offsets = [0, 24], sizes = [16, 8], strides = [1, 1]} : vector<16x96xf32> to vector<16x8xf32>
    %506 = vector.shape_cast %505 : vector<16x8xf32> to vector<2x8x8xf32>
    %507 = vector.extract_strided_slice %447 {offsets = [0, 56], sizes = [16, 8], strides = [1, 1]} : vector<16x96xf32> to vector<16x8xf32>
    %508 = vector.shape_cast %507 : vector<16x8xf32> to vector<2x8x8xf32>
    %509 = vector.extract_strided_slice %447 {offsets = [0, 88], sizes = [16, 8], strides = [1, 1]} : vector<16x96xf32> to vector<16x8xf32>
    %510 = vector.shape_cast %509 : vector<16x8xf32> to vector<2x8x8xf32>
    "tpu.trace_start"() <{level = 10 : i32, message = "bqd,bkd->bqk"}> : () -> ()
    %cst_177 = arith.constant dense<0.000000e+00> : vector<2x8x8xf32>
    %511 = tpu.matmul %506, %508, %cst_177 {dimension_numbers = #tpu.dot_dimension_numbers<[2], [2], [1], [1], [0, 0, 0, 1, 1, 1], [0], [0]>} : vector<2x8x8xf32>, vector<2x8x8xf32>, vector<2x8x8xf32> -> vector<2x8x8xf32>
    "tpu.trace_stop"() : () -> ()
    %cst_178 = arith.constant dense<0xFF800000> : vector<2x8xf32>
    %512 = vector.multi_reduction <maximumf>, %511, %cst_178 [2] : vector<2x8x8xf32> to vector<2x8xf32>
    %513 = vector.shape_cast %512 : vector<2x8xf32> to vector<2x8x1xf32>
    %514 = vector.broadcast %513 : vector<2x8x1xf32> to vector<2x8x8xf32>
    %515 = arith.subf %511, %514 : vector<2x8x8xf32>
    %516 = math.exp %515 : vector<2x8x8xf32>
    %cst_179 = arith.constant dense<0.000000e+00> : vector<2x8xf32>
    %517 = vector.multi_reduction <add>, %516, %cst_179 [2] : vector<2x8x8xf32> to vector<2x8xf32>
    %518 = vector.shape_cast %517 : vector<2x8xf32> to vector<2x8x1xf32>
    "tpu.trace_start"() <{level = 10 : i32, message = "bqk,bkd->bqd"}> : () -> ()
    %cst_180 = arith.constant dense<0.000000e+00> : vector<2x8x8xf32>
    %519 = tpu.matmul %516, %510, %cst_180 {dimension_numbers = #tpu.dot_dimension_numbers<[2], [1], [1], [2], [0, 0, 0, 1, 1, 2], [0], [0]>} : vector<2x8x8xf32>, vector<2x8x8xf32>, vector<2x8x8xf32> -> vector<2x8x8xf32>
    "tpu.trace_stop"() : () -> ()
    %520 = tpu.reciprocal %518 {approx = true} : vector<2x8x1xf32> -> vector<2x8x1xf32>
    %521 = vector.broadcast %520 : vector<2x8x1xf32> to vector<2x8x8xf32>
    %522 = arith.mulf %519, %521 : vector<2x8x8xf32>
    %523 = vector.shape_cast %522 : vector<2x8x8xf32> to vector<16x8xf32>
    %524 = tpu.concatenate %466, %485, %504, %523 in 1 : vector<16x8xf32>, vector<16x8xf32>, vector<16x8xf32>, vector<16x8xf32> -> vector<16x32xf32>
    %cst_181 = arith.constant dense<0.000000e+00> : vector<16x32xf32>
    %525 = tpu.matmul %524, %420, %cst_181 {dimension_numbers = #tpu.dot_dimension_numbers<[1], [0], [0], [1], [0, 0, 1, 1], [], []>} : vector<16x32xf32>, vector<32x32xf32>, vector<16x32xf32> -> vector<16x32xf32>
    %526 = vector.broadcast %422 : vector<1x32xf32> to vector<16x32xf32>
    %527 = arith.addf %525, %526 : vector<16x32xf32>
    %528 = arith.addf %414, %527 : vector<16x32xf32>
    %cst_182 = arith.constant dense<0.000000e+00> : vector<16xf32>
    %529 = vector.multi_reduction <add>, %528, %cst_182 [1] : vector<16x32xf32> to vector<16xf32>
    %530 = vector.shape_cast %529 : vector<16xf32> to vector<16x1xf32>
    %cst_183 = arith.constant 3.200000e+01 : f32
    %531 = vector.broadcast %cst_183 : f32 to vector<16x1xf32>
    %532 = arith.divf %530, %531 : vector<16x1xf32>
    %533 = vector.broadcast %532 : vector<16x1xf32> to vector<16x32xf32>
    %534 = arith.subf %528, %533 : vector<16x32xf32>
    %535 = arith.mulf %534, %534 : vector<16x32xf32>
    %cst_184 = arith.constant dense<0.000000e+00> : vector<16xf32>
    %536 = vector.multi_reduction <add>, %535, %cst_184 [1] : vector<16x32xf32> to vector<16xf32>
    %537 = vector.shape_cast %536 : vector<16xf32> to vector<16x1xf32>
    %cst_185 = arith.constant 3.200000e+01 : f32
    %538 = vector.broadcast %cst_185 : f32 to vector<16x1xf32>
    %539 = arith.divf %537, %538 : vector<16x1xf32>
    %540 = vector.broadcast %532 : vector<16x1xf32> to vector<16x32xf32>
    %541 = arith.subf %528, %540 : vector<16x32xf32>
    %cst_186 = arith.constant 9.99999974E-6 : f32
    %542 = vector.broadcast %cst_186 : f32 to vector<16x1xf32>
    %543 = arith.addf %539, %542 : vector<16x1xf32>
    %544 = math.rsqrt %543 : vector<16x1xf32>
    %545 = vector.broadcast %544 : vector<16x1xf32> to vector<16x32xf32>
    %546 = arith.mulf %541, %545 : vector<16x32xf32>
    %cst_187 = arith.constant dense<0.000000e+00> : vector<16x32xf32>
    %547 = tpu.matmul %546, %424, %cst_187 {dimension_numbers = #tpu.dot_dimension_numbers<[1], [0], [0], [1], [0, 0, 1, 1], [], []>} : vector<16x32xf32>, vector<32x32xf32>, vector<16x32xf32> -> vector<16x32xf32>
    %548 = vector.broadcast %426 : vector<1x32xf32> to vector<16x32xf32>
    %549 = arith.addf %547, %548 : vector<16x32xf32>
    %cst_188 = arith.constant 0.000000e+00 : f32
    %550 = vector.broadcast %cst_188 : f32 to vector<16x32xf32>
    %551 = arith.maximumf %549, %550 : vector<16x32xf32>
    %552 = arith.addf %551, %414 : vector<16x32xf32>
    %c0_189 = arith.constant 0 : index
    %c0_190 = arith.constant 0 : index
    %553 = vector.load %arg7[%c0_189, %c0_190] : memref<16x32xf32, #tpu.memory_space<vmem>>, vector<16x32xf32>
    tpu.vector_store %arg7[%c0_189, %c0_190], %552 {strides = array<i32>} : memref<16x32xf32, #tpu.memory_space<vmem>>, vector<16x32xf32>,
    return
  }
}

</mosaic_0001>

<bundles_post_ra>
// kernel: tpu_custom_call.1
= control target key start
LH: loop header
LB: loop body
LE: loop exit
PB: predicated region body
PF: predicated region fallthrough
CT: control target
= control target key end

     0   :  { %12 = vsyncpa [#allocation3], 0  ;;  %s9053_s0 = inlined_call_operand.hbm [shape: f32[16,32], index: 0, kind: input, shape index: {}]   ;;  %s9054_s1 = inlined_call_operand.hbm [shape: f32[4,32,96], index: 1, kind: input, shape index: {}]   ;;  %s9055_s2 = inlined_call_operand.vmem [shape: f32[4,1,96], index: 2, kind: input, shape index: {}]   ;;  %s9056_s3 = inlined_call_operand.hbm [shape: f32[4,32,32], index: 3, kind: input, shape index: {}]   ;;  %s9057_s4 = inlined_call_operand.vmem [shape: f32[4,1,32], index: 4, kind: input, shape index: {}]   ;;  %s9058_s5 = inlined_call_operand.hbm [shape: f32[4,32,32], index: 5, kind: input, shape index: {}]   ;;  %s9059_s6 = inlined_call_operand.vmem [shape: f32[4,1,32], index: 6, kind: input, shape index: {}]   ;;  %s9060_s7 = inlined_call_operand.hbm [shape: f32[16,32], index: 7, kind: output, shape index: {}]  }
   0x1   :  { %13 = vsyncpa [#allocation6], 0 }
   0x2   :  { %14 = vsyncpa [#allocation9], 0 }
   0x3   :  { %15 = vsyncpa [#allocation4], 0  ;;  %s8045_s24 = smov [#allocation5]   ;;  %s8046_s26 = smov [#allocation2]  }
   0x4   :  { %s33_s25 = sshll.u32 %s8045_s24, 4  ;;  %s21_s27 = sshll.u32 %s8046_s26, 4  ;;  %s34_s25 = int_to_ptr.vmem [resolvable:$true] %s33_s25  ;;  %s8107_s27 = int_to_ptr.vmem [resolvable:$true] %s21_s27 }
   0x5   :  { %s7927_s30 = scalar_lea.hbm %s9054_s1, 2048 }
   0x6   :  { %p7928_p0 = scmp.ne.s32.totalorder %s9054_s1, %s7927_s30  ;;  %p7931_p1 = scmp.lt.u32.totalorder %s7927_s30, %s9054_s1 }
   0x8   :  { %p7933_p2 = pnand %p7931_p1, %p7928_p0 }
   0xa   :  { %7936 = shalt.err (!%p7933_p2)
}
   0xb   :  { %s7937_s12 = scalar_lea.vmem %s34_s25, 2048  ;;  %p7942_p4 = scmp.lt.s32.totalorder %s34_s25, %s34_s25 }
   0xc   :  { %p7938_p3 = scmp.ne.s32.totalorder %s34_s25, %s7937_s12  ;;  %p7943_p5 = scmp.lt.s32.totalorder %s7937_s12, %s7937_s12 }
   0xe   :  { %p7944_p6 = por %p7943_p5, %p7942_p4 }
  0x10   :  { %p7945_p7 = pnand %p7944_p6, %p7938_p3 }
  0x12   :  { %7948 = shalt.err (!%p7945_p7)
}
  0x13   :  { %s8047_s13 = smov 128   ;;  %s8048_s14 = smov 8  }
  0x14   :  { %39 = dma.hbm_to_vmem [thread:$0]  %s9054_s1, 2048, %s34_s25, [#allocation6], %s8047_s13, %s8047_s13, %s8048_s14  }
  0x15   :  { %s7949_s19 = scalar_lea.hbm %s9053_s0, 256 }
  0x16   :  { %p7950_p8 = scmp.ne.s32.totalorder %s9053_s0, %s7949_s19  ;;  %p7953_p9 = scmp.lt.u32.totalorder %s7949_s19, %s9053_s0 }
  0x18   :  { %p7955_p10 = pnand %p7953_p9, %p7950_p8 }
  0x1a   :  { %7958 = shalt.err (!%p7955_p10)
}
  0x1b   :  { %s7959_s24 = scalar_lea.vmem %s8107_s27, 256  ;;  %p7964_p12 = scmp.lt.s32.totalorder %s8107_s27, %s8107_s27 }
  0x1c   :  { %p7960_p11 = scmp.ne.s32.totalorder %s8107_s27, %s7959_s24  ;;  %p7965_p13 = scmp.lt.s32.totalorder %s7959_s24, %s7959_s24 }
  0x1e   :  { %p7966_p0 = por %p7965_p13, %p7964_p12 }
  0x20   :  { %p7967_p1 = pnand %p7966_p0, %p7960_p11 }
  0x22   :  { %7970 = shalt.err (!%p7967_p1)
}
  0x23   :  { %27 = dma.hbm_to_vmem [thread:$0]  %s9053_s0, 256, %s8107_s27, [#allocation3], %s8047_s13, %s8047_s13, %s8048_s14  }
  0x24   :  { %s8049_s26 = smov [#allocation7]   ;;  %s8050_s29 = smov [#allocation8]  }
  0x25   :  { %s47_s28 = sshll.u32 %s8049_s26, 4  ;;  %s61_s30 = sshll.u32 %s8050_s29, 4  ;;  %s48_s28 = int_to_ptr.vmem [resolvable:$true] %s47_s28  ;;  %s8144_s30 = int_to_ptr.vmem [resolvable:$true] %s61_s30 }
  0x26   :  { %s7971_s10 = scalar_lea.hbm %s9056_s3, 2048 }
  0x27   :  { %p7972_p2 = scmp.ne.s32.totalorder %s9056_s3, %s7971_s10  ;;  %p7975_p3 = scmp.lt.u32.totalorder %s7971_s10, %s9056_s3 }
  0x29   :  { %p7977_p4 = pnand %p7975_p3, %p7972_p2 }
  0x2b   :  { %7980 = shalt.err (!%p7977_p4)
}
  0x2c   :  { %s7981_s0 = scalar_lea.vmem %s48_s28, 2048  ;;  %p7986_p6 = scmp.lt.s32.totalorder %s48_s28, %s48_s28 }
  0x2d   :  { %p7982_p5 = scmp.ne.s32.totalorder %s48_s28, %s7981_s0  ;;  %p7987_p7 = scmp.lt.s32.totalorder %s7981_s0, %s7981_s0 }
  0x2f   :  { %p7988_p8 = por %p7987_p7, %p7986_p6 }
  0x31   :  { %p7989_p9 = pnand %p7988_p8, %p7982_p5 }
  0x33   :  { %7992 = shalt.err (!%p7989_p9)
}
  0x34   :  { %53 = dma.hbm_to_vmem [thread:$0]  %s9056_s3, 2048, %s48_s28, [#allocation6], %s8047_s13, %s8047_s13, %s8048_s14  }
  0x35   :  { %s7993_s20 = scalar_lea.hbm %s9058_s5, 2048 }
  0x36   :  { %p7994_p10 = scmp.ne.s32.totalorder %s9058_s5, %s7993_s20  ;;  %p7997_p11 = scmp.lt.u32.totalorder %s7993_s20, %s9058_s5 }
  0x38   :  { %p7999_p12 = pnand %p7997_p11, %p7994_p10 }
  0x3a   :  { %8002 = shalt.err (!%p7999_p12)
}
  0x3b   :  { %s8003_s1 = scalar_lea.vmem %s8144_s30, 2048  ;;  %p8008_p0 = scmp.lt.s32.totalorder %s8144_s30, %s8144_s30 }
  0x3c   :  { %p8004_p13 = scmp.ne.s32.totalorder %s8144_s30, %s8003_s1  ;;  %p8009_p1 = scmp.lt.s32.totalorder %s8003_s1, %s8003_s1 }
  0x3e   :  { %p8010_p2 = por %p8009_p1, %p8008_p0 }
  0x40   :  { %p8011_p3 = pnand %p8010_p2, %p8004_p13 }
  0x42   :  { %8014 = shalt.err (!%p8011_p3)
}
  0x43   :  { %67 = dma.hbm_to_vmem [thread:$0]  %s9058_s5, 2048, %s8144_s30, [#allocation9], %s8047_s13, %s8047_s13, %s8048_s14  }
  0x44   :  { %8037 = dma.done.wait [#allocation3], 256  }
  0x45   :  { %8038 = vsyncadd [#allocation3], 4294967040 }
  0x46   :  { %8039 = dma.done.wait [#allocation6], 4096  }
  0x47   :  { %8040 = vsyncadd [#allocation6], 4294963200 }
  0x48   :  { %8041 = dma.done.wait [#allocation9], 2048  }
  0x49   :  { %8042 = vsyncadd [#allocation9], 4294965248  ;;  %vm99_vm0 = vcmask 261120   ;;  %v8181_v0 = vld [vmem:[#allocation2] sm:$0xff]  ;;  %v8183_v1 = vld [vmem:[#allocation2 + $0x8] sm:$0xff]  ;;  %v8051_v30 = vmov 0.0  }
  0x4a   :  { %v100_v2 = vsel %vm99_vm0, %v8181_v0, 0.0  ;;  %v103_v3 = vsel %vm99_vm0, %v8183_v1, 0.0  ;;  %v84_v14 = vld [vmem:[#allocation5] sm:$0xff]  ;;  %v85_v15 = vld [vmem:[#allocation5 + $0x8] sm:$0xff]  ;;  %v86_v16 = vld [vmem:[#allocation5 + $0x10] sm:$0xff]  ;;  %7208 = vmatprep.subr.mxu1 %v8051_v30  ;;  %vm8052_vm1 = vmmov 0  }
  0x4b   :  { %101 = vadd.xlane.f32.xlu0 %v100_v2  ;;  %v7649_v17 = vpack.c.bf16 %v85_v15, %v84_v14  ;;  %v87_v18 = vld [vmem:[#allocation5 + $0x18] sm:$0xff]  ;;  %7210 = vmatprep.mubr.msk.f32.mxu1 %vm8052_vm1, %v8051_v30  ;;  %v6856_v31 = vld [vmem:[%s9055_s2] ss:$0 sm:$0xff]  ;;  %s8053_s28 = smov 96   ;;  %vm217_vm2 = vcmask 64512   ;;  %s8054_s29 = smov 64  }
  0x4c   :  { %v7653_v19 = vpack.c.bf16 %v87_v18, %v86_v16  ;;  %s8055_s30 = smov 88   ;;  %s8056_s8 = smov 120   ;;  %vm1559_vm3 = vcmask 130048   ;;  %vm1562_vm4 = vcmask 195584  }
  0x4d   :  { %7650 = vmatprep.subr.bf16.mxu0 %v7649_v17  ;;  %s8057_s9 = smov 56   ;;  %s8058_s10 = smov 80  }
  0x4e   :  { %7652 = vmatpush3.bf16.msra.mxu0 %v7649_v17  ;;  %s8059_s11 = smov 112   ;;  %s8060_s12 = smov 48  }
  0x4f   :  { %104 = vadd.xlane.f32.xlu0 %v103_v3  ;;  %7654 = vmatprep.subr.bf16.mxu0 %v7653_v19  ;;  %s8061_s15 = smov 72   ;;  %s8062_s16 = smov 104  }
  0x50   :  { %s8063_s0 = smov 40   ;;  %s8064_s27 = smov 16  }
  0x51   :  { %s8065_s17 = smov 24  }
  0x52   :  { %7656 = vmatpush3.bf16.msra.mxu0 %v7653_v19 }
  0x53   :  { %7218 = vmatprep.subr.mxu0 %v8051_v30 }
  0xd8   :  { %v102_v4 = vpop.xlane.xlu0 %101 }
  0xd9   :  { %v107_v5 = vmul.f32 0.03125, %v102_v4 }
  0xdb   :  { %v109_v6 = vsub.f32 %v8181_v0, %v107_v5 }
  0xdc   :  { %v105_v7 = vpop.xlane.xlu0 %104 }
  0xdd   :  { %v108_v8 = vmul.f32 0.03125, %v105_v7  ;;  %v111_v9 = vmul.f32 %v109_v6, %v109_v6 }
  0xdf   :  { %v110_v10 = vsub.f32 %v8183_v1, %v108_v8  ;;  %v113_v11 = vsel %vm99_vm0, %v111_v9, 0.0 }
  0xe0   :  { %114 = vadd.xlane.f32.xlu1 %v113_v11 }
  0xe1   :  { %v112_v12 = vmul.f32 %v110_v10, %v110_v10 }
  0xe3   :  { %v116_v13 = vsel %vm99_vm0, %v112_v12, 0.0 }
  0xe4   :  { %117 = vadd.xlane.f32.xlu1 %v116_v13 }
 0x16d   :  { %v115_v20 = vpop.xlane.xlu1 %114 }
 0x16e   :  { %v119_v21 = vmul.f32 0.03125, %v115_v20 }
 0x170   :  { %v121_v22 = vadd.f32 1e-05, %v119_v21 }
 0x171   :  { %v118_v23 = vpop.xlane.xlu1 %117 }
 0x172   :  { %7767 = vrsqrt.f32 %v121_v22  ;;  %v120_v24 = vmul.f32 0.03125, %v118_v23 }
 0x174   :  { %v122_v25 = vadd.f32 1e-05, %v120_v24 }
 0x176   :  { %7769 = vrsqrt.f32 %v122_v25 }
 0x17c   :  { %v7768_v26 = vpop.eup %7767 }
 0x17d   :  { %v125_v27 = vmul.f32 %v7768_v26, %v109_v6 }
 0x17f   :  { %7205 = vmatprep.mubr.msk.f32.mxu0 %vm99_vm0, %v125_v27 }
 0x180   :  { %v7770_v28 = vpop.eup %7769 }
 0x181   :  { %v126_v29 = vmul.f32 %v7770_v28, %v110_v10 }
 0x183   :  { %7206 = vmatmul.mubr.msk.f32.vlgmr.msra.gmra.mrb[0].mxu0 %vm99_vm0, %v126_v29 }
 0x184   :  { %7220 = vmatprep.mubr.msk.f32.mxu0 %vm8052_vm1, %v8051_v30 }
 0x256   :  { %v7207_v32 = vpop.f32.mrb[0].mxu0 }
 0x257   :  { %v8204_v33 = vadd.f32 %v7207_v32, %v6856_v31  ;;  %v205_v34 = vpop.f32.mrb[1].mxu0 }
 0x258   :  { %v8206_v35 = vadd.f32 %v6856_v31, %v205_v34 }
 0x259   :  { %293 = vrot.lane.b32.xlu1 %v8204_v33, %s8053_s28 }
 0x25a   :  { %215 = vrot.lane.b32.xlu0 %v8206_v35, %s8053_s28 }
 0x2cb   :  { %v294_v37 = vpop.permute.xlu1 %293 }
 0x2cc   :  { %v216_v36 = vpop.permute.xlu0 %215 }
 0x2cd   :  { %7209 = vmatpush3.xpose.msk.msra.mxu1 %vm217_vm2, %v216_v36 }
 0x2ce   :  { %7213 = vmatprep.subr.mxu1 %v8051_v30 }
 0x2d0   :  { %7211 = vmatmul.mubr.msk.f32.vlgmr.msra.gmra.mrb[0].mxu1 %vm217_vm2, %v8206_v35 }
 0x2d1   :  { %7214 = vmatpush3.xpose.msk.msra.mxu1 %vm217_vm2, %v294_v37  ;;  %7215 = vmatprep.mubr.msk.f32.mxu1 %vm8052_vm1, %v8051_v30 }
 0x2d2   :  { %7223 = vmatprep.subr.mxu1 %v8051_v30 }
 0x2d4   :  { %7216 = vmatmul.mubr.msk.f32.vlgmr.msra.gmra.mrb[2].mxu1 %vm217_vm2, %v8204_v33 }
 0x2d5   :  { %7225 = vmatprep.mubr.msk.f32.mxu1 %vm8052_vm1, %v8051_v30 }
 0x3a3   :  { %v288_v38 = vpop.f32.mrb[0].mxu1 }
 0x3a4   :  { %v7212_v39 = vpop.f32.mrb[1].mxu1  ;;  %v369_v40 = vsel %vm217_vm2, %v288_v38, -inf }
 0x3a5   :  { %370 = vmax.xlane.f32.xlu1 %v369_v40 }
 0x3a7   :  { %v365_v41 = vpop.f32.mrb[2].mxu1 }
 0x3a8   :  { %v7217_v42 = vpop.f32.mrb[3].mxu1  ;;  %v372_v43 = vsel %vm217_vm2, %v365_v41, -inf }
 0x3a9   :  { %373 = vmax.xlane.f32.xlu0 %v372_v43 }
 0x3b6   :  { %463 = vrot.lane.b32.xlu1 %v8204_v33, %s8054_s29 }
 0x3ba   :  { %545 = vrot.lane.b32.xlu1 %v8206_v35, %s8055_s30 }
 0x3be   :  { %623 = vrot.lane.b32.xlu1 %v8204_v33, %s8055_s30 }
 0x3bf   :  { %387 = vrot.lane.b32.xlu0 %v8206_v35, %s8054_s29 }
 0x3c2   :  { %621 = vrot.lane.b32.xlu1 %v8204_v33, %s8056_s8 }
 0x3c3   :  { %543 = vrot.lane.b32.xlu0 %v8206_v35, %s8056_s8 }
 0x3c6   :  { %793 = vrot.lane.b32.xlu1 %v8204_v33, %s8057_s9 }
 0x3c7   :  { %717 = vrot.lane.b32.xlu0 %v8206_v35, %s8057_s9 }
 0x3ca   :  { %953 = vrot.lane.b32.xlu1 %v8204_v33, %s8058_s10 }
 0x432   :  { %v371_v44 = vpop.xlane.xlu1 %370 }
 0x433   :  { %v375_v45 = vsub.f32 %v288_v38, %v371_v44 }
 0x435   :  { %v377_v46 = vmul.f32 1.442695, %v375_v45 }
 0x436   :  { %v464_v47 = vpop.permute.xlu1 %463  ;;  %v374_v48 = vpop.xlane.xlu0 %373 }
 0x437   :  { %7771 = vpow2.f32 %v377_v46  ;;  %v376_v49 = vsub.f32 %v365_v41, %v374_v48  ;;  %7224 = vmatpush3.msra.mxu1 %v464_v47 }
 0x438   :  { %7233 = vmatprep.subr.mxu1 %v8051_v30 }
 0x439   :  { %v379_v50 = vmul.f32 1.442695, %v376_v49 }
 0x43a   :  { %v546_v51 = vpop.permute.xlu1 %545  ;;  %v388_v52 = vpop.permute.xlu0 %387 }
 0x43b   :  { %7773 = vpow2.f32 %v379_v50  ;;  %7219 = vmatpush3.msra.mxu0 %v388_v52 }
 0x43c   :  { %7228 = vmatprep.subr.mxu0 %v8051_v30 }
 0x43e   :  { %v624_v53 = vpop.permute.xlu1 %623  ;;  %v544_v54 = vpop.permute.xlu0 %543 }
 0x441   :  { %v8246_v55 = vpop.eup %7771 }
 0x442   :  { %7221 = vmatmul.mubr.msk.f32.vlgmr.msra.gmra.mrb[2].mxu0 %vm217_vm2, %v8246_v55  ;;  %v622_v56 = vpop.permute.xlu1 %621  ;;  %v718_v58 = vpop.permute.xlu0 %717 }
 0x443   :  { %7229 = vmatpush3.xpose.msk.msra.mxu0 %vm217_vm2, %v546_v51  ;;  %7230 = vmatprep.mubr.msk.f32.mxu0 %vm8052_vm1, %v8051_v30 }
 0x444   :  { %7238 = vmatprep.subr.mxu0 %v8051_v30 }
 0x445   :  { %v8254_v57 = vpop.eup %7773 }
 0x446   :  { %7226 = vmatmul.mubr.msk.f32.vlgmr.msra.gmra.mrb[4].mxu1 %vm217_vm2, %v8254_v57  ;;  %7231 = vmatmul.mubr.msk.f32.vlgmr.msra.gmra.mrb[4].mxu0 %vm217_vm2, %v544_v54  ;;  %v794_v59 = vpop.permute.xlu1 %793 }
 0x447   :  { %7234 = vmatpush3.xpose.msk.msra.mxu1 %vm217_vm2, %v624_v53  ;;  %7239 = vmatpush3.msra.mxu0 %v718_v58 }
 0x448   :  { %7235 = vmatprep.mubr.msk.f32.mxu1 %vm8052_vm1, %v8051_v30  ;;  %7243 = vmatprep.subr.mxu1 %v8051_v30 }
 0x449   :  { %7240 = vmatprep.mubr.msk.f32.mxu0 %vm8052_vm1, %v8051_v30  ;;  %7248 = vmatprep.subr.mxu0 %v8051_v30 }
 0x44a   :  { %7236 = vmatmul.mubr.msk.f32.vlgmr.msra.gmra.mrb[6].mxu1 %vm217_vm2, %v622_v56  ;;  %v954_v8 = vpop.permute.xlu1 %953 }
 0x44b   :  { %7244 = vmatpush3.msra.mxu1 %v794_v59  ;;  %7245 = vmatprep.mubr.msk.f32.mxu1 %vm8052_vm1, %v8051_v30 }
 0x44c   :  { %7253 = vmatprep.subr.mxu1 %v8051_v30 }
 0x515   :  { %v8270_v60 = vpop.f32.mrb[2].mxu0 }
 0x516   :  { %v7222_v61 = vpop.f32.mrb[3].mxu0 }
 0x519   :  { %v8272_v62 = vpop.f32.mrb[4].mxu1  ;;  %v617_v63 = vpop.f32.mrb[4].mxu0 }
 0x51a   :  { %v7227_v2 = vpop.f32.mrb[5].mxu1  ;;  %v7232_v3 = vpop.f32.mrb[5].mxu0  ;;  %v699_v4 = vsel %vm217_vm2, %v617_v63, -inf }
 0x51b   :  { %700 = vmax.xlane.f32.xlu0 %v699_v4 }
 0x51d   :  { %v695_v5 = vpop.f32.mrb[6].mxu1 }
 0x51e   :  { %v7237_v6 = vpop.f32.mrb[7].mxu1  ;;  %v702_v7 = vsel %vm217_vm2, %v695_v5, -inf }
 0x51f   :  { %703 = vmax.xlane.f32.xlu1 %v702_v7 }
 0x530   :  { %951 = vrot.lane.b32.xlu1 %v8204_v33, %s8059_s11 }
 0x531   :  { %875 = vrot.lane.b32.xlu0 %v8206_v35, %s8058_s10 }
 0x534   :  { %1123 = vrot.lane.b32.xlu1 %v8204_v33, %s8060_s12 }
 0x535   :  { %873 = vrot.lane.b32.xlu0 %v8206_v35, %s8059_s11 }
 0x538   :  { %1283 = vrot.lane.b32.xlu1 %v8204_v33, %s8061_s15 }
 0x539   :  { %1047 = vrot.lane.b32.xlu0 %v8206_v35, %s8060_s12 }
 0x5a8   :  { %v701_v9 = vpop.xlane.xlu0 %700 }
 0x5a9   :  { %v705_v10 = vsub.f32 %v617_v63, %v701_v9 }
 0x5ab   :  { %v707_v11 = vmul.f32 1.442695, %v705_v10 }
 0x5ac   :  { %v704_v12 = vpop.xlane.xlu1 %703  ;;  %v876_v15 = vpop.permute.xlu0 %875 }
 0x5ad   :  { %7775 = vpow2.f32 %v707_v11  ;;  %v706_v13 = vsub.f32 %v695_v5, %v704_v12  ;;  %v381_v12 = vsel %vm217_vm2, %v8246_v55, 0.0 }
 0x5af   :  { %v709_v14 = vmul.f32 1.442695, %v706_v13 }
 0x5b0   :  { %v874_v16 = vpop.permute.xlu0 %873  ;;  %v952_v18 = vpop.permute.xlu1 %951 }
 0x5b1   :  { %7777 = vpow2.f32 %v709_v14  ;;  %v384_v14 = vsel %vm217_vm2, %v8254_v57, 0.0 }
 0x5b4   :  { %v1048_v20 = vpop.permute.xlu0 %1047  ;;  %v1124_v21 = vpop.permute.xlu1 %1123 }
 0x5b7   :  { %v8288_v17 = vpop.eup %7775 }
 0x5b8   :  { %7241 = vmatmul.mubr.msk.f32.vlgmr.msra.gmra.mrb[6].mxu0 %vm217_vm2, %v8288_v17  ;;  %v1284_v34 = vpop.permute.xlu1 %1283  ;;  %v711_v59 = vsel %vm217_vm2, %v8288_v17, 0.0 }
 0x5b9   :  { %7249 = vmatpush3.xpose.msk.msra.mxu0 %vm217_vm2, %v876_v15  ;;  %7250 = vmatprep.mubr.msk.f32.mxu0 %vm8052_vm1, %v8051_v30 }
 0x5ba   :  { %7258 = vmatprep.subr.mxu0 %v8051_v30 }
 0x5bb   :  { %v8296_v19 = vpop.eup %7777 }
 0x5bc   :  { %7246 = vmatmul.mubr.msk.f32.vlgmr.msra.gmra.mrb[8].mxu1 %vm217_vm2, %v8296_v19  ;;  %7251 = vmatmul.mubr.msk.f32.vlgmr.msra.gmra.mrb[8].mxu0 %vm217_vm2, %v874_v16  ;;  %v714_v63 = vsel %vm217_vm2, %v8296_v19, 0.0 }
 0x5bd   :  { %7254 = vmatpush3.xpose.msk.msra.mxu1 %vm217_vm2, %v954_v8  ;;  %7259 = vmatpush3.msra.mxu0 %v1048_v20 }
 0x5be   :  { %7255 = vmatprep.mubr.msk.f32.mxu1 %vm8052_vm1, %v8051_v30  ;;  %7263 = vmatprep.subr.mxu1 %v8051_v30 }
 0x5bf   :  { %7260 = vmatprep.mubr.msk.f32.mxu0 %vm8052_vm1, %v8051_v30  ;;  %7268 = vmatprep.subr.mxu0 %v8051_v30 }
 0x5c0   :  { %7256 = vmatmul.mubr.msk.f32.vlgmr.msra.gmra.mrb[10].mxu1 %vm217_vm2, %v952_v18 }
 0x5c1   :  { %7264 = vmatpush3.msra.mxu1 %v1124_v21  ;;  %7265 = vmatprep.mubr.msk.f32.mxu1 %vm8052_vm1, %v8051_v30 }
 0x5c2   :  { %7273 = vmatprep.subr.mxu1 %v8051_v30 }
 0x68b   :  { %v8312_v22 = vpop.f32.mrb[6].mxu0 }
 0x68c   :  { %v7242_v23 = vpop.f32.mrb[7].mxu0 }
 0x68f   :  { %v8314_v24 = vpop.f32.mrb[8].mxu1  ;;  %v947_v25 = vpop.f32.mrb[8].mxu0 }
 0x690   :  { %v7247_v26 = vpop.f32.mrb[9].mxu1  ;;  %v7252_v27 = vpop.f32.mrb[9].mxu0  ;;  %v1029_v28 = vsel %vm217_vm2, %v947_v25, -inf }
 0x691   :  { %1030 = vmax.xlane.f32.xlu0 %v1029_v28  ;;  %v89_v27 = vld [vmem:[#allocation7] sm:$0xff]  ;;  %v90_v28 = vld [vmem:[#allocation7 + $0x8] sm:$0xff] }
 0x693   :  { %v1025_v29 = vpop.f32.mrb[10].mxu1 }
 0x694   :  { %v7257_v31 = vpop.f32.mrb[11].mxu1  ;;  %v1032_v32 = vsel %vm217_vm2, %v1025_v29, -inf }
 0x695   :  { %1033 = vmax.xlane.f32.xlu1 %v1032_v32  ;;  %v91_v31 = vld [vmem:[#allocation7 + $0x10] sm:$0xff] }
 0x6a6   :  { %1281 = vrot.lane.b32.xlu1 %v8204_v33, %s8062_s16 }
 0x6a7   :  { %1205 = vrot.lane.b32.xlu0 %v8206_v35, %s8061_s15 }
 0x6ab   :  { %1203 = vrot.lane.b32.xlu0 %v8206_v35, %s8062_s16 }
 0x71e   :  { %v1031_v36 = vpop.xlane.xlu0 %1030 }
 0x71f   :  { %v1035_v37 = vsub.f32 %v947_v25, %v1031_v36 }
 0x721   :  { %v1037_v38 = vmul.f32 1.442695, %v1035_v37 }
 0x722   :  { %v1034_v39 = vpop.xlane.xlu1 %1033  ;;  %v1206_v42 = vpop.permute.xlu0 %1205 }
 0x723   :  { %7779 = vpow2.f32 %v1037_v38  ;;  %v1036_v40 = vsub.f32 %v1025_v29, %v1034_v39 }
 0x725   :  { %v1039_v41 = vmul.f32 1.442695, %v1036_v40 }
 0x726   :  { %v1204_v45 = vpop.permute.xlu0 %1203  ;;  %v1282_v46 = vpop.permute.xlu1 %1281 }
 0x727   :  { %7781 = vpow2.f32 %v1039_v41 }
 0x72d   :  { %v7780_v43 = vpop.eup %7779 }
 0x72e   :  { %7261 = vmatmul.mubr.msk.f32.vlgmr.msra.gmra.mrb[10].mxu0 %vm217_vm2, %v7780_v43  ;;  %v1041_v61 = vsel %vm217_vm2, %v7780_v43, 0.0 }
 0x72f   :  { %7269 = vmatpush3.xpose.msk.msra.mxu0 %vm217_vm2, %v1206_v42  ;;  %7270 = vmatprep.mubr.msk.f32.mxu0 %vm8052_vm1, %v8051_v30 }
 0x730   :  { %7278 = vmatprep.subr.mxu0 %v8051_v30 }
 0x731   :  { %v7782_v44 = vpop.eup %7781 }
 0x732   :  { %7266 = vmatmul.mubr.msk.f32.vlgmr.msra.gmra.mrb[12].mxu1 %vm217_vm2, %v7782_v44  ;;  %7271 = vmatmul.mubr.msk.f32.vlgmr.msra.gmra.mrb[12].mxu0 %vm217_vm2, %v1204_v45  ;;  %v1044_v2 = vsel %vm217_vm2, %v7782_v44, 0.0 }
 0x733   :  { %7274 = vmatpush3.xpose.msk.msra.mxu1 %vm217_vm2, %v1284_v34  ;;  %7275 = vmatprep.mubr.msk.f32.mxu1 %vm8052_vm1, %v8051_v30 }
 0x734   :  { %7283 = vmatprep.subr.mxu1 %v8051_v30  ;;  %7280 = vmatprep.mubr.msk.f32.mxu0 %vm8052_vm1, %v8051_v30 }
 0x736   :  { %7276 = vmatmul.mubr.msk.f32.vlgmr.msra.gmra.mrb[14].mxu1 %vm217_vm2, %v1282_v46 }
 0x737   :  { %7285 = vmatprep.mubr.msk.f32.mxu1 %vm8052_vm1, %v8051_v30 }
 0x801   :  { %v1119_v47 = vpop.f32.mrb[10].mxu0 }
 0x802   :  { %v7262_v48 = vpop.f32.mrb[11].mxu0 }
 0x805   :  { %v8340_v49 = vpop.f32.mrb[12].mxu1  ;;  %v1277_v50 = vpop.f32.mrb[12].mxu0 }
 0x806   :  { %v7267_v51 = vpop.f32.mrb[13].mxu1  ;;  %v7272_v52 = vpop.f32.mrb[13].mxu0  ;;  %v1359_v53 = vsel %vm217_vm2, %v1277_v50, -inf }
 0x807   :  { %1360 = vmax.xlane.f32.xlu0 %v1359_v53 }
 0x809   :  { %v1355_v54 = vpop.f32.mrb[14].mxu1 }
 0x80a   :  { %v7277_v56 = vpop.f32.mrb[15].mxu1  ;;  %v1362_v58 = vsel %vm217_vm2, %v1355_v54, -inf }
 0x80b   :  { %1363 = vmax.xlane.f32.xlu1 %v1362_v58 }
 0x81c   :  { %1453 = vrot.lane.b32.xlu1 %v8204_v33, %s8063_s0 }
 0x81d   :  { %1377 = vrot.lane.b32.xlu0 %v8206_v35, %s8063_s0 }
 0x83c   :  { %712 = vadd.xlane.f32.xlu0 %v711_v59 }
 0x840   :  { %1042 = vadd.xlane.f32.xlu0 %v1041_v61  ;;  %715 = vadd.xlane.f32.xlu1 %v714_v63 }
 0x844   :  { %1045 = vadd.xlane.f32.xlu0 %v1044_v2 }
 0x894   :  { %v1361_v3 = vpop.xlane.xlu0 %1360 }
 0x895   :  { %v1365_v4 = vsub.f32 %v1277_v50, %v1361_v3  ;;  %v6883_v3 = vld [vmem:[%s9057_s4] ss:$0 sm:$0xff] }
 0x897   :  { %v1367_v33 = vmul.f32 1.442695, %v1365_v4 }
 0x898   :  { %v1378_v5 = vpop.permute.xlu0 %1377  ;;  %v1364_v6 = vpop.xlane.xlu1 %1363 }
 0x899   :  { %7783 = vpow2.f32 %v1367_v33  ;;  %v1366_v35 = vsub.f32 %v1355_v54, %v1364_v6  ;;  %7279 = vmatpush3.msra.mxu0 %v1378_v5 }
 0x89b   :  { %v1369_v7 = vmul.f32 1.442695, %v1366_v35 }
 0x89c   :  { %v1454_v8 = vpop.permute.xlu1 %1453 }
 0x89d   :  { %7785 = vpow2.f32 %v1369_v7  ;;  %7284 = vmatpush3.msra.mxu1 %v1454_v8 }
 0x8a3   :  { %v7784_v9 = vpop.eup %7783 }
 0x8a4   :  { %7281 = vmatmul.mubr.msk.f32.vlgmr.msra.gmra.mrb[14].mxu0 %vm217_vm2, %v7784_v9  ;;  %v1371_v10 = vsel %vm217_vm2, %v7784_v9, 0.0 }
 0x8a5   :  { %1372 = vadd.xlane.f32.xlu0 %v1371_v10 }
 0x8a7   :  { %v7786_v11 = vpop.eup %7785 }
 0x8a8   :  { %7286 = vmatmul.mubr.msk.f32.vlgmr.msra.gmra.mrb[16].mxu1 %vm217_vm2, %v7786_v11  ;;  %v1374_v13 = vsel %vm217_vm2, %v7786_v11, 0.0 }
 0x8a9   :  { %382 = vadd.xlane.f32.xlu0 %v381_v12  ;;  %1375 = vadd.xlane.f32.xlu1 %v1374_v13 }
 0x8ad   :  { %385 = vadd.xlane.f32.xlu1 %v384_v14 }
 0x8c9   :  { %v713_v15 = vpop.xlane.xlu0 %712 }
 0x8ca   :  { %7787 = vrcp.f32 %v713_v15 }
 0x8cd   :  { %v1043_v16 = vpop.xlane.xlu0 %1042  ;;  %v716_v17 = vpop.xlane.xlu1 %715 }
 0x8ce   :  { %7789 = vrcp.f32 %v716_v17 }
 0x8cf   :  { %7791 = vrcp.f32 %v1043_v16 }
 0x8d1   :  { %v1046_v18 = vpop.xlane.xlu0 %1045 }
 0x8d2   :  { %7793 = vrcp.f32 %v1046_v18 }
 0x8d4   :  { %v7788_v19 = vpop.eup %7787 }
 0x8d5   :  { %v871_v20 = vmul.f32 %v7788_v19, %v8312_v22  ;;  %v7657_v22 = vpack.c.bf16 %v90_v28, %v89_v27  ;;  %v94_v19 = vld [vmem:[#allocation8] sm:$0xff] }
 0x8d7   :  { %1535 = vrot.lane.b32.xlu0 %v871_v20, %s8048_s14  ;;  %7658 = vmatprep.subr.bf16.mxu0 %v7657_v22  ;;  %v95_v20 = vld [vmem:[#allocation8 + $0x8] sm:$0xff] }
 0x8d8   :  { %v7790_v55 = vpop.eup %7789  ;;  %7660 = vmatpush3.bf16.msra.mxu0 %v7657_v22 }
 0x8d9   :  { %v872_v21 = vmul.f32 %v7790_v55, %v8314_v24  ;;  %v7792_v23 = vpop.eup %7791  ;;  %v92_v24 = vld [vmem:[#allocation7 + $0x18] sm:$0xff]  ;;  %v96_v55 = vld [vmem:[#allocation8 + $0x10] sm:$0xff] }
 0x8da   :  { %v1201_v57 = vmul.f32 %v7792_v23, %v1119_v47  ;;  %v7661_v32 = vpack.c.bf16 %v92_v24, %v91_v31  ;;  %v97_v23 = vld [vmem:[#allocation8 + $0x18] sm:$0xff] }
 0x8db   :  { %1537 = vrot.lane.b32.xlu1 %v872_v21, %s8048_s14  ;;  %v7665_v21 = vpack.c.bf16 %v95_v20, %v94_v19 }
 0x8dc   :  { %v7794_v25 = vpop.eup %7793  ;;  %7662 = vmatprep.subr.bf16.mxu0 %v7661_v32 }
 0x8dd   :  { %v1202_v26 = vmul.f32 %v7794_v25, %v8340_v49  ;;  %7664 = vmatpush3.bf16.msra.mxu0 %v7661_v32  ;;  %7666 = vmatprep.subr.bf16.mxu1 %v7665_v21 }
 0x8de   :  { %7668 = vmatpush3.bf16.msra.mxu1 %v7665_v21 }
 0x8df   :  { %1543 = vrot.lane.b32.xlu1 %v1201_v57, %s8064_s27  ;;  %v7669_v57 = vpack.c.bf16 %v97_v23, %v96_v55 }
 0x8e1   :  { %7670 = vmatprep.subr.bf16.mxu1 %v7669_v57 }
 0x8e2   :  { %7672 = vmatpush3.bf16.msra.mxu1 %v7669_v57 }
 0x8e3   :  { %1545 = vrot.lane.b32.xlu1 %v1202_v26, %s8064_s27  ;;  %7321 = vmatprep.subr.mxu1 %v8051_v30 }
 0x932   :  { %v1373_v29 = vpop.xlane.xlu0 %1372 }
 0x933   :  { %7795 = vrcp.f32 %v1373_v29 }
 0x936   :  { %v1376_v34 = vpop.xlane.xlu1 %1375  ;;  %v383_v44 = vpop.xlane.xlu0 %382 }
 0x937   :  { %7797 = vrcp.f32 %v1376_v34 }
 0x938   :  { %7799 = vrcp.f32 %v383_v44 }
 0x93a   :  { %v386_v45 = vpop.xlane.xlu1 %385 }
 0x93b   :  { %7801 = vrcp.f32 %v386_v45 }
 0x93d   :  { %v7796_v36 = vpop.eup %7795 }
 0x941   :  { %v7798_v40 = vpop.eup %7797 }
 0x942   :  { %v7800_v47 = vpop.eup %7799 }
 0x943   :  { %v541_v50 = vmul.f32 %v7800_v47, %v8270_v60 }
 0x945   :  { %v7802_v51 = vpop.eup %7801 }
 0x946   :  { %v542_v58 = vmul.f32 %v7802_v51, %v8272_v62 }
 0x949   :  { %v1536_v49 = vpop.permute.xlu0 %1535 }
 0x94a   :  { %v1557_v52 = vsel %vm217_vm2, %v541_v50, %v1536_v49 }
 0x94d   :  { %v1538_v46 = vpop.permute.xlu1 %1537 }
 0x94e   :  { %v1558_v61 = vsel %vm217_vm2, %v542_v58, %v1538_v46  ;;  %v1773_v58 = vld [vmem:[#allocation5 + $0x28] sm:$0xff] }
 0x951   :  { %v1544_v48 = vpop.permute.xlu1 %1543 }
 0x952   :  { %v1560_v53 = vsel %vm1559_vm3, %v1557_v52, %v1544_v48 }
 0x955   :  { %v1546_v54 = vpop.permute.xlu1 %1545 }
 0x956   :  { %v1561_v63 = vsel %vm1559_vm3, %v1558_v61, %v1546_v54 }
 0x977   :  { %v1449_v37 = vpop.f32.mrb[14].mxu0 }
 0x978   :  { %v1531_v38 = vmul.f32 %v7796_v36, %v1449_v37  ;;  %v7282_v39 = vpop.f32.mrb[15].mxu0  ;;  %v6886_v36 = vld [vmem:[%s9059_s6] ss:$0 sm:$0xff] }
 0x97a   :  { %1551 = vrot.lane.b32.xlu0 %v1531_v38, %s8065_s17 }
 0x97b   :  { %v1525_v41 = vpop.f32.mrb[16].mxu1 }
 0x97c   :  { %v1532_v42 = vmul.f32 %v7798_v40, %v1525_v41  ;;  %v7287_v43 = vpop.f32.mrb[17].mxu1 }
 0x97e   :  { %1553 = vrot.lane.b32.xlu1 %v1532_v42, %s8065_s17 }
 0x9ec   :  { %v1552_v56 = vpop.permute.xlu0 %1551 }
 0x9ed   :  { %v1563_v59 = vsel %vm1562_vm4, %v1560_v53, %v1552_v56  ;;  %v1772_v56 = vld [vmem:[#allocation5 + $0x20] sm:$0xff] }
 0x9ee   :  { %7296 = vmatprep.mubr.msk.f32.mxu0 %vm99_vm0, %v1563_v59  ;;  %v1774_v59 = vld [vmem:[#allocation5 + $0x30] sm:$0xff]  ;;  %v7673_v61 = vpack.c.bf16 %v1773_v58, %v1772_v56 }
 0x9f0   :  { %v1554_v60 = vpop.permute.xlu1 %1553  ;;  %7674 = vmatprep.subr.bf16.mxu0 %v7673_v61 }
 0x9f1   :  { %v1564_v2 = vsel %vm1562_vm4, %v1561_v63, %v1554_v60  ;;  %v1775_v63 = vld [vmem:[#allocation5 + $0x38] sm:$0xff] }
 0x9f2   :  { %7297 = vmatmul.mubr.msk.f32.vlgmr.msra.gmra.mrb[16].mxu0 %vm99_vm0, %v1564_v2  ;;  %v7677_v60 = vpack.c.bf16 %v1775_v63, %v1774_v59 }
 0x9f3   :  { %7676 = vmatpush3.bf16.msra.mxu0 %v7673_v61 }
 0x9f4   :  { %7678 = vmatprep.subr.bf16.mxu0 %v7677_v60 }
 0x9f7   :  { %7680 = vmatpush3.bf16.msra.mxu0 %v7677_v60 }
 0x9f8   :  { %7331 = vmatprep.subr.mxu0 %v8051_v30 }
 0xac5   :  { %v7298_v4 = vpop.f32.mrb[16].mxu0 }
 0xac6   :  { %v1649_v33 = vadd.f32 %v7298_v4, %v6883_v3  ;;  %v1643_v62 = vpop.f32.mrb[17].mxu0 }
 0xac7   :  { %v1644_v5 = vadd.f32 %v6883_v3, %v1643_v62 }
 0xac8   :  { %v1653_v6 = vadd.f32 %v1649_v33, %v8183_v1 }
 0xac9   :  { %v1652_v35 = vadd.f32 %v1644_v5, %v8181_v0 }
 0xaca   :  { %v1657_v7 = vsel %vm99_vm0, %v1653_v6, 0.0 }
 0xacb   :  { %1658 = vadd.xlane.f32.xlu1 %v1657_v7  ;;  %v1654_v8 = vsel %vm99_vm0, %v1652_v35, 0.0 }
 0xacc   :  { %1655 = vadd.xlane.f32.xlu0 %v1654_v8 }
 0xb58   :  { %v1659_v9 = vpop.xlane.xlu1 %1658 }
 0xb59   :  { %v1661_v10 = vmul.f32 0.03125, %v1659_v9  ;;  %v1656_v11 = vpop.xlane.xlu0 %1655  ;;  %v6892_v9 = vld [vmem:[%s9055_s2 + $0x1] ss:$0 sm:$0xff] }
 0xb5a   :  { %v1660_v12 = vmul.f32 0.03125, %v1656_v11 }
 0xb5b   :  { %v1663_v13 = vsub.f32 %v1653_v6, %v1661_v10 }
 0xb5c   :  { %v1662_v14 = vsub.f32 %v1652_v35, %v1660_v12 }
 0xb5d   :  { %v1665_v17 = vmul.f32 %v1663_v13, %v1663_v13 }
 0xb5e   :  { %v1664_v15 = vmul.f32 %v1662_v14, %v1662_v14 }
 0xb5f   :  { %v1669_v18 = vsel %vm99_vm0, %v1665_v17, 0.0 }
 0xb60   :  { %v1666_v16 = vsel %vm99_vm0, %v1664_v15, 0.0 }
 0xb61   :  { %1667 = vadd.xlane.f32.xlu0 %v1666_v16 }
 0xb65   :  { %1670 = vadd.xlane.f32.xlu0 %v1669_v18 }
 0xbee   :  { %v1668_v25 = vpop.xlane.xlu0 %1667 }
 0xbef   :  { %v1672_v26 = vmul.f32 0.03125, %v1668_v25 }
 0xbf1   :  { %v1674_v27 = vadd.f32 1e-05, %v1672_v26 }
 0xbf2   :  { %v1671_v28 = vpop.xlane.xlu0 %1670 }
 0xbf3   :  { %7803 = vrsqrt.f32 %v1674_v27  ;;  %v1673_v22 = vmul.f32 0.03125, %v1671_v28 }
 0xbf5   :  { %v1675_v29 = vadd.f32 1e-05, %v1673_v22 }
 0xbf7   :  { %7805 = vrsqrt.f32 %v1675_v29 }
 0xbfd   :  { %v7804_v31 = vpop.eup %7803 }
 0xbfe   :  { %v1678_v24 = vmul.f32 %v7804_v31, %v1662_v14 }
 0xc00   :  { %7307 = vmatprep.mubr.msk.f32.mxu1 %vm99_vm0, %v1678_v24 }
 0xc01   :  { %v7806_v32 = vpop.eup %7805 }
 0xc02   :  { %v1679_v34 = vmul.f32 %v7806_v32, %v1663_v13 }
 0xc04   :  { %7308 = vmatmul.mubr.msk.f32.vlgmr.msra.gmra.mrb[18].mxu1 %vm99_vm0, %v1679_v34 }
 0xc05   :  { %7323 = vmatprep.mubr.msk.f32.mxu1 %vm8052_vm1, %v8051_v30 }
 0xcd7   :  { %v7309_v37 = vpop.f32.mrb[18].mxu1 }
 0xcd8   :  { %v1764_v38 = vadd.f32 %v7309_v37, %v6886_v36  ;;  %v1758_v39 = vpop.f32.mrb[19].mxu1 }
 0xcd9   :  { %v1759_v40 = vadd.f32 %v6886_v36, %v1758_v39 }
 0xcda   :  { %v1768_v41 = vmax.f32 %v1764_v38, 0.0 }
 0xcdb   :  { %v1767_v42 = vmax.f32 %v1759_v40, 0.0 }
 0xcdc   :  { %v8399_v43 = vadd.f32 %v1768_v41, %v8183_v1 }
 0xcdd   :  { %v8402_v44 = vadd.f32 %v1767_v42, %v8181_v0 }
 0xcde   :  { %v1795_v45 = vsel %vm99_vm0, %v8399_v43, 0.0 }
 0xcdf   :  { %1796 = vadd.xlane.f32.xlu1 %v1795_v45  ;;  %v1792_v46 = vsel %vm99_vm0, %v8402_v44, 0.0 }
 0xce0   :  { %1793 = vadd.xlane.f32.xlu0 %v1792_v46 }
 0xd6c   :  { %v1797_v47 = vpop.xlane.xlu1 %1796 }
 0xd6d   :  { %v1799_v48 = vmul.f32 0.03125, %v1797_v47  ;;  %v1794_v49 = vpop.xlane.xlu0 %1793 }
 0xd6e   :  { %v1798_v50 = vmul.f32 0.03125, %v1794_v49 }
 0xd6f   :  { %v1801_v51 = vsub.f32 %v8399_v43, %v1799_v48 }
 0xd70   :  { %v1800_v1 = vsub.f32 %v8402_v44, %v1798_v50 }
 0xd71   :  { %v1803_v52 = vmul.f32 %v1801_v51, %v1801_v51 }
 0xd72   :  { %v1802_v53 = vmul.f32 %v1800_v1, %v1800_v1 }
 0xd73   :  { %v1807_v0 = vsel %vm99_vm0, %v1803_v52, 0.0 }
 0xd74   :  { %1808 = vadd.xlane.f32.xlu1 %v1807_v0  ;;  %v1804_v54 = vsel %vm99_vm0, %v1802_v53, 0.0 }
 0xd75   :  { %1805 = vadd.xlane.f32.xlu0 %v1804_v54 }
 0xe01   :  { %v1809_v2 = vpop.xlane.xlu1 %1808 }
 0xe02   :  { %v1811_v3 = vmul.f32 0.03125, %v1809_v2  ;;  %v1806_v4 = vpop.xlane.xlu0 %1805 }
 0xe03   :  { %v1810_v33 = vmul.f32 0.03125, %v1806_v4 }
 0xe04   :  { %v1813_v62 = vadd.f32 1e-05, %v1811_v3 }
 0xe05   :  { %v1812_v5 = vadd.f32 1e-05, %v1810_v33 }
 0xe06   :  { %7807 = vrsqrt.f32 %v1813_v62 }
 0xe07   :  { %7809 = vrsqrt.f32 %v1812_v5 }
 0xe10   :  { %v7808_v6 = vpop.eup %7807 }
 0xe11   :  { %v7810_v35 = vpop.eup %7809  ;;  %v1817_v8 = vmul.f32 %v7808_v6, %v1801_v51 }
 0xe12   :  { %v1816_v7 = vmul.f32 %v7810_v35, %v1800_v1 }
 0xe14   :  { %7318 = vmatprep.mubr.msk.f32.mxu0 %vm99_vm0, %v1816_v7 }
 0xe15   :  { %7319 = vmatmul.mubr.msk.f32.vlgmr.msra.gmra.mrb[18].mxu0 %vm99_vm0, %v1817_v8 }
 0xe16   :  { %7333 = vmatprep.mubr.msk.f32.mxu0 %vm8052_vm1, %v8051_v30 }
 0xee8   :  { %v7320_v10 = vpop.f32.mrb[18].mxu0 }
 0xee9   :  { %v8420_v11 = vadd.f32 %v7320_v10, %v6892_v9  ;;  %v1896_v12 = vpop.f32.mrb[19].mxu0 }
 0xeea   :  { %v8422_v13 = vadd.f32 %v6892_v9, %v1896_v12 }
 0xeeb   :  { %1983 = vrot.lane.b32.xlu1 %v8420_v11, %s8053_s28 }
 0xeec   :  { %1906 = vrot.lane.b32.xlu0 %v8422_v13, %s8053_s28 }
 0xf5d   :  { %v1984_v15 = vpop.permute.xlu1 %1983 }
 0xf5e   :  { %v1907_v14 = vpop.permute.xlu0 %1906 }
 0xf5f   :  { %7322 = vmatpush3.xpose.msk.msra.mxu1 %vm217_vm2, %v1907_v14 }
 0xf60   :  { %7326 = vmatprep.subr.mxu1 %v8051_v30 }
 0xf62   :  { %7324 = vmatmul.mubr.msk.f32.vlgmr.msra.gmra.mrb[20].mxu1 %vm217_vm2, %v8422_v13 }
 0xf63   :  { %7327 = vmatpush3.xpose.msk.msra.mxu1 %vm217_vm2, %v1984_v15  ;;  %7328 = vmatprep.mubr.msk.f32.mxu1 %vm8052_vm1, %v8051_v30 }
 0xf64   :  { %7336 = vmatprep.subr.mxu1 %v8051_v30 }
 0xf66   :  { %7329 = vmatmul.mubr.msk.f32.vlgmr.msra.gmra.mrb[22].mxu1 %vm217_vm2, %v8420_v11 }
 0xf67   :  { %7338 = vmatprep.mubr.msk.f32.mxu1 %vm8052_vm1, %v8051_v30 }
0x1035   :  { %v1978_v16 = vpop.f32.mrb[20].mxu1 }
0x1036   :  { %v7325_v17 = vpop.f32.mrb[21].mxu1  ;;  %v2059_v18 = vsel %vm217_vm2, %v1978_v16, -inf }
0x1037   :  { %2060 = vmax.xlane.f32.xlu1 %v2059_v18 }
0x1039   :  { %v2055_v19 = vpop.f32.mrb[22].mxu1 }
0x103a   :  { %v7330_v20 = vpop.f32.mrb[23].mxu1  ;;  %v2062_v55 = vsel %vm217_vm2, %v2055_v19, -inf }
0x103b   :  { %2063 = vmax.xlane.f32.xlu0 %v2062_v55 }
0x1048   :  { %2153 = vrot.lane.b32.xlu1 %v8420_v11, %s8054_s29 }
0x104c   :  { %2235 = vrot.lane.b32.xlu1 %v8422_v13, %s8055_s30 }
0x1050   :  { %2313 = vrot.lane.b32.xlu1 %v8420_v11, %s8055_s30 }
0x1051   :  { %2077 = vrot.lane.b32.xlu0 %v8422_v13, %s8054_s29 }
0x1054   :  { %2311 = vrot.lane.b32.xlu1 %v8420_v11, %s8056_s8 }
0x1055   :  { %2233 = vrot.lane.b32.xlu0 %v8422_v13, %s8056_s8 }
0x1058   :  { %2483 = vrot.lane.b32.xlu1 %v8420_v11, %s8057_s9 }
0x1059   :  { %2407 = vrot.lane.b32.xlu0 %v8422_v13, %s8057_s9 }
0x105c   :  { %2643 = vrot.lane.b32.xlu1 %v8420_v11, %s8058_s10 }
0x10c4   :  { %v2061_v21 = vpop.xlane.xlu1 %2060 }
0x10c5   :  { %v2065_v23 = vsub.f32 %v1978_v16, %v2061_v21 }
0x10c7   :  { %v2067_v57 = vmul.f32 1.442695, %v2065_v23 }
0x10c8   :  { %v2154_v25 = vpop.permute.xlu1 %2153  ;;  %v2064_v26 = vpop.xlane.xlu0 %2063 }
0x10c9   :  { %7811 = vpow2.f32 %v2067_v57  ;;  %v2066_v27 = vsub.f32 %v2055_v19, %v2064_v26  ;;  %7337 = vmatpush3.msra.mxu1 %v2154_v25 }
0x10ca   :  { %7346 = vmatprep.subr.mxu1 %v8051_v30 }
0x10cb   :  { %v2069_v28 = vmul.f32 1.442695, %v2066_v27 }
0x10cc   :  { %v2236_v22 = vpop.permute.xlu1 %2235  ;;  %v2078_v29 = vpop.permute.xlu0 %2077 }
0x10cd   :  { %7813 = vpow2.f32 %v2069_v28  ;;  %7332 = vmatpush3.msra.mxu0 %v2078_v29 }
0x10ce   :  { %7341 = vmatprep.subr.mxu0 %v8051_v30 }
0x10d0   :  { %v2314_v31 = vpop.permute.xlu1 %2313  ;;  %v2234_v24 = vpop.permute.xlu0 %2233 }
0x10d3   :  { %v8462_v32 = vpop.eup %7811 }
0x10d4   :  { %7334 = vmatmul.mubr.msk.f32.vlgmr.msra.gmra.mrb[20].mxu0 %vm217_vm2, %v8462_v32  ;;  %v2312_v34 = vpop.permute.xlu1 %2311  ;;  %v2408_v37 = vpop.permute.xlu0 %2407 }
0x10d5   :  { %7342 = vmatpush3.xpose.msk.msra.mxu0 %vm217_vm2, %v2236_v22  ;;  %7343 = vmatprep.mubr.msk.f32.mxu0 %vm8052_vm1, %v8051_v30 }
0x10d6   :  { %7351 = vmatprep.subr.mxu0 %v8051_v30 }
0x10d7   :  { %v8470_v36 = vpop.eup %7813 }
0x10d8   :  { %7339 = vmatmul.mubr.msk.f32.vlgmr.msra.gmra.mrb[24].mxu1 %vm217_vm2, %v8470_v36  ;;  %7344 = vmatmul.mubr.msk.f32.vlgmr.msra.gmra.mrb[22].mxu0 %vm217_vm2, %v2234_v24  ;;  %v2484_v38 = vpop.permute.xlu1 %2483 }
0x10d9   :  { %7347 = vmatpush3.xpose.msk.msra.mxu1 %vm217_vm2, %v2314_v31  ;;  %7352 = vmatpush3.msra.mxu0 %v2408_v37 }
0x10da   :  { %7348 = vmatprep.mubr.msk.f32.mxu1 %vm8052_vm1, %v8051_v30  ;;  %7356 = vmatprep.subr.mxu1 %v8051_v30 }
0x10db   :  { %7353 = vmatprep.mubr.msk.f32.mxu0 %vm8052_vm1, %v8051_v30  ;;  %7361 = vmatprep.subr.mxu0 %v8051_v30 }
0x10dc   :  { %7349 = vmatmul.mubr.msk.f32.vlgmr.msra.gmra.mrb[26].mxu1 %vm217_vm2, %v2312_v34  ;;  %v2644_v51 = vpop.permute.xlu1 %2643 }
0x10dd   :  { %7357 = vmatpush3.msra.mxu1 %v2484_v38  ;;  %7358 = vmatprep.mubr.msk.f32.mxu1 %vm8052_vm1, %v8051_v30 }
0x10de   :  { %7366 = vmatprep.subr.mxu1 %v8051_v30 }
0x11a7   :  { %v8486_v39 = vpop.f32.mrb[20].mxu0 }
0x11a8   :  { %v7335_v40 = vpop.f32.mrb[21].mxu0 }
0x11ab   :  { %v8488_v41 = vpop.f32.mrb[24].mxu1  ;;  %v2307_v42 = vpop.f32.mrb[22].mxu0 }
0x11ac   :  { %v7340_v45 = vpop.f32.mrb[25].mxu1  ;;  %v7345_v46 = vpop.f32.mrb[23].mxu0  ;;  %v2389_v47 = vsel %vm217_vm2, %v2307_v42, -inf }
0x11ad   :  { %2390 = vmax.xlane.f32.xlu0 %v2389_v47 }
0x11af   :  { %v2385_v48 = vpop.f32.mrb[26].mxu1 }
0x11b0   :  { %v7350_v49 = vpop.f32.mrb[27].mxu1  ;;  %v2392_v50 = vsel %vm217_vm2, %v2385_v48, -inf }
0x11b1   :  { %2393 = vmax.xlane.f32.xlu1 %v2392_v50 }
0x11c2   :  { %2641 = vrot.lane.b32.xlu1 %v8420_v11, %s8059_s11 }
0x11c3   :  { %2565 = vrot.lane.b32.xlu0 %v8422_v13, %s8058_s10 }
0x11c6   :  { %2813 = vrot.lane.b32.xlu1 %v8420_v11, %s8060_s12 }
0x11c7   :  { %2563 = vrot.lane.b32.xlu0 %v8422_v13, %s8059_s11 }
0x11ca   :  { %2973 = vrot.lane.b32.xlu1 %v8420_v11, %s8061_s15 }
0x11cb   :  { %2737 = vrot.lane.b32.xlu0 %v8422_v13, %s8060_s12 }
0x123a   :  { %v2391_v1 = vpop.xlane.xlu0 %2390 }
0x123b   :  { %v2395_v52 = vsub.f32 %v2307_v42, %v2391_v1 }
0x123d   :  { %v2397_v53 = vmul.f32 1.442695, %v2395_v52 }
0x123e   :  { %v2394_v0 = vpop.xlane.xlu1 %2393  ;;  %v2566_v58 = vpop.permute.xlu0 %2565 }
0x123f   :  { %7815 = vpow2.f32 %v2397_v53  ;;  %v2396_v54 = vsub.f32 %v2385_v48, %v2394_v0  ;;  %v2071_v0 = vsel %vm217_vm2, %v8462_v32, 0.0 }
0x1241   :  { %v2399_v56 = vmul.f32 1.442695, %v2396_v54 }
0x1242   :  { %v2564_v59 = vpop.permute.xlu0 %2563  ;;  %v2642_v63 = vpop.permute.xlu1 %2641 }
0x1243   :  { %7817 = vpow2.f32 %v2399_v56  ;;  %v2074_v56 = vsel %vm217_vm2, %v8470_v36, 0.0 }
0x1246   :  { %v2738_v2 = vpop.permute.xlu0 %2737  ;;  %v2814_v3 = vpop.permute.xlu1 %2813 }
0x1249   :  { %v8504_v61 = vpop.eup %7815 }
0x124a   :  { %7354 = vmatmul.mubr.msk.f32.vlgmr.msra.gmra.mrb[24].mxu0 %vm217_vm2, %v8504_v61  ;;  %v2974_v12 = vpop.permute.xlu1 %2973  ;;  %v2401_v38 = vsel %vm217_vm2, %v8504_v61, 0.0 }
0x124b   :  { %7362 = vmatpush3.xpose.msk.msra.mxu0 %vm217_vm2, %v2566_v58  ;;  %7363 = vmatprep.mubr.msk.f32.mxu0 %vm8052_vm1, %v8051_v30 }
0x124c   :  { %7371 = vmatprep.subr.mxu0 %v8051_v30 }
0x124d   :  { %v8512_v60 = vpop.eup %7817 }
0x124e   :  { %7359 = vmatmul.mubr.msk.f32.vlgmr.msra.gmra.mrb[28].mxu1 %vm217_vm2, %v8512_v60  ;;  %7364 = vmatmul.mubr.msk.f32.vlgmr.msra.gmra.mrb[26].mxu0 %vm217_vm2, %v2564_v59  ;;  %v2404_v42 = vsel %vm217_vm2, %v8512_v60, 0.0 }
0x124f   :  { %7367 = vmatpush3.xpose.msk.msra.mxu1 %vm217_vm2, %v2644_v51  ;;  %7372 = vmatpush3.msra.mxu0 %v2738_v2 }
0x1250   :  { %7368 = vmatprep.mubr.msk.f32.mxu1 %vm8052_vm1, %v8051_v30  ;;  %7376 = vmatprep.subr.mxu1 %v8051_v30 }
0x1251   :  { %7373 = vmatprep.mubr.msk.f32.mxu0 %vm8052_vm1, %v8051_v30  ;;  %7381 = vmatprep.subr.mxu0 %v8051_v30 }
0x1252   :  { %7369 = vmatmul.mubr.msk.f32.vlgmr.msra.gmra.mrb[30].mxu1 %vm217_vm2, %v2642_v63 }
0x1253   :  { %7377 = vmatpush3.msra.mxu1 %v2814_v3  ;;  %7378 = vmatprep.mubr.msk.f32.mxu1 %vm8052_vm1, %v8051_v30 }
0x1254   :  { %7386 = vmatprep.subr.mxu1 %v8051_v30 }
0x131d   :  { %v8528_v4 = vpop.f32.mrb[24].mxu0 }
0x131e   :  { %v7355_v33 = vpop.f32.mrb[25].mxu0 }
0x1321   :  { %v8530_v62 = vpop.f32.mrb[28].mxu1  ;;  %v2637_v5 = vpop.f32.mrb[26].mxu0 }
0x1322   :  { %v7360_v6 = vpop.f32.mrb[29].mxu1  ;;  %v7365_v35 = vpop.f32.mrb[27].mxu0  ;;  %v2719_v7 = vsel %vm217_vm2, %v2637_v5, -inf }
0x1323   :  { %2720 = vmax.xlane.f32.xlu0 %v2719_v7  ;;  %v1779_v35 = vld [vmem:[#allocation7 + $0x20] sm:$0xff]  ;;  %v1780_v7 = vld [vmem:[#allocation7 + $0x28] sm:$0xff] }
0x1325   :  { %v2715_v8 = vpop.f32.mrb[30].mxu1 }
0x1326   :  { %v7370_v9 = vpop.f32.mrb[31].mxu1  ;;  %v2722_v10 = vsel %vm217_vm2, %v2715_v8, -inf }
0x1327   :  { %2723 = vmax.xlane.f32.xlu1 %v2722_v10  ;;  %v1781_v9 = vld [vmem:[#allocation7 + $0x30] sm:$0xff]  ;;  %v1782_v10 = vld [vmem:[#allocation7 + $0x38] sm:$0xff] }
0x1338   :  { %2971 = vrot.lane.b32.xlu1 %v8420_v11, %s8062_s16 }
0x1339   :  { %2895 = vrot.lane.b32.xlu0 %v8422_v13, %s8061_s15 }
0x133d   :  { %2893 = vrot.lane.b32.xlu0 %v8422_v13, %s8062_s16 }
0x13b0   :  { %v2721_v14 = vpop.xlane.xlu0 %2720 }
0x13b1   :  { %v2725_v15 = vsub.f32 %v2637_v5, %v2721_v14 }
0x13b3   :  { %v2727_v16 = vmul.f32 1.442695, %v2725_v15 }
0x13b4   :  { %v2724_v17 = vpop.xlane.xlu1 %2723  ;;  %v2896_v20 = vpop.permute.xlu0 %2895 }
0x13b5   :  { %7819 = vpow2.f32 %v2727_v16  ;;  %v2726_v18 = vsub.f32 %v2715_v8, %v2724_v17  ;;  %v7681_v8 = vpack.c.bf16 %v1780_v7, %v1779_v35 }
0x13b7   :  { %v2729_v19 = vmul.f32 1.442695, %v2726_v18 }
0x13b8   :  { %v2894_v23 = vpop.permute.xlu0 %2893  ;;  %v2972_v57 = vpop.permute.xlu1 %2971 }
0x13b9   :  { %7821 = vpow2.f32 %v2729_v19 }
0x13bf   :  { %v7820_v55 = vpop.eup %7819 }
0x13c0   :  { %7374 = vmatmul.mubr.msk.f32.vlgmr.msra.gmra.mrb[28].mxu0 %vm217_vm2, %v7820_v55  ;;  %v2731_v40 = vsel %vm217_vm2, %v7820_v55, 0.0 }
0x13c1   :  { %7382 = vmatpush3.xpose.msk.msra.mxu0 %vm217_vm2, %v2896_v20  ;;  %7383 = vmatprep.mubr.msk.f32.mxu0 %vm8052_vm1, %v8051_v30 }
0x13c2   :  { %7391 = vmatprep.subr.mxu0 %v8051_v30 }
0x13c3   :  { %v7822_v21 = vpop.eup %7821 }
0x13c4   :  { %7379 = vmatmul.mubr.msk.f32.vlgmr.msra.gmra.mrb[32].mxu1 %vm217_vm2, %v7822_v21  ;;  %7384 = vmatmul.mubr.msk.f32.vlgmr.msra.gmra.mrb[30].mxu0 %vm217_vm2, %v2894_v23  ;;  %v2734_v45 = vsel %vm217_vm2, %v7822_v21, 0.0 }
0x13c5   :  { %7387 = vmatpush3.xpose.msk.msra.mxu1 %vm217_vm2, %v2974_v12  ;;  %7388 = vmatprep.mubr.msk.f32.mxu1 %vm8052_vm1, %v8051_v30 }
0x13c6   :  { %7396 = vmatprep.subr.mxu1 %v8051_v30  ;;  %7393 = vmatprep.mubr.msk.f32.mxu0 %vm8052_vm1, %v8051_v30 }
0x13c8   :  { %7389 = vmatmul.mubr.msk.f32.vlgmr.msra.gmra.mrb[34].mxu1 %vm217_vm2, %v2972_v57 }
0x13c9   :  { %7398 = vmatprep.mubr.msk.f32.mxu1 %vm8052_vm1, %v8051_v30 }
0x1493   :  { %v2809_v25 = vpop.f32.mrb[28].mxu0 }
0x1494   :  { %v7375_v26 = vpop.f32.mrb[29].mxu0 }
0x1497   :  { %v2885_v27 = vpop.f32.mrb[32].mxu1  ;;  %v2967_v28 = vpop.f32.mrb[30].mxu0 }
0x1498   :  { %v7380_v22 = vpop.f32.mrb[33].mxu1  ;;  %v7385_v29 = vpop.f32.mrb[31].mxu0  ;;  %v3049_v31 = vsel %vm217_vm2, %v2967_v28, -inf }
0x1499   :  { %3050 = vmax.xlane.f32.xlu0 %v3049_v31 }
0x149b   :  { %v3045_v24 = vpop.f32.mrb[34].mxu1 }
0x149c   :  { %v7390_v34 = vpop.f32.mrb[35].mxu1  ;;  %v3052_v37 = vsel %vm217_vm2, %v3045_v24, -inf }
0x149d   :  { %3053 = vmax.xlane.f32.xlu1 %v3052_v37 }
0x14ae   :  { %3143 = vrot.lane.b32.xlu1 %v8420_v11, %s8063_s0 }
0x14af   :  { %3067 = vrot.lane.b32.xlu0 %v8422_v13, %s8063_s0 }
0x14ce   :  { %2402 = vadd.xlane.f32.xlu0 %v2401_v38 }
0x14d2   :  { %2732 = vadd.xlane.f32.xlu0 %v2731_v40  ;;  %2405 = vadd.xlane.f32.xlu1 %v2404_v42 }
0x14d6   :  { %2735 = vadd.xlane.f32.xlu0 %v2734_v45 }
0x1526   :  { %v3051_v46 = vpop.xlane.xlu0 %3050 }
0x1527   :  { %v3055_v47 = vsub.f32 %v2967_v28, %v3051_v46  ;;  %v6919_v46 = vld [vmem:[%s9057_s4 + $0x1] ss:$0 sm:$0xff] }
0x1529   :  { %v3057_v11 = vmul.f32 1.442695, %v3055_v47 }
0x152a   :  { %v3068_v48 = vpop.permute.xlu0 %3067  ;;  %v3054_v49 = vpop.xlane.xlu1 %3053 }
0x152b   :  { %7823 = vpow2.f32 %v3057_v11  ;;  %v3056_v13 = vsub.f32 %v3045_v24, %v3054_v49  ;;  %7392 = vmatpush3.msra.mxu0 %v3068_v48 }
0x152c   :  { %7682 = vmatprep.subr.bf16.mxu0 %v7681_v8 }
0x152d   :  { %v3059_v50 = vmul.f32 1.442695, %v3056_v13 }
0x152e   :  { %v3144_v51 = vpop.permute.xlu1 %3143 }
0x152f   :  { %7825 = vpow2.f32 %v3059_v50  ;;  %7397 = vmatpush3.msra.mxu1 %v3144_v51 }
0x1535   :  { %v7824_v1 = vpop.eup %7823 }
0x1536   :  { %7394 = vmatmul.mubr.msk.f32.vlgmr.msra.gmra.mrb[32].mxu0 %vm217_vm2, %v7824_v1  ;;  %v3061_v52 = vsel %vm217_vm2, %v7824_v1, 0.0 }
0x1537   :  { %3062 = vadd.xlane.f32.xlu0 %v3061_v52  ;;  %7684 = vmatpush3.bf16.msra.mxu0 %v7681_v8 }
0x1539   :  { %v7826_v53 = vpop.eup %7825 }
0x153a   :  { %7399 = vmatmul.mubr.msk.f32.vlgmr.msra.gmra.mrb[36].mxu1 %vm217_vm2, %v7826_v53  ;;  %v3064_v54 = vsel %vm217_vm2, %v7826_v53, 0.0 }
0x153b   :  { %2072 = vadd.xlane.f32.xlu0 %v2071_v0  ;;  %3065 = vadd.xlane.f32.xlu1 %v3064_v54 }
0x153f   :  { %2075 = vadd.xlane.f32.xlu1 %v2074_v56 }
0x155b   :  { %v2403_v58 = vpop.xlane.xlu0 %2402 }
0x155c   :  { %7827 = vrcp.f32 %v2403_v58 }
0x155f   :  { %v2733_v59 = vpop.xlane.xlu0 %2732  ;;  %v2406_v61 = vpop.xlane.xlu1 %2405 }
0x1560   :  { %7829 = vrcp.f32 %v2406_v61 }
0x1561   :  { %7831 = vrcp.f32 %v2733_v59 }
0x1563   :  { %v2736_v63 = vpop.xlane.xlu0 %2735 }
0x1564   :  { %7833 = vrcp.f32 %v2736_v63 }
0x1566   :  { %v7828_v60 = vpop.eup %7827 }
0x1567   :  { %v2561_v2 = vmul.f32 %v7828_v60, %v8528_v4  ;;  %v1786_v60 = vld [vmem:[#allocation8 + $0x20] sm:$0xff] }
0x1569   :  { %3225 = vrot.lane.b32.xlu0 %v2561_v2, %s8048_s14  ;;  %v1787_v2 = vld [vmem:[#allocation8 + $0x28] sm:$0xff] }
0x156a   :  { %v7830_v32 = vpop.eup %7829 }
0x156b   :  { %v2562_v3 = vmul.f32 %v7830_v32, %v8530_v62  ;;  %v7832_v33 = vpop.eup %7831  ;;  %v7685_v62 = vpack.c.bf16 %v1782_v10, %v1781_v9  ;;  %v1788_v32 = vld [vmem:[#allocation8 + $0x30] sm:$0xff] }
0x156c   :  { %v2891_v36 = vmul.f32 %v7832_v33, %v2809_v25  ;;  %v1789_v33 = vld [vmem:[#allocation8 + $0x38] sm:$0xff] }
0x156d   :  { %3227 = vrot.lane.b32.xlu1 %v2562_v3, %s8048_s14  ;;  %7686 = vmatprep.subr.bf16.mxu0 %v7685_v62  ;;  %v7689_v3 = vpack.c.bf16 %v1787_v2, %v1786_v60 }
0x156e   :  { %v7834_v5 = vpop.eup %7833  ;;  %7688 = vmatpush3.bf16.msra.mxu0 %v7685_v62 }
0x156f   :  { %v2892_v6 = vmul.f32 %v7834_v5, %v2885_v27  ;;  %7690 = vmatprep.subr.bf16.mxu1 %v7689_v3 }
0x1570   :  { %7692 = vmatpush3.bf16.msra.mxu1 %v7689_v3 }
0x1571   :  { %3233 = vrot.lane.b32.xlu1 %v2891_v36, %s8064_s27  ;;  %v7693_v36 = vpack.c.bf16 %v1789_v33, %v1788_v32 }
0x1573   :  { %7694 = vmatprep.subr.bf16.mxu1 %v7693_v36 }
0x1574   :  { %7696 = vmatpush3.bf16.msra.mxu1 %v7693_v36 }
0x1575   :  { %3235 = vrot.lane.b32.xlu1 %v2892_v6, %s8064_s27  ;;  %7434 = vmatprep.subr.mxu1 %v8051_v30 }
0x15c4   :  { %v3063_v4 = vpop.xlane.xlu0 %3062 }
0x15c5   :  { %7835 = vrcp.f32 %v3063_v4 }
0x15c8   :  { %v3066_v12 = vpop.xlane.xlu1 %3065  ;;  %v2073_v21 = vpop.xlane.xlu0 %2072 }
0x15c9   :  { %7837 = vrcp.f32 %v3066_v12 }
0x15ca   :  { %7839 = vrcp.f32 %v2073_v21 }
0x15cc   :  { %v2076_v23 = vpop.xlane.xlu1 %2075 }
0x15cd   :  { %7841 = vrcp.f32 %v2076_v23 }
0x15cf   :  { %v7836_v14 = vpop.eup %7835 }
0x15d3   :  { %v7838_v18 = vpop.eup %7837 }
0x15d4   :  { %v7840_v25 = vpop.eup %7839 }
0x15d5   :  { %v2231_v28 = vmul.f32 %v7840_v25, %v8486_v39 }
0x15d7   :  { %v7842_v22 = vpop.eup %7841 }
0x15d8   :  { %v2232_v37 = vmul.f32 %v7842_v22, %v8488_v41 }
0x15db   :  { %v3226_v27 = vpop.permute.xlu0 %3225 }
0x15dc   :  { %v3247_v29 = vsel %vm217_vm2, %v2231_v28, %v3226_v27 }
0x15df   :  { %v3228_v57 = vpop.permute.xlu1 %3227 }
0x15e0   :  { %v3248_v40 = vsel %vm217_vm2, %v2232_v37, %v3228_v57  ;;  %v3461_v37 = vld [vmem:[#allocation5 + $0x48] sm:$0xff] }
0x15e3   :  { %v3234_v26 = vpop.permute.xlu1 %3233 }
0x15e4   :  { %v3249_v31 = vsel %vm1559_vm3, %v3247_v29, %v3234_v26 }
0x15e7   :  { %v3236_v24 = vpop.permute.xlu1 %3235 }
0x15e8   :  { %v3250_v42 = vsel %vm1559_vm3, %v3248_v40, %v3236_v24 }
0x1609   :  { %v3139_v15 = vpop.f32.mrb[32].mxu0 }
0x160a   :  { %v3221_v16 = vmul.f32 %v7836_v14, %v3139_v15  ;;  %v7395_v17 = vpop.f32.mrb[33].mxu0  ;;  %v6922_v14 = vld [vmem:[%s9059_s6 + $0x1] ss:$0 sm:$0xff] }
0x160c   :  { %3241 = vrot.lane.b32.xlu0 %v3221_v16, %s8065_s17 }
0x160d   :  { %v3215_v19 = vpop.f32.mrb[36].mxu1 }
0x160e   :  { %v3222_v20 = vmul.f32 %v7838_v18, %v3215_v19  ;;  %v7400_v55 = vpop.f32.mrb[37].mxu1 }
0x1610   :  { %3243 = vrot.lane.b32.xlu1 %v3222_v20, %s8065_s17 }
0x167e   :  { %v3242_v34 = vpop.permute.xlu0 %3241 }
0x167f   :  { %v3251_v38 = vsel %vm1562_vm4, %v3249_v31, %v3242_v34  ;;  %v3460_v34 = vld [vmem:[#allocation5 + $0x40] sm:$0xff] }
0x1680   :  { %7409 = vmatprep.mubr.msk.f32.mxu0 %vm99_vm0, %v3251_v38  ;;  %v3462_v38 = vld [vmem:[#allocation5 + $0x50] sm:$0xff]  ;;  %v7697_v40 = vpack.c.bf16 %v3461_v37, %v3460_v34 }
0x1682   :  { %v3244_v45 = vpop.permute.xlu1 %3243  ;;  %7698 = vmatprep.subr.bf16.mxu0 %v7697_v40 }
0x1683   :  { %v3252_v39 = vsel %vm1562_vm4, %v3250_v42, %v3244_v45  ;;  %v3463_v42 = vld [vmem:[#allocation5 + $0x58] sm:$0xff] }
0x1684   :  { %7410 = vmatmul.mubr.msk.f32.vlgmr.msra.gmra.mrb[34].mxu0 %vm99_vm0, %v3252_v39  ;;  %v7701_v45 = vpack.c.bf16 %v3463_v42, %v3462_v38 }
0x1685   :  { %7700 = vmatpush3.bf16.msra.mxu0 %v7697_v40 }
0x1686   :  { %7702 = vmatprep.subr.bf16.mxu0 %v7701_v45 }
0x1689   :  { %7704 = vmatpush3.bf16.msra.mxu0 %v7701_v45 }
0x168a   :  { %7444 = vmatprep.subr.mxu0 %v8051_v30 }
0x1757   :  { %v7411_v47 = vpop.f32.mrb[34].mxu0 }
0x1758   :  { %v3337_v11 = vadd.f32 %v7411_v47, %v6919_v46  ;;  %v3331_v41 = vpop.f32.mrb[35].mxu0 }
0x1759   :  { %v3332_v48 = vadd.f32 %v6919_v46, %v3331_v41 }
0x175a   :  { %v3341_v49 = vadd.f32 %v3337_v11, %v8399_v43 }
0x175b   :  { %v3340_v13 = vadd.f32 %v3332_v48, %v8402_v44 }
0x175c   :  { %v3345_v50 = vsel %vm99_vm0, %v3341_v49, 0.0 }
0x175d   :  { %3346 = vadd.xlane.f32.xlu1 %v3345_v50  ;;  %v3342_v51 = vsel %vm99_vm0, %v3340_v13, 0.0 }
0x175e   :  { %3343 = vadd.xlane.f32.xlu0 %v3342_v51 }
0x17ea   :  { %v3347_v1 = vpop.xlane.xlu1 %3346 }
0x17eb   :  { %v3349_v52 = vmul.f32 0.03125, %v3347_v1  ;;  %v3344_v53 = vpop.xlane.xlu0 %3343  ;;  %v6928_v1 = vld [vmem:[%s9055_s2 + $0x2] ss:$0 sm:$0xff] }
0x17ec   :  { %v3348_v0 = vmul.f32 0.03125, %v3344_v53 }
0x17ed   :  { %v3351_v54 = vsub.f32 %v3341_v49, %v3349_v52 }
0x17ee   :  { %v3350_v56 = vsub.f32 %v3340_v13, %v3348_v0 }
0x17ef   :  { %v3353_v61 = vmul.f32 %v3351_v54, %v3351_v54 }
0x17f0   :  { %v3352_v58 = vmul.f32 %v3350_v56, %v3350_v56 }
0x17f1   :  { %v3357_v63 = vsel %vm99_vm0, %v3353_v61, 0.0 }
0x17f2   :  { %v3354_v59 = vsel %vm99_vm0, %v3352_v58, 0.0 }
0x17f3   :  { %3355 = vadd.xlane.f32.xlu0 %v3354_v59 }
0x17f7   :  { %3358 = vadd.xlane.f32.xlu0 %v3357_v63 }
0x1880   :  { %v3356_v5 = vpop.xlane.xlu0 %3355 }
0x1881   :  { %v3360_v6 = vmul.f32 0.03125, %v3356_v5 }
0x1883   :  { %v3362_v35 = vadd.f32 1e-05, %v3360_v6 }
0x1884   :  { %v3359_v7 = vpop.xlane.xlu0 %3358 }
0x1885   :  { %7843 = vrsqrt.f32 %v3362_v35  ;;  %v3361_v8 = vmul.f32 0.03125, %v3359_v7 }
0x1887   :  { %v3363_v4 = vadd.f32 1e-05, %v3361_v8 }
0x1889   :  { %7845 = vrsqrt.f32 %v3363_v4 }
0x188f   :  { %v7844_v9 = vpop.eup %7843 }
0x1890   :  { %v3366_v10 = vmul.f32 %v7844_v9, %v3350_v56 }
0x1892   :  { %7420 = vmatprep.mubr.msk.f32.mxu1 %vm99_vm0, %v3366_v10 }
0x1893   :  { %v7846_v62 = vpop.eup %7845 }
0x1894   :  { %v3367_v12 = vmul.f32 %v7846_v62, %v3351_v54 }
0x1896   :  { %7421 = vmatmul.mubr.msk.f32.vlgmr.msra.gmra.mrb[38].mxu1 %vm99_vm0, %v3367_v12 }
0x1897   :  { %7436 = vmatprep.mubr.msk.f32.mxu1 %vm8052_vm1, %v8051_v30 }
0x1969   :  { %v7422_v15 = vpop.f32.mrb[38].mxu1 }
0x196a   :  { %v3452_v16 = vadd.f32 %v7422_v15, %v6922_v14  ;;  %v3446_v17 = vpop.f32.mrb[39].mxu1 }
0x196b   :  { %v3447_v18 = vadd.f32 %v6922_v14, %v3446_v17 }
0x196c   :  { %v3456_v19 = vmax.f32 %v3452_v16, 0.0 }
0x196d   :  { %v3455_v20 = vmax.f32 %v3447_v18, 0.0 }
0x196e   :  { %v8612_v55 = vadd.f32 %v3456_v19, %v8399_v43 }
0x196f   :  { %v8615_v21 = vadd.f32 %v3455_v20, %v8402_v44 }
0x1970   :  { %v3483_v23 = vsel %vm99_vm0, %v8612_v55, 0.0 }
0x1971   :  { %3484 = vadd.xlane.f32.xlu1 %v3483_v23  ;;  %v3480_v57 = vsel %vm99_vm0, %v8615_v21, 0.0 }
0x1972   :  { %3481 = vadd.xlane.f32.xlu0 %v3480_v57 }
0x19fe   :  { %v3485_v25 = vpop.xlane.xlu1 %3484 }
0x19ff   :  { %v3487_v26 = vmul.f32 0.03125, %v3485_v25  ;;  %v3482_v27 = vpop.xlane.xlu0 %3481 }
0x1a00   :  { %v3486_v28 = vmul.f32 0.03125, %v3482_v27 }
0x1a01   :  { %v3489_v22 = vsub.f32 %v8612_v55, %v3487_v26 }
0x1a02   :  { %v3488_v43 = vsub.f32 %v8615_v21, %v3486_v28 }
0x1a03   :  { %v3491_v29 = vmul.f32 %v3489_v22, %v3489_v22 }
0x1a04   :  { %v3490_v31 = vmul.f32 %v3488_v43, %v3488_v43 }
0x1a05   :  { %v3495_v44 = vsel %vm99_vm0, %v3491_v29, 0.0 }
0x1a06   :  { %3496 = vadd.xlane.f32.xlu1 %v3495_v44  ;;  %v3492_v24 = vsel %vm99_vm0, %v3490_v31, 0.0 }
0x1a07   :  { %3493 = vadd.xlane.f32.xlu0 %v3492_v24 }
0x1a93   :  { %v3497_v39 = vpop.xlane.xlu1 %3496 }
0x1a94   :  { %v3499_v46 = vmul.f32 0.03125, %v3497_v39  ;;  %v3494_v47 = vpop.xlane.xlu0 %3493 }
0x1a95   :  { %v3498_v11 = vmul.f32 0.03125, %v3494_v47 }
0x1a96   :  { %v3501_v41 = vadd.f32 1e-05, %v3499_v46 }
0x1a97   :  { %v3500_v48 = vadd.f32 1e-05, %v3498_v11 }
0x1a98   :  { %7847 = vrsqrt.f32 %v3501_v41 }
0x1a99   :  { %7849 = vrsqrt.f32 %v3500_v48 }
0x1aa2   :  { %v7848_v49 = vpop.eup %7847 }
0x1aa3   :  { %v7850_v13 = vpop.eup %7849  ;;  %v3505_v51 = vmul.f32 %v7848_v49, %v3489_v22 }
0x1aa4   :  { %v3504_v50 = vmul.f32 %v7850_v13, %v3488_v43 }
0x1aa6   :  { %7431 = vmatprep.mubr.msk.f32.mxu0 %vm99_vm0, %v3504_v50 }
0x1aa7   :  { %7432 = vmatmul.mubr.msk.f32.vlgmr.msra.gmra.mrb[36].mxu0 %vm99_vm0, %v3505_v51 }
0x1aa8   :  { %7446 = vmatprep.mubr.msk.f32.mxu0 %vm8052_vm1, %v8051_v30 }
0x1b7a   :  { %v7433_v52 = vpop.f32.mrb[36].mxu0 }
0x1b7b   :  { %v8633_v53 = vadd.f32 %v7433_v52, %v6928_v1  ;;  %v3584_v0 = vpop.f32.mrb[37].mxu0 }
0x1b7c   :  { %v8635_v54 = vadd.f32 %v6928_v1, %v3584_v0 }
0x1b7d   :  { %3671 = vrot.lane.b32.xlu1 %v8633_v53, %s8053_s28 }
0x1b7e   :  { %3594 = vrot.lane.b32.xlu0 %v8635_v54, %s8053_s28 }
0x1bef   :  { %v3672_v58 = vpop.permute.xlu1 %3671 }
0x1bf0   :  { %v3595_v56 = vpop.permute.xlu0 %3594 }
0x1bf1   :  { %7435 = vmatpush3.xpose.msk.msra.mxu1 %vm217_vm2, %v3595_v56 }
0x1bf2   :  { %7439 = vmatprep.subr.mxu1 %v8051_v30 }
0x1bf4   :  { %7437 = vmatmul.mubr.msk.f32.vlgmr.msra.gmra.mrb[40].mxu1 %vm217_vm2, %v8635_v54 }
0x1bf5   :  { %7440 = vmatpush3.xpose.msk.msra.mxu1 %vm217_vm2, %v3672_v58  ;;  %7441 = vmatprep.mubr.msk.f32.mxu1 %vm8052_vm1, %v8051_v30 }
0x1bf6   :  { %7449 = vmatprep.subr.mxu1 %v8051_v30 }
0x1bf8   :  { %7442 = vmatmul.mubr.msk.f32.vlgmr.msra.gmra.mrb[42].mxu1 %vm217_vm2, %v8633_v53 }
0x1bf9   :  { %7451 = vmatprep.mubr.msk.f32.mxu1 %vm8052_vm1, %v8051_v30 }
0x1cc7   :  { %v3666_v59 = vpop.f32.mrb[40].mxu1 }
0x1cc8   :  { %v7438_v61 = vpop.f32.mrb[41].mxu1  ;;  %v3747_v63 = vsel %vm217_vm2, %v3666_v59, -inf }
0x1cc9   :  { %3748 = vmax.xlane.f32.xlu1 %v3747_v63 }
0x1ccb   :  { %v3743_v60 = vpop.f32.mrb[42].mxu1 }
0x1ccc   :  { %v7443_v2 = vpop.f32.mrb[43].mxu1  ;;  %v3750_v32 = vsel %vm217_vm2, %v3743_v60, -inf }
0x1ccd   :  { %3751 = vmax.xlane.f32.xlu0 %v3750_v32 }
0x1cda   :  { %3841 = vrot.lane.b32.xlu1 %v8633_v53, %s8054_s29 }
0x1cde   :  { %3923 = vrot.lane.b32.xlu1 %v8635_v54, %s8055_s30 }
0x1ce2   :  { %4001 = vrot.lane.b32.xlu1 %v8633_v53, %s8055_s30 }
0x1ce3   :  { %3765 = vrot.lane.b32.xlu0 %v8635_v54, %s8054_s29 }
0x1ce6   :  { %3999 = vrot.lane.b32.xlu1 %v8633_v53, %s8056_s8 }
0x1ce7   :  { %3921 = vrot.lane.b32.xlu0 %v8635_v54, %s8056_s8 }
0x1cea   :  { %4171 = vrot.lane.b32.xlu1 %v8633_v53, %s8057_s9 }
0x1ceb   :  { %4095 = vrot.lane.b32.xlu0 %v8635_v54, %s8057_s9 }
0x1cee   :  { %4331 = vrot.lane.b32.xlu1 %v8633_v53, %s8058_s10 }
0x1d56   :  { %v3749_v3 = vpop.xlane.xlu1 %3748 }
0x1d57   :  { %v3753_v33 = vsub.f32 %v3666_v59, %v3749_v3 }
0x1d59   :  { %v3755_v36 = vmul.f32 1.442695, %v3753_v33 }
0x1d5a   :  { %v3842_v5 = vpop.permute.xlu1 %3841  ;;  %v3752_v6 = vpop.xlane.xlu0 %3751 }
0x1d5b   :  { %7851 = vpow2.f32 %v3755_v36  ;;  %v3754_v35 = vsub.f32 %v3743_v60, %v3752_v6  ;;  %7450 = vmatpush3.msra.mxu1 %v3842_v5 }
0x1d5c   :  { %7459 = vmatprep.subr.mxu1 %v8051_v30 }
0x1d5d   :  { %v3757_v7 = vmul.f32 1.442695, %v3754_v35 }
0x1d5e   :  { %v3924_v8 = vpop.permute.xlu1 %3923  ;;  %v3766_v4 = vpop.permute.xlu0 %3765 }
0x1d5f   :  { %7853 = vpow2.f32 %v3757_v7  ;;  %7445 = vmatpush3.msra.mxu0 %v3766_v4 }
0x1d60   :  { %7454 = vmatprep.subr.mxu0 %v8051_v30 }
0x1d62   :  { %v4002_v9 = vpop.permute.xlu1 %4001  ;;  %v3922_v10 = vpop.permute.xlu0 %3921 }
0x1d65   :  { %v8675_v62 = vpop.eup %7851 }
0x1d66   :  { %7447 = vmatmul.mubr.msk.f32.vlgmr.msra.gmra.mrb[38].mxu0 %vm217_vm2, %v8675_v62  ;;  %v4000_v12 = vpop.permute.xlu1 %3999  ;;  %v4096_v15 = vpop.permute.xlu0 %4095 }
0x1d67   :  { %7455 = vmatpush3.xpose.msk.msra.mxu0 %vm217_vm2, %v3924_v8  ;;  %7456 = vmatprep.mubr.msk.f32.mxu0 %vm8052_vm1, %v8051_v30 }
0x1d68   :  { %7464 = vmatprep.subr.mxu0 %v8051_v30 }
0x1d69   :  { %v8683_v14 = vpop.eup %7853 }
0x1d6a   :  { %7452 = vmatmul.mubr.msk.f32.vlgmr.msra.gmra.mrb[44].mxu1 %vm217_vm2, %v8683_v14  ;;  %7457 = vmatmul.mubr.msk.f32.vlgmr.msra.gmra.mrb[40].mxu0 %vm217_vm2, %v3922_v10  ;;  %v4172_v16 = vpop.permute.xlu1 %4171 }
0x1d6b   :  { %7460 = vmatpush3.xpose.msk.msra.mxu1 %vm217_vm2, %v4002_v9  ;;  %7465 = vmatpush3.msra.mxu0 %v4096_v15 }
0x1d6c   :  { %7461 = vmatprep.mubr.msk.f32.mxu1 %vm8052_vm1, %v8051_v30  ;;  %7469 = vmatprep.subr.mxu1 %v8051_v30 }
0x1d6d   :  { %7466 = vmatprep.mubr.msk.f32.mxu0 %vm8052_vm1, %v8051_v30  ;;  %7474 = vmatprep.subr.mxu0 %v8051_v30 }
0x1d6e   :  { %7462 = vmatmul.mubr.msk.f32.vlgmr.msra.gmra.mrb[46].mxu1 %vm217_vm2, %v4000_v12  ;;  %v4332_v22 = vpop.permute.xlu1 %4331 }
0x1d6f   :  { %7470 = vmatpush3.msra.mxu1 %v4172_v16  ;;  %7471 = vmatprep.mubr.msk.f32.mxu1 %vm8052_vm1, %v8051_v30 }
0x1d70   :  { %7479 = vmatprep.subr.mxu1 %v8051_v30 }
0x1e39   :  { %v8699_v17 = vpop.f32.mrb[38].mxu0 }
0x1e3a   :  { %v7448_v18 = vpop.f32.mrb[39].mxu0 }
0x1e3d   :  { %v8701_v19 = vpop.f32.mrb[44].mxu1  ;;  %v3995_v20 = vpop.f32.mrb[40].mxu0 }
0x1e3e   :  { %v7453_v23 = vpop.f32.mrb[45].mxu1  ;;  %v7458_v57 = vpop.f32.mrb[41].mxu0  ;;  %v4077_v25 = vsel %vm217_vm2, %v3995_v20, -inf }
0x1e3f   :  { %4078 = vmax.xlane.f32.xlu0 %v4077_v25 }
0x1e41   :  { %v4073_v26 = vpop.f32.mrb[46].mxu1 }
0x1e42   :  { %v7463_v27 = vpop.f32.mrb[47].mxu1  ;;  %v4080_v28 = vsel %vm217_vm2, %v4073_v26, -inf }
0x1e43   :  { %4081 = vmax.xlane.f32.xlu1 %v4080_v28 }
0x1e54   :  { %4329 = vrot.lane.b32.xlu1 %v8633_v53, %s8059_s11 }
0x1e55   :  { %4253 = vrot.lane.b32.xlu0 %v8635_v54, %s8058_s10 }
0x1e58   :  { %4501 = vrot.lane.b32.xlu1 %v8633_v53, %s8060_s12 }
0x1e59   :  { %4251 = vrot.lane.b32.xlu0 %v8635_v54, %s8059_s11 }
0x1e5c   :  { %4661 = vrot.lane.b32.xlu1 %v8633_v53, %s8061_s15 }
0x1e5d   :  { %4425 = vrot.lane.b32.xlu0 %v8635_v54, %s8060_s12 }
0x1ecc   :  { %v4079_v43 = vpop.xlane.xlu0 %4078 }
0x1ecd   :  { %v4083_v29 = vsub.f32 %v3995_v20, %v4079_v43 }
0x1ecf   :  { %v4085_v31 = vmul.f32 1.442695, %v4083_v29 }
0x1ed0   :  { %v4082_v44 = vpop.xlane.xlu1 %4081  ;;  %v4254_v37 = vpop.permute.xlu0 %4253 }
0x1ed1   :  { %7855 = vpow2.f32 %v4085_v31  ;;  %v4084_v24 = vsub.f32 %v4073_v26, %v4082_v44  ;;  %v3759_v44 = vsel %vm217_vm2, %v8675_v62, 0.0 }
0x1ed3   :  { %v4087_v34 = vmul.f32 1.442695, %v4084_v24 }
0x1ed4   :  { %v4252_v38 = vpop.permute.xlu0 %4251  ;;  %v4330_v42 = vpop.permute.xlu1 %4329 }
0x1ed5   :  { %7857 = vpow2.f32 %v4087_v34  ;;  %v3762_v34 = vsel %vm217_vm2, %v8683_v14, 0.0 }
0x1ed8   :  { %v4426_v39 = vpop.permute.xlu0 %4425  ;;  %v4502_v46 = vpop.permute.xlu1 %4501 }
0x1edb   :  { %v8717_v40 = vpop.eup %7855 }
0x1edc   :  { %7467 = vmatmul.mubr.msk.f32.vlgmr.msra.gmra.mrb[42].mxu0 %vm217_vm2, %v8717_v40  ;;  %v4662_v0 = vpop.permute.xlu1 %4661  ;;  %v4089_v16 = vsel %vm217_vm2, %v8717_v40, 0.0 }
0x1edd   :  { %7475 = vmatpush3.xpose.msk.msra.mxu0 %vm217_vm2, %v4254_v37  ;;  %7476 = vmatprep.mubr.msk.f32.mxu0 %vm8052_vm1, %v8051_v30 }
0x1ede   :  { %7484 = vmatprep.subr.mxu0 %v8051_v30 }
0x1edf   :  { %v8725_v45 = vpop.eup %7857 }
0x1ee0   :  { %7472 = vmatmul.mubr.msk.f32.vlgmr.msra.gmra.mrb[48].mxu1 %vm217_vm2, %v8725_v45  ;;  %7477 = vmatmul.mubr.msk.f32.vlgmr.msra.gmra.mrb[44].mxu0 %vm217_vm2, %v4252_v38  ;;  %v4092_v20 = vsel %vm217_vm2, %v8725_v45, 0.0 }
0x1ee1   :  { %7480 = vmatpush3.xpose.msk.msra.mxu1 %vm217_vm2, %v4332_v22  ;;  %7485 = vmatpush3.msra.mxu0 %v4426_v39 }
0x1ee2   :  { %7481 = vmatprep.mubr.msk.f32.mxu1 %vm8052_vm1, %v8051_v30  ;;  %7489 = vmatprep.subr.mxu1 %v8051_v30 }
0x1ee3   :  { %7486 = vmatprep.mubr.msk.f32.mxu0 %vm8052_vm1, %v8051_v30  ;;  %7494 = vmatprep.subr.mxu0 %v8051_v30 }
0x1ee4   :  { %7482 = vmatmul.mubr.msk.f32.vlgmr.msra.gmra.mrb[50].mxu1 %vm217_vm2, %v4330_v42 }
0x1ee5   :  { %7490 = vmatpush3.msra.mxu1 %v4502_v46  ;;  %7491 = vmatprep.mubr.msk.f32.mxu1 %vm8052_vm1, %v8051_v30 }
0x1ee6   :  { %7499 = vmatprep.subr.mxu1 %v8051_v30 }
0x1faf   :  { %v8741_v47 = vpop.f32.mrb[42].mxu0 }
0x1fb0   :  { %v7468_v11 = vpop.f32.mrb[43].mxu0 }
0x1fb3   :  { %v8743_v41 = vpop.f32.mrb[48].mxu1  ;;  %v4325_v48 = vpop.f32.mrb[44].mxu0 }
0x1fb4   :  { %v7473_v49 = vpop.f32.mrb[49].mxu1  ;;  %v7478_v13 = vpop.f32.mrb[45].mxu0  ;;  %v4407_v50 = vsel %vm217_vm2, %v4325_v48, -inf }
0x1fb5   :  { %4408 = vmax.xlane.f32.xlu0 %v4407_v50  ;;  %v3467_v13 = vld [vmem:[#allocation7 + $0x40] sm:$0xff]  ;;  %v3468_v50 = vld [vmem:[#allocation7 + $0x48] sm:$0xff] }
0x1fb7   :  { %v4403_v51 = vpop.f32.mrb[50].mxu1 }
0x1fb8   :  { %v7483_v1 = vpop.f32.mrb[51].mxu1  ;;  %v4410_v52 = vsel %vm217_vm2, %v4403_v51, -inf }
0x1fb9   :  { %4411 = vmax.xlane.f32.xlu1 %v4410_v52  ;;  %v3469_v1 = vld [vmem:[#allocation7 + $0x50] sm:$0xff]  ;;  %v3470_v52 = vld [vmem:[#allocation7 + $0x58] sm:$0xff] }
0x1fca   :  { %4659 = vrot.lane.b32.xlu1 %v8633_v53, %s8062_s16 }
0x1fcb   :  { %4583 = vrot.lane.b32.xlu0 %v8635_v54, %s8061_s15 }
0x1fcf   :  { %4581 = vrot.lane.b32.xlu0 %v8635_v54, %s8062_s16 }
0x2042   :  { %v4409_v56 = vpop.xlane.xlu0 %4408 }
0x2043   :  { %v4413_v58 = vsub.f32 %v4325_v48, %v4409_v56 }
0x2045   :  { %v4415_v59 = vmul.f32 1.442695, %v4413_v58 }
0x2046   :  { %v4412_v61 = vpop.xlane.xlu1 %4411  ;;  %v4584_v2 = vpop.permute.xlu0 %4583 }
0x2047   :  { %7859 = vpow2.f32 %v4415_v59  ;;  %v4414_v63 = vsub.f32 %v4403_v51, %v4412_v61  ;;  %v7705_v51 = vpack.c.bf16 %v3468_v50, %v3467_v13 }
0x2049   :  { %v4417_v60 = vmul.f32 1.442695, %v4414_v63 }
0x204a   :  { %v4582_v33 = vpop.permute.xlu0 %4581  ;;  %v4660_v36 = vpop.permute.xlu1 %4659 }
0x204b   :  { %7861 = vpow2.f32 %v4417_v60 }
0x2051   :  { %v7860_v32 = vpop.eup %7859 }
0x2052   :  { %7487 = vmatmul.mubr.msk.f32.vlgmr.msra.gmra.mrb[46].mxu0 %vm217_vm2, %v7860_v32  ;;  %v4419_v18 = vsel %vm217_vm2, %v7860_v32, 0.0 }
0x2053   :  { %7495 = vmatpush3.xpose.msk.msra.mxu0 %vm217_vm2, %v4584_v2  ;;  %7496 = vmatprep.mubr.msk.f32.mxu0 %vm8052_vm1, %v8051_v30 }
0x2054   :  { %7504 = vmatprep.subr.mxu0 %v8051_v30 }
0x2055   :  { %v7862_v3 = vpop.eup %7861 }
0x2056   :  { %7492 = vmatmul.mubr.msk.f32.vlgmr.msra.gmra.mrb[52].mxu1 %vm217_vm2, %v7862_v3  ;;  %7497 = vmatmul.mubr.msk.f32.vlgmr.msra.gmra.mrb[48].mxu0 %vm217_vm2, %v4582_v33  ;;  %v4422_v23 = vsel %vm217_vm2, %v7862_v3, 0.0 }
0x2057   :  { %7500 = vmatpush3.xpose.msk.msra.mxu1 %vm217_vm2, %v4662_v0  ;;  %7501 = vmatprep.mubr.msk.f32.mxu1 %vm8052_vm1, %v8051_v30 }
0x2058   :  { %7509 = vmatprep.subr.mxu1 %v8051_v30  ;;  %7506 = vmatprep.mubr.msk.f32.mxu0 %vm8052_vm1, %v8051_v30 }
0x205a   :  { %7502 = vmatmul.mubr.msk.f32.vlgmr.msra.gmra.mrb[54].mxu1 %vm217_vm2, %v4660_v36 }
0x205b   :  { %7511 = vmatprep.mubr.msk.f32.mxu1 %vm8052_vm1, %v8051_v30 }
0x2125   :  { %v4497_v5 = vpop.f32.mrb[46].mxu0 }
0x2126   :  { %v7488_v6 = vpop.f32.mrb[47].mxu0 }
0x2129   :  { %v4573_v35 = vpop.f32.mrb[52].mxu1  ;;  %v4655_v7 = vpop.f32.mrb[48].mxu0 }
0x212a   :  { %v7493_v8 = vpop.f32.mrb[53].mxu1  ;;  %v7498_v4 = vpop.f32.mrb[49].mxu0  ;;  %v4737_v9 = vsel %vm217_vm2, %v4655_v7, -inf }
0x212b   :  { %4738 = vmax.xlane.f32.xlu0 %v4737_v9 }
0x212d   :  { %v4733_v10 = vpop.f32.mrb[54].mxu1 }
0x212e   :  { %v7503_v12 = vpop.f32.mrb[55].mxu1  ;;  %v4740_v15 = vsel %vm217_vm2, %v4733_v10, -inf }
0x212f   :  { %4741 = vmax.xlane.f32.xlu1 %v4740_v15 }
0x2140   :  { %4831 = vrot.lane.b32.xlu1 %v8633_v53, %s8063_s0 }
0x2141   :  { %4755 = vrot.lane.b32.xlu0 %v8635_v54, %s8063_s0 }
0x2160   :  { %4090 = vadd.xlane.f32.xlu0 %v4089_v16 }
0x2164   :  { %4420 = vadd.xlane.f32.xlu0 %v4419_v18  ;;  %4093 = vadd.xlane.f32.xlu1 %v4092_v20 }
0x2168   :  { %4423 = vadd.xlane.f32.xlu0 %v4422_v23 }
0x21b8   :  { %v4739_v57 = vpop.xlane.xlu0 %4738 }
0x21b9   :  { %v4743_v25 = vsub.f32 %v4655_v7, %v4739_v57  ;;  %v6955_v57 = vld [vmem:[%s9057_s4 + $0x2] ss:$0 sm:$0xff] }
0x21bb   :  { %v4745_v53 = vmul.f32 1.442695, %v4743_v25 }
0x21bc   :  { %v4756_v26 = vpop.permute.xlu0 %4755  ;;  %v4742_v27 = vpop.xlane.xlu1 %4741 }
0x21bd   :  { %7863 = vpow2.f32 %v4745_v53  ;;  %v4744_v54 = vsub.f32 %v4733_v10, %v4742_v27  ;;  %7505 = vmatpush3.msra.mxu0 %v4756_v26 }
0x21be   :  { %7706 = vmatprep.subr.bf16.mxu0 %v7705_v51 }
0x21bf   :  { %v4747_v28 = vmul.f32 1.442695, %v4744_v54 }
0x21c0   :  { %v4832_v22 = vpop.permute.xlu1 %4831 }
0x21c1   :  { %7865 = vpow2.f32 %v4747_v28  ;;  %7510 = vmatpush3.msra.mxu1 %v4832_v22 }
0x21c7   :  { %v7864_v43 = vpop.eup %7863 }
0x21c8   :  { %7507 = vmatmul.mubr.msk.f32.vlgmr.msra.gmra.mrb[50].mxu0 %vm217_vm2, %v7864_v43  ;;  %v4749_v29 = vsel %vm217_vm2, %v7864_v43, 0.0 }
0x21c9   :  { %4750 = vadd.xlane.f32.xlu0 %v4749_v29  ;;  %7708 = vmatpush3.bf16.msra.mxu0 %v7705_v51 }
0x21cb   :  { %v7866_v31 = vpop.eup %7865 }
0x21cc   :  { %7512 = vmatmul.mubr.msk.f32.vlgmr.msra.gmra.mrb[56].mxu1 %vm217_vm2, %v7866_v31  ;;  %v4752_v24 = vsel %vm217_vm2, %v7866_v31, 0.0 }
0x21cd   :  { %3760 = vadd.xlane.f32.xlu0 %v3759_v44  ;;  %4753 = vadd.xlane.f32.xlu1 %v4752_v24 }
0x21d1   :  { %3763 = vadd.xlane.f32.xlu1 %v3762_v34 }
0x21ed   :  { %v4091_v37 = vpop.xlane.xlu0 %4090 }
0x21ee   :  { %7867 = vrcp.f32 %v4091_v37 }
0x21f1   :  { %v4421_v38 = vpop.xlane.xlu0 %4420  ;;  %v4094_v40 = vpop.xlane.xlu1 %4093 }
0x21f2   :  { %7869 = vrcp.f32 %v4094_v40 }
0x21f3   :  { %7871 = vrcp.f32 %v4421_v38 }
0x21f5   :  { %v4424_v42 = vpop.xlane.xlu0 %4423 }
0x21f6   :  { %7873 = vrcp.f32 %v4424_v42 }
0x21f8   :  { %v7868_v45 = vpop.eup %7867 }
0x21f9   :  { %v4249_v39 = vmul.f32 %v7868_v45, %v8741_v47  ;;  %v3474_v45 = vld [vmem:[#allocation8 + $0x40] sm:$0xff] }
0x21fb   :  { %4913 = vrot.lane.b32.xlu0 %v4249_v39, %s8048_s14  ;;  %v3475_v39 = vld [vmem:[#allocation8 + $0x48] sm:$0xff] }
0x21fc   :  { %v7870_v62 = vpop.eup %7869 }
0x21fd   :  { %v4250_v46 = vmul.f32 %v7870_v62, %v8743_v41  ;;  %v7872_v11 = vpop.eup %7871  ;;  %v7709_v41 = vpack.c.bf16 %v3470_v52, %v3469_v1  ;;  %v3476_v62 = vld [vmem:[#allocation8 + $0x50] sm:$0xff] }
0x21fe   :  { %v4579_v14 = vmul.f32 %v7872_v11, %v4497_v5  ;;  %v3477_v11 = vld [vmem:[#allocation8 + $0x58] sm:$0xff] }
0x21ff   :  { %4915 = vrot.lane.b32.xlu1 %v4250_v46, %s8048_s14  ;;  %7710 = vmatprep.subr.bf16.mxu0 %v7709_v41  ;;  %v7713_v46 = vpack.c.bf16 %v3475_v39, %v3474_v45 }
0x2200   :  { %v7874_v48 = vpop.eup %7873  ;;  %7712 = vmatpush3.bf16.msra.mxu0 %v7709_v41 }
0x2201   :  { %v4580_v49 = vmul.f32 %v7874_v48, %v4573_v35  ;;  %7714 = vmatprep.subr.bf16.mxu1 %v7713_v46 }
0x2202   :  { %7716 = vmatpush3.bf16.msra.mxu1 %v7713_v46 }
0x2203   :  { %4921 = vrot.lane.b32.xlu1 %v4579_v14, %s8064_s27  ;;  %v7717_v14 = vpack.c.bf16 %v3477_v11, %v3476_v62 }
0x2205   :  { %7718 = vmatprep.subr.bf16.mxu1 %v7717_v14 }
0x2206   :  { %7720 = vmatpush3.bf16.msra.mxu1 %v7717_v14 }
0x2207   :  { %4923 = vrot.lane.b32.xlu1 %v4580_v49, %s8064_s27  ;;  %7547 = vmatprep.subr.mxu1 %v8051_v30 }
0x2256   :  { %v4751_v47 = vpop.xlane.xlu0 %4750 }
0x2257   :  { %7875 = vrcp.f32 %v4751_v47 }
0x225a   :  { %v4754_v0 = vpop.xlane.xlu1 %4753  ;;  %v3761_v3 = vpop.xlane.xlu0 %3760 }
0x225b   :  { %7877 = vrcp.f32 %v4754_v0 }
0x225c   :  { %7879 = vrcp.f32 %v3761_v3 }
0x225e   :  { %v3764_v33 = vpop.xlane.xlu1 %3763 }
0x225f   :  { %7881 = vrcp.f32 %v3764_v33 }
0x2261   :  { %v7876_v56 = vpop.eup %7875 }
0x2265   :  { %v7878_v63 = vpop.eup %7877 }
0x2266   :  { %v7880_v5 = vpop.eup %7879 }
0x2267   :  { %v3919_v7 = vmul.f32 %v7880_v5, %v8699_v17 }
0x2269   :  { %v7882_v8 = vpop.eup %7881 }
0x226a   :  { %v3920_v15 = vmul.f32 %v7882_v8, %v8701_v19 }
0x226d   :  { %v4914_v35 = vpop.permute.xlu0 %4913 }
0x226e   :  { %v4935_v4 = vsel %vm217_vm2, %v3919_v7, %v4914_v35 }
0x2271   :  { %v4916_v36 = vpop.permute.xlu1 %4915 }
0x2272   :  { %v4936_v18 = vsel %vm217_vm2, %v3920_v15, %v4916_v36  ;;  %v5149_v15 = vld [vmem:[#allocation5 + $0x68] sm:$0xff] }
0x2275   :  { %v4922_v6 = vpop.permute.xlu1 %4921 }
0x2276   :  { %v4937_v9 = vsel %vm1559_vm3, %v4935_v4, %v4922_v6 }
0x2279   :  { %v4924_v10 = vpop.permute.xlu1 %4923 }
0x227a   :  { %v4938_v20 = vsel %vm1559_vm3, %v4936_v18, %v4924_v10 }
0x229b   :  { %v4827_v58 = vpop.f32.mrb[50].mxu0 }
0x229c   :  { %v4909_v59 = vmul.f32 %v7876_v56, %v4827_v58  ;;  %v7508_v61 = vpop.f32.mrb[51].mxu0  ;;  %v6958_v56 = vld [vmem:[%s9059_s6 + $0x2] ss:$0 sm:$0xff] }
0x229e   :  { %4929 = vrot.lane.b32.xlu0 %v4909_v59, %s8065_s17 }
0x229f   :  { %v4903_v60 = vpop.f32.mrb[56].mxu1 }
0x22a0   :  { %v4910_v2 = vmul.f32 %v7878_v63, %v4903_v60  ;;  %v7513_v32 = vpop.f32.mrb[57].mxu1 }
0x22a2   :  { %4931 = vrot.lane.b32.xlu1 %v4910_v2, %s8065_s17 }
0x2310   :  { %v4930_v12 = vpop.permute.xlu0 %4929 }
0x2311   :  { %v4939_v16 = vsel %vm1562_vm4, %v4937_v9, %v4930_v12  ;;  %v5148_v12 = vld [vmem:[#allocation5 + $0x60] sm:$0xff] }
0x2312   :  { %7522 = vmatprep.mubr.msk.f32.mxu0 %vm99_vm0, %v4939_v16  ;;  %v5150_v16 = vld [vmem:[#allocation5 + $0x70] sm:$0xff]  ;;  %v7721_v18 = vpack.c.bf16 %v5149_v15, %v5148_v12 }
0x2314   :  { %v4932_v23 = vpop.permute.xlu1 %4931  ;;  %7722 = vmatprep.subr.bf16.mxu0 %v7721_v18 }
0x2315   :  { %v4940_v17 = vsel %vm1562_vm4, %v4938_v20, %v4932_v23  ;;  %v5151_v20 = vld [vmem:[#allocation5 + $0x78] sm:$0xff] }
0x2316   :  { %7523 = vmatmul.mubr.msk.f32.vlgmr.msra.gmra.mrb[52].mxu0 %vm99_vm0, %v4940_v17  ;;  %v7725_v23 = vpack.c.bf16 %v5151_v20, %v5150_v16 }
0x2317   :  { %7724 = vmatpush3.bf16.msra.mxu0 %v7721_v18 }
0x2318   :  { %7726 = vmatprep.subr.bf16.mxu0 %v7725_v23 }
0x231b   :  { %7728 = vmatpush3.bf16.msra.mxu0 %v7725_v23 }
0x231c   :  { %7557 = vmatprep.subr.mxu0 %v8051_v30 }
0x23e9   :  { %v7524_v25 = vpop.f32.mrb[52].mxu0 }
0x23ea   :  { %v5025_v53 = vadd.f32 %v7524_v25, %v6955_v57  ;;  %v5019_v19 = vpop.f32.mrb[53].mxu0 }
0x23eb   :  { %v5020_v26 = vadd.f32 %v6955_v57, %v5019_v19 }
0x23ec   :  { %v5029_v27 = vadd.f32 %v5025_v53, %v8612_v55 }
0x23ed   :  { %v5028_v54 = vadd.f32 %v5020_v26, %v8615_v21 }
0x23ee   :  { %v5033_v28 = vsel %vm99_vm0, %v5029_v27, 0.0 }
0x23ef   :  { %5034 = vadd.xlane.f32.xlu1 %v5033_v28  ;;  %v5030_v22 = vsel %vm99_vm0, %v5028_v54, 0.0 }
0x23f0   :  { %5031 = vadd.xlane.f32.xlu0 %v5030_v22 }
0x247c   :  { %v5035_v43 = vpop.xlane.xlu1 %5034 }
0x247d   :  { %v5037_v29 = vmul.f32 0.03125, %v5035_v43  ;;  %v5032_v31 = vpop.xlane.xlu0 %5031  ;;  %v6964_v43 = vld [vmem:[%s9055_s2 + $0x3] ss:$0 sm:$0xff] }
0x247e   :  { %v5036_v44 = vmul.f32 0.03125, %v5032_v31 }
0x247f   :  { %v5039_v24 = vsub.f32 %v5029_v27, %v5037_v29 }
0x2480   :  { %v5038_v34 = vsub.f32 %v5028_v54, %v5036_v44 }
0x2481   :  { %v5041_v40 = vmul.f32 %v5039_v24, %v5039_v24 }
0x2482   :  { %v5040_v37 = vmul.f32 %v5038_v34, %v5038_v34 }
0x2483   :  { %v5045_v42 = vsel %vm99_vm0, %v5041_v40, 0.0 }
0x2484   :  { %v5042_v38 = vsel %vm99_vm0, %v5040_v37, 0.0 }
0x2485   :  { %5043 = vadd.xlane.f32.xlu0 %v5042_v38 }
0x2489   :  { %5046 = vadd.xlane.f32.xlu0 %v5045_v42 }
0x2512   :  { %v5044_v48 = vpop.xlane.xlu0 %5043 }
0x2513   :  { %v5048_v49 = vmul.f32 0.03125, %v5044_v48 }
0x2515   :  { %v5050_v13 = vadd.f32 1e-05, %v5048_v49 }
0x2516   :  { %v5047_v50 = vpop.xlane.xlu0 %5046 }
0x2517   :  { %7883 = vrsqrt.f32 %v5050_v13  ;;  %v5049_v51 = vmul.f32 0.03125, %v5047_v50 }
0x2519   :  { %v5051_v47 = vadd.f32 1e-05, %v5049_v51 }
0x251b   :  { %7885 = vrsqrt.f32 %v5051_v47 }
0x2521   :  { %v7884_v1 = vpop.eup %7883 }
0x2522   :  { %v5054_v52 = vmul.f32 %v7884_v1, %v5038_v34 }
0x2524   :  { %7533 = vmatprep.mubr.msk.f32.mxu1 %vm99_vm0, %v5054_v52 }
0x2525   :  { %v7886_v41 = vpop.eup %7885 }
0x2526   :  { %v5055_v0 = vmul.f32 %v7886_v41, %v5039_v24 }
0x2528   :  { %7534 = vmatmul.mubr.msk.f32.vlgmr.msra.gmra.mrb[58].mxu1 %vm99_vm0, %v5055_v0 }
0x2529   :  { %7549 = vmatprep.mubr.msk.f32.mxu1 %vm8052_vm1, %v8051_v30 }
0x25fb   :  { %v7535_v58 = vpop.f32.mrb[58].mxu1 }
0x25fc   :  { %v5140_v59 = vadd.f32 %v7535_v58, %v6958_v56  ;;  %v5134_v61 = vpop.f32.mrb[59].mxu1 }
0x25fd   :  { %v5135_v63 = vadd.f32 %v6958_v56, %v5134_v61 }
0x25fe   :  { %v5144_v60 = vmax.f32 %v5140_v59, 0.0 }
0x25ff   :  { %v5143_v2 = vmax.f32 %v5135_v63, 0.0 }
0x2600   :  { %v8825_v32 = vadd.f32 %v5144_v60, %v8612_v55 }
0x2601   :  { %v8828_v3 = vadd.f32 %v5143_v2, %v8615_v21 }
0x2602   :  { %v5171_v33 = vsel %vm99_vm0, %v8825_v32, 0.0 }
0x2603   :  { %5172 = vadd.xlane.f32.xlu1 %v5171_v33  ;;  %v5168_v36 = vsel %vm99_vm0, %v8828_v3, 0.0 }
0x2604   :  { %5169 = vadd.xlane.f32.xlu0 %v5168_v36 }
0x2690   :  { %v5173_v5 = vpop.xlane.xlu1 %5172 }
0x2691   :  { %v5175_v6 = vmul.f32 0.03125, %v5173_v5  ;;  %v5170_v35 = vpop.xlane.xlu0 %5169 }
0x2692   :  { %v5174_v7 = vmul.f32 0.03125, %v5170_v35 }
0x2693   :  { %v5177_v8 = vsub.f32 %v8825_v32, %v5175_v6 }
0x2694   :  { %v5176_v55 = vsub.f32 %v8828_v3, %v5174_v7 }
0x2695   :  { %v5179_v4 = vmul.f32 %v5177_v8, %v5177_v8 }
0x2696   :  { %v5178_v9 = vmul.f32 %v5176_v55, %v5176_v55 }
0x2697   :  { %v5183_v21 = vsel %vm99_vm0, %v5179_v4, 0.0 }
0x2698   :  { %5184 = vadd.xlane.f32.xlu1 %v5183_v21  ;;  %v5180_v10 = vsel %vm99_vm0, %v5178_v9, 0.0 }
0x2699   :  { %5181 = vadd.xlane.f32.xlu0 %v5180_v10 }
0x2725   :  { %v5185_v17 = vpop.xlane.xlu1 %5184 }
0x2726   :  { %v5187_v57 = vmul.f32 0.03125, %v5185_v17  ;;  %v5182_v25 = vpop.xlane.xlu0 %5181 }
0x2727   :  { %v5186_v53 = vmul.f32 0.03125, %v5182_v25 }
0x2728   :  { %v5189_v19 = vadd.f32 1e-05, %v5187_v57 }
0x2729   :  { %v5188_v26 = vadd.f32 1e-05, %v5186_v53 }
0x272a   :  { %7887 = vrsqrt.f32 %v5189_v19 }
0x272b   :  { %7889 = vrsqrt.f32 %v5188_v26 }
0x2734   :  { %v7888_v27 = vpop.eup %7887 }
0x2735   :  { %v7890_v54 = vpop.eup %7889  ;;  %v5193_v22 = vmul.f32 %v7888_v27, %v5177_v8 }
0x2736   :  { %v5192_v28 = vmul.f32 %v7890_v54, %v5176_v55 }
0x2738   :  { %7544 = vmatprep.mubr.msk.f32.mxu0 %vm99_vm0, %v5192_v28 }
0x2739   :  { %7545 = vmatmul.mubr.msk.f32.vlgmr.msra.gmra.mrb[54].mxu0 %vm99_vm0, %v5193_v22 }
0x273a   :  { %7559 = vmatprep.mubr.msk.f32.mxu0 %vm8052_vm1, %v8051_v30 }
0x280c   :  { %v7546_v29 = vpop.f32.mrb[54].mxu0 }
0x280d   :  { %v8846_v31 = vadd.f32 %v7546_v29, %v6964_v43  ;;  %v5272_v44 = vpop.f32.mrb[55].mxu0 }
0x280e   :  { %v8848_v24 = vadd.f32 %v6964_v43, %v5272_v44 }
0x280f   :  { %5359 = vrot.lane.b32.xlu1 %v8846_v31, %s8053_s28 }
0x2810   :  { %5282 = vrot.lane.b32.xlu0 %v8848_v24, %s8053_s28 }
0x2881   :  { %v5360_v37 = vpop.permute.xlu1 %5359 }
0x2882   :  { %v5283_v34 = vpop.permute.xlu0 %5282 }
0x2883   :  { %7548 = vmatpush3.xpose.msk.msra.mxu1 %vm217_vm2, %v5283_v34 }
0x2884   :  { %7552 = vmatprep.subr.mxu1 %v8051_v30 }
0x2886   :  { %7550 = vmatmul.mubr.msk.f32.vlgmr.msra.gmra.mrb[60].mxu1 %vm217_vm2, %v8848_v24 }
0x2887   :  { %7553 = vmatpush3.xpose.msk.msra.mxu1 %vm217_vm2, %v5360_v37  ;;  %7554 = vmatprep.mubr.msk.f32.mxu1 %vm8052_vm1, %v8051_v30 }
0x2888   :  { %7562 = vmatprep.subr.mxu1 %v8051_v30 }
0x288a   :  { %7555 = vmatmul.mubr.msk.f32.vlgmr.msra.gmra.mrb[62].mxu1 %vm217_vm2, %v8846_v31 }
0x288b   :  { %7564 = vmatprep.mubr.msk.f32.mxu1 %vm8052_vm1, %v8051_v30 }
0x2959   :  { %v5354_v38 = vpop.f32.mrb[60].mxu1 }
0x295a   :  { %v7551_v40 = vpop.f32.mrb[61].mxu1  ;;  %v5435_v42 = vsel %vm217_vm2, %v5354_v38, -inf }
0x295b   :  { %5436 = vmax.xlane.f32.xlu1 %v5435_v42 }
0x295d   :  { %v5431_v45 = vpop.f32.mrb[62].mxu1 }
0x295e   :  { %v7556_v39 = vpop.f32.mrb[63].mxu1  ;;  %v5438_v62 = vsel %vm217_vm2, %v5431_v45, -inf }
0x295f   :  { %5439 = vmax.xlane.f32.xlu0 %v5438_v62 }
0x296c   :  { %5529 = vrot.lane.b32.xlu1 %v8846_v31, %s8054_s29 }
0x2970   :  { %5611 = vrot.lane.b32.xlu1 %v8848_v24, %s8055_s30 }
0x2974   :  { %5689 = vrot.lane.b32.xlu1 %v8846_v31, %s8055_s30  ;;  %s8066_s30 = smov [#allocation10]  }
0x2975   :  { %5453 = vrot.lane.b32.xlu0 %v8848_v24, %s8054_s29 }
0x2978   :  { %5687 = vrot.lane.b32.xlu1 %v8846_v31, %s8056_s8 }
0x2979   :  { %5609 = vrot.lane.b32.xlu0 %v8848_v24, %s8056_s8  ;;  %s6842_s8 = sshll.u32 %s8066_s30, 4  ;;  %s6843_s8 = int_to_ptr.vmem [resolvable:$true] %s6842_s8 }
0x297a   :  { %p8020_p5 = scmp.lt.s32.totalorder %s6843_s8, %s6843_s8 }
0x297c   :  { %5859 = vrot.lane.b32.xlu1 %v8846_v31, %s8057_s9 }
0x297d   :  { %5783 = vrot.lane.b32.xlu0 %v8848_v24, %s8057_s9  ;;  %s8015_s9 = scalar_lea.vmem %s6843_s8, 256 }
0x297e   :  { %p8016_p4 = scmp.ne.s32.totalorder %s6843_s8, %s8015_s9  ;;  %p8021_p6 = scmp.lt.s32.totalorder %s8015_s9, %s8015_s9 }
0x2980   :  { %6019 = vrot.lane.b32.xlu1 %v8846_v31, %s8058_s10  ;;  %p8022_p7 = por %p8021_p6, %p8020_p5 }
0x2982   :  { %p8023_p8 = pnand %p8022_p7, %p8016_p4 }
0x29e8   :  { %v5437_v46 = vpop.xlane.xlu1 %5436 }
0x29e9   :  { %v5441_v11 = vsub.f32 %v5354_v38, %v5437_v46 }
0x29eb   :  { %v5443_v14 = vmul.f32 1.442695, %v5441_v11 }
0x29ec   :  { %v5530_v48 = vpop.permute.xlu1 %5529  ;;  %v5440_v49 = vpop.xlane.xlu0 %5439 }
0x29ed   :  { %7891 = vpow2.f32 %v5443_v14  ;;  %v5442_v13 = vsub.f32 %v5431_v45, %v5440_v49  ;;  %7563 = vmatpush3.msra.mxu1 %v5530_v48 }
0x29ee   :  { %7572 = vmatprep.subr.mxu1 %v8051_v30 }
0x29ef   :  { %v5445_v50 = vmul.f32 1.442695, %v5442_v13 }
0x29f0   :  { %v5612_v51 = vpop.permute.xlu1 %5611  ;;  %v5454_v47 = vpop.permute.xlu0 %5453 }
0x29f1   :  { %7893 = vpow2.f32 %v5445_v50  ;;  %7558 = vmatpush3.msra.mxu0 %v5454_v47 }
0x29f2   :  { %7567 = vmatprep.subr.mxu0 %v8051_v30 }
0x29f4   :  { %v5690_v1 = vpop.permute.xlu1 %5689  ;;  %v5610_v52 = vpop.permute.xlu0 %5609 }
0x29f7   :  { %v8888_v41 = vpop.eup %7891 }
0x29f8   :  { %7560 = vmatmul.mubr.msk.f32.vlgmr.msra.gmra.mrb[56].mxu0 %vm217_vm2, %v8888_v41  ;;  %v5688_v0 = vpop.permute.xlu1 %5687  ;;  %v5784_v58 = vpop.permute.xlu0 %5783 }
0x29f9   :  { %7568 = vmatpush3.xpose.msk.msra.mxu0 %vm217_vm2, %v5612_v51  ;;  %7569 = vmatprep.mubr.msk.f32.mxu0 %vm8052_vm1, %v8051_v30 }
0x29fa   :  { %7577 = vmatprep.subr.mxu0 %v8051_v30 }
0x29fb   :  { %v8896_v56 = vpop.eup %7893 }
0x29fc   :  { %7565 = vmatmul.mubr.msk.f32.vlgmr.msra.gmra.mrb[64].mxu1 %vm217_vm2, %v8896_v56  ;;  %7570 = vmatmul.mubr.msk.f32.vlgmr.msra.gmra.mrb[58].mxu0 %vm217_vm2, %v5610_v52  ;;  %v5860_v59 = vpop.permute.xlu1 %5859 }
0x29fd   :  { %7573 = vmatpush3.xpose.msk.msra.mxu1 %vm217_vm2, %v5690_v1  ;;  %7578 = vmatpush3.msra.mxu0 %v5784_v58 }
0x29fe   :  { %7574 = vmatprep.mubr.msk.f32.mxu1 %vm8052_vm1, %v8051_v30  ;;  %7582 = vmatprep.subr.mxu1 %v8051_v30 }
0x29ff   :  { %7579 = vmatprep.mubr.msk.f32.mxu0 %vm8052_vm1, %v8051_v30  ;;  %7587 = vmatprep.subr.mxu0 %v8051_v30 }
0x2a00   :  { %7575 = vmatmul.mubr.msk.f32.vlgmr.msra.gmra.mrb[66].mxu1 %vm217_vm2, %v5688_v0  ;;  %v6020_v8 = vpop.permute.xlu1 %6019 }
0x2a01   :  { %7583 = vmatpush3.msra.mxu1 %v5860_v59  ;;  %7584 = vmatprep.mubr.msk.f32.mxu1 %vm8052_vm1, %v8051_v30 }
0x2a02   :  { %7592 = vmatprep.subr.mxu1 %v8051_v30 }
0x2acb   :  { %v8912_v61 = vpop.f32.mrb[56].mxu0 }
0x2acc   :  { %v7561_v63 = vpop.f32.mrb[57].mxu0 }
0x2acf   :  { %v8914_v60 = vpop.f32.mrb[64].mxu1  ;;  %v5683_v2 = vpop.f32.mrb[58].mxu0 }
0x2ad0   :  { %v7566_v33 = vpop.f32.mrb[65].mxu1  ;;  %v7571_v36 = vpop.f32.mrb[59].mxu0  ;;  %v5765_v5 = vsel %vm217_vm2, %v5683_v2, -inf }
0x2ad1   :  { %5766 = vmax.xlane.f32.xlu0 %v5765_v5 }
0x2ad3   :  { %v5761_v6 = vpop.f32.mrb[66].mxu1 }
0x2ad4   :  { %v7576_v35 = vpop.f32.mrb[67].mxu1  ;;  %v5768_v7 = vsel %vm217_vm2, %v5761_v6, -inf }
0x2ad5   :  { %5769 = vmax.xlane.f32.xlu1 %v5768_v7 }
0x2ae6   :  { %6017 = vrot.lane.b32.xlu1 %v8846_v31, %s8059_s11 }
0x2ae7   :  { %5941 = vrot.lane.b32.xlu0 %v8848_v24, %s8058_s10 }
0x2aea   :  { %6189 = vrot.lane.b32.xlu1 %v8846_v31, %s8060_s12 }
0x2aeb   :  { %5939 = vrot.lane.b32.xlu0 %v8848_v24, %s8059_s11 }
0x2aee   :  { %6349 = vrot.lane.b32.xlu1 %v8846_v31, %s8061_s15 }
0x2aef   :  { %6113 = vrot.lane.b32.xlu0 %v8848_v24, %s8060_s12 }
0x2b5e   :  { %v5767_v55 = vpop.xlane.xlu0 %5766 }
0x2b5f   :  { %v5771_v4 = vsub.f32 %v5683_v2, %v5767_v55 }
0x2b61   :  { %v5773_v9 = vmul.f32 1.442695, %v5771_v4 }
0x2b62   :  { %v5770_v21 = vpop.xlane.xlu1 %5769  ;;  %v5942_v15 = vpop.permute.xlu0 %5941 }
0x2b63   :  { %7895 = vpow2.f32 %v5773_v9  ;;  %v5772_v10 = vsub.f32 %v5761_v6, %v5770_v21  ;;  %v5447_v9 = vsel %vm217_vm2, %v8888_v41, 0.0 }
0x2b65   :  { %v5775_v12 = vmul.f32 1.442695, %v5772_v10  ;;  %v5450_v10 = vsel %vm217_vm2, %v8896_v56, 0.0 }
0x2b66   :  { %v5940_v16 = vpop.permute.xlu0 %5939  ;;  %v6018_v20 = vpop.permute.xlu1 %6017 }
0x2b67   :  { %7897 = vpow2.f32 %v5775_v12 }
0x2b6a   :  { %v6114_v17 = vpop.permute.xlu0 %6113  ;;  %v6190_v57 = vpop.permute.xlu1 %6189 }
0x2b6d   :  { %v8930_v18 = vpop.eup %7895 }
0x2b6e   :  { %7580 = vmatmul.mubr.msk.f32.vlgmr.msra.gmra.mrb[60].mxu0 %vm217_vm2, %v8930_v18  ;;  %v6350_v44 = vpop.permute.xlu1 %6349 }
0x2b6f   :  { %7588 = vmatpush3.xpose.msk.msra.mxu0 %vm217_vm2, %v5942_v15  ;;  %7589 = vmatprep.mubr.msk.f32.mxu0 %vm8052_vm1, %v8051_v30 }
0x2b70   :  { %7597 = vmatprep.subr.mxu0 %v8051_v30 }
0x2b71   :  { %v8938_v23 = vpop.eup %7897 }
0x2b72   :  { %7585 = vmatmul.mubr.msk.f32.vlgmr.msra.gmra.mrb[68].mxu1 %vm217_vm2, %v8938_v23  ;;  %7590 = vmatmul.mubr.msk.f32.vlgmr.msra.gmra.mrb[62].mxu0 %vm217_vm2, %v5940_v16  ;;  %v5780_v63 = vsel %vm217_vm2, %v8938_v23, 0.0 }
0x2b73   :  { %7593 = vmatpush3.xpose.msk.msra.mxu1 %vm217_vm2, %v6020_v8  ;;  %7598 = vmatpush3.msra.mxu0 %v6114_v17 }
0x2b74   :  { %7594 = vmatprep.mubr.msk.f32.mxu1 %vm8052_vm1, %v8051_v30  ;;  %7602 = vmatprep.subr.mxu1 %v8051_v30 }
0x2b75   :  { %7599 = vmatprep.mubr.msk.f32.mxu0 %vm8052_vm1, %v8051_v30  ;;  %7607 = vmatprep.subr.mxu0 %v8051_v30 }
0x2b76   :  { %7595 = vmatmul.mubr.msk.f32.vlgmr.msra.gmra.mrb[70].mxu1 %vm217_vm2, %v6018_v20 }
0x2b77   :  { %7603 = vmatpush3.msra.mxu1 %v6190_v57  ;;  %7604 = vmatprep.mubr.msk.f32.mxu1 %vm8052_vm1, %v8051_v30 }
0x2b78   :  { %7612 = vmatprep.subr.mxu1 %v8051_v30 }
0x2c41   :  { %v8954_v25 = vpop.f32.mrb[60].mxu0 }
0x2c42   :  { %v7581_v53 = vpop.f32.mrb[61].mxu0 }
0x2c45   :  { %v8956_v19 = vpop.f32.mrb[68].mxu1  ;;  %v6013_v26 = vpop.f32.mrb[62].mxu0 }
0x2c46   :  { %v7586_v27 = vpop.f32.mrb[69].mxu1  ;;  %v7591_v54 = vpop.f32.mrb[63].mxu0  ;;  %v6095_v28 = vsel %vm217_vm2, %v6013_v26, -inf }
0x2c47   :  { %6096 = vmax.xlane.f32.xlu0 %v6095_v28  ;;  %v5155_v27 = vld [vmem:[#allocation7 + $0x60] sm:$0xff]  ;;  %v5156_v54 = vld [vmem:[#allocation7 + $0x68] sm:$0xff] }
0x2c48   :  { %v7729_v28 = vpack.c.bf16 %v5156_v54, %v5155_v27 }
0x2c49   :  { %v6091_v22 = vpop.f32.mrb[70].mxu1 }
0x2c4a   :  { %v7596_v43 = vpop.f32.mrb[71].mxu1  ;;  %v6098_v29 = vsel %vm217_vm2, %v6091_v22, -inf }
0x2c4b   :  { %6099 = vmax.xlane.f32.xlu1 %v6098_v29  ;;  %v5158_v43 = vld [vmem:[#allocation7 + $0x78] sm:$0xff] }
0x2c5c   :  { %6347 = vrot.lane.b32.xlu1 %v8846_v31, %s8062_s16 }
0x2c5d   :  { %6271 = vrot.lane.b32.xlu0 %v8848_v24, %s8061_s15 }
0x2c61   :  { %6269 = vrot.lane.b32.xlu0 %v8848_v24, %s8062_s16 }
0x2cd4   :  { %v6097_v34 = vpop.xlane.xlu0 %6096 }
0x2cd5   :  { %v6101_v37 = vsub.f32 %v6013_v26, %v6097_v34 }
0x2cd7   :  { %v6103_v38 = vmul.f32 1.442695, %v6101_v37 }
0x2cd8   :  { %v6100_v40 = vpop.xlane.xlu1 %6099  ;;  %v6272_v39 = vpop.permute.xlu0 %6271 }
0x2cd9   :  { %7899 = vpow2.f32 %v6103_v38  ;;  %v6102_v42 = vsub.f32 %v6091_v22, %v6100_v40  ;;  %v5157_v22 = vld [vmem:[#allocation7 + $0x70] sm:$0xff] }
0x2cdb   :  { %v6105_v45 = vmul.f32 1.442695, %v6102_v42 }
0x2cdc   :  { %v6270_v11 = vpop.permute.xlu0 %6269  ;;  %v6348_v14 = vpop.permute.xlu1 %6347 }
0x2cdd   :  { %7901 = vpow2.f32 %v6105_v45 }
0x2ce3   :  { %v7900_v62 = vpop.eup %7899 }
0x2ce4   :  { %7600 = vmatmul.mubr.msk.f32.vlgmr.msra.gmra.mrb[64].mxu0 %vm217_vm2, %v7900_v62  ;;  %v6107_v59 = vsel %vm217_vm2, %v7900_v62, 0.0 }
0x2ce5   :  { %7608 = vmatpush3.xpose.msk.msra.mxu0 %vm217_vm2, %v6272_v39  ;;  %7609 = vmatprep.mubr.msk.f32.mxu0 %vm8052_vm1, %v8051_v30 }
0x2ce6   :  { %7617 = vmatprep.subr.mxu0 %v8051_v30 }
0x2ce7   :  { %v7902_v46 = vpop.eup %7901 }
0x2ce8   :  { %7605 = vmatmul.mubr.msk.f32.vlgmr.msra.gmra.mrb[72].mxu1 %vm217_vm2, %v7902_v46  ;;  %7610 = vmatmul.mubr.msk.f32.vlgmr.msra.gmra.mrb[66].mxu0 %vm217_vm2, %v6270_v11  ;;  %v6110_v2 = vsel %vm217_vm2, %v7902_v46, 0.0 }
0x2ce9   :  { %7613 = vmatpush3.xpose.msk.msra.mxu1 %vm217_vm2, %v6350_v44  ;;  %7614 = vmatprep.mubr.msk.f32.mxu1 %vm8052_vm1, %v8051_v30 }
0x2cea   :  { %7622 = vmatprep.subr.mxu1 %v8051_v30  ;;  %7619 = vmatprep.mubr.msk.f32.mxu0 %vm8052_vm1, %v8051_v30 }
0x2cec   :  { %7615 = vmatmul.mubr.msk.f32.vlgmr.msra.gmra.mrb[74].mxu1 %vm217_vm2, %v6348_v14 }
0x2ced   :  { %7624 = vmatprep.mubr.msk.f32.mxu1 %vm8052_vm1, %v8051_v30  ;;  %v5777_v30 = vsel %vm217_vm2, %v8930_v18, 0.0 }
0x2db7   :  { %v6185_v48 = vpop.f32.mrb[64].mxu0 }
0x2db8   :  { %v7601_v49 = vpop.f32.mrb[65].mxu0 }
0x2dbb   :  { %v6261_v13 = vpop.f32.mrb[72].mxu1  ;;  %v6343_v50 = vpop.f32.mrb[66].mxu0 }
0x2dbc   :  { %v7606_v51 = vpop.f32.mrb[73].mxu1  ;;  %v7611_v47 = vpop.f32.mrb[67].mxu0  ;;  %v6425_v1 = vsel %vm217_vm2, %v6343_v50, -inf }
0x2dbd   :  { %6426 = vmax.xlane.f32.xlu0 %v6425_v1 }
0x2dbf   :  { %v6421_v52 = vpop.f32.mrb[74].mxu1 }
0x2dc0   :  { %v7616_v0 = vpop.f32.mrb[75].mxu1  ;;  %v6428_v58 = vsel %vm217_vm2, %v6421_v52, -inf }
0x2dc1   :  { %6429 = vmax.xlane.f32.xlu1 %v6428_v58 }
0x2dd2   :  { %6519 = vrot.lane.b32.xlu1 %v8846_v31, %s8063_s0 }
0x2dd3   :  { %6443 = vrot.lane.b32.xlu0 %v8848_v24, %s8063_s0 }
0x2df2   :  { %5778 = vadd.xlane.f32.xlu0 %v5777_v30 }
0x2df6   :  { %6108 = vadd.xlane.f32.xlu0 %v6107_v59  ;;  %5781 = vadd.xlane.f32.xlu1 %v5780_v63 }
0x2dfa   :  { %6111 = vadd.xlane.f32.xlu0 %v6110_v2  ;;  %v6991_v2 = vld [vmem:[%s9057_s4 + $0x3] ss:$0 sm:$0xff] }
0x2e4a   :  { %v6427_v33 = vpop.xlane.xlu0 %6426 }
0x2e4b   :  { %v6431_v36 = vsub.f32 %v6343_v50, %v6427_v33 }
0x2e4d   :  { %v6433_v31 = vmul.f32 1.442695, %v6431_v36 }
0x2e4e   :  { %v6444_v5 = vpop.permute.xlu0 %6443  ;;  %v6430_v6 = vpop.xlane.xlu1 %6429 }
0x2e4f   :  { %7903 = vpow2.f32 %v6433_v31  ;;  %v6432_v24 = vsub.f32 %v6421_v52, %v6430_v6  ;;  %7618 = vmatpush3.msra.mxu0 %v6444_v5 }
0x2e50   :  { %7730 = vmatprep.subr.bf16.mxu0 %v7729_v28 }
0x2e51   :  { %v6435_v35 = vmul.f32 1.442695, %v6432_v24 }
0x2e52   :  { %v6520_v7 = vpop.permute.xlu1 %6519 }
0x2e53   :  { %7905 = vpow2.f32 %v6435_v35  ;;  %7623 = vmatpush3.msra.mxu1 %v6520_v7 }
0x2e59   :  { %v7904_v8 = vpop.eup %7903 }
0x2e5a   :  { %7620 = vmatmul.mubr.msk.f32.vlgmr.msra.gmra.mrb[68].mxu0 %vm217_vm2, %v7904_v8  ;;  %v6437_v55 = vsel %vm217_vm2, %v7904_v8, 0.0 }
0x2e5b   :  { %6438 = vadd.xlane.f32.xlu0 %v6437_v55  ;;  %7732 = vmatpush3.bf16.msra.mxu0 %v7729_v28 }
0x2e5d   :  { %v7906_v4 = vpop.eup %7905 }
0x2e5e   :  { %7625 = vmatmul.mubr.msk.f32.vlgmr.msra.gmra.mrb[76].mxu1 %vm217_vm2, %v7906_v4  ;;  %v6440_v21 = vsel %vm217_vm2, %v7906_v4, 0.0 }
0x2e5f   :  { %5448 = vadd.xlane.f32.xlu0 %v5447_v9  ;;  %6441 = vadd.xlane.f32.xlu1 %v6440_v21 }
0x2e63   :  { %5451 = vadd.xlane.f32.xlu1 %v5450_v10 }
0x2e7f   :  { %v5779_v12 = vpop.xlane.xlu0 %5778 }
0x2e80   :  { %7907 = vrcp.f32 %v5779_v12 }
0x2e83   :  { %v6109_v15 = vpop.xlane.xlu0 %6108  ;;  %v5782_v16 = vpop.xlane.xlu1 %5781 }
0x2e84   :  { %7909 = vrcp.f32 %v5782_v16 }
0x2e85   :  { %7911 = vrcp.f32 %v6109_v15 }
0x2e87   :  { %v6112_v18 = vpop.xlane.xlu0 %6111 }
0x2e88   :  { %7913 = vrcp.f32 %v6112_v18  ;;  %v5162_v18 = vld [vmem:[#allocation8 + $0x60] sm:$0xff] }
0x2e8a   :  { %v7908_v20 = vpop.eup %7907 }
0x2e8b   :  { %v5937_v23 = vmul.f32 %v7908_v20, %v8954_v25  ;;  %v5163_v20 = vld [vmem:[#allocation8 + $0x68] sm:$0xff] }
0x2e8d   :  { %6601 = vrot.lane.b32.xlu0 %v5937_v23, %s8048_s14  ;;  %v7737_v23 = vpack.c.bf16 %v5163_v20, %v5162_v18 }
0x2e8e   :  { %v7910_v41 = vpop.eup %7909 }
0x2e8f   :  { %v5938_v17 = vmul.f32 %v7910_v41, %v8956_v19  ;;  %v7912_v57 = vpop.eup %7911  ;;  %v7733_v19 = vpack.c.bf16 %v5158_v43, %v5157_v22  ;;  %7738 = vmatprep.subr.bf16.mxu1 %v7737_v23  ;;  %v5164_v41 = vld [vmem:[#allocation8 + $0x70] sm:$0xff] }
0x2e90   :  { %v6267_v56 = vmul.f32 %v7912_v57, %v6185_v48  ;;  %7740 = vmatpush3.bf16.msra.mxu1 %v7737_v23 }
0x2e91   :  { %6603 = vrot.lane.b32.xlu1 %v5938_v17, %s8048_s14  ;;  %7734 = vmatprep.subr.bf16.mxu0 %v7733_v19  ;;  %v5165_v17 = vld [vmem:[#allocation8 + $0x78] sm:$0xff] }
0x2e92   :  { %v7914_v53 = vpop.eup %7913  ;;  %7736 = vmatpush3.bf16.msra.mxu0 %v7733_v19  ;;  %v7741_v57 = vpack.c.bf16 %v5165_v17, %v5164_v41 }
0x2e93   :  { %v6268_v26 = vmul.f32 %v7914_v53, %v6261_v13 }
0x2e94   :  { %7742 = vmatprep.subr.bf16.mxu1 %v7741_v57 }
0x2e95   :  { %6609 = vrot.lane.b32.xlu1 %v6267_v56, %s8064_s27  ;;  %7744 = vmatpush3.bf16.msra.mxu1 %v7741_v57 }
0x2e99   :  { %6611 = vrot.lane.b32.xlu1 %v6268_v26, %s8064_s27 }
0x2ee8   :  { %v6439_v25 = vpop.xlane.xlu0 %6438 }
0x2ee9   :  { %7915 = vrcp.f32 %v6439_v25 }
0x2eec   :  { %v6442_v29 = vpop.xlane.xlu1 %6441  ;;  %v5449_v62 = vpop.xlane.xlu0 %5448 }
0x2eed   :  { %7917 = vrcp.f32 %v6442_v29  ;;  %v6994_v29 = vld [vmem:[%s9059_s6 + $0x3] ss:$0 sm:$0xff] }
0x2eee   :  { %7919 = vrcp.f32 %v5449_v62 }
0x2ef0   :  { %v5452_v46 = vpop.xlane.xlu1 %5451 }
0x2ef1   :  { %7921 = vrcp.f32 %v5452_v46 }
0x2ef3   :  { %v7916_v44 = vpop.eup %7915 }
0x2ef7   :  { %v7918_v40 = vpop.eup %7917 }
0x2ef8   :  { %v7920_v14 = vpop.eup %7919 }
0x2ef9   :  { %v5607_v13 = vmul.f32 %v7920_v14, %v8912_v61 }
0x2efb   :  { %v7922_v50 = vpop.eup %7921 }
0x2efc   :  { %v5608_v0 = vmul.f32 %v7922_v50, %v8914_v60 }
0x2eff   :  { %v6602_v49 = vpop.permute.xlu0 %6601 }
0x2f00   :  { %v6623_v51 = vsel %vm217_vm2, %v5607_v13, %v6602_v49 }
0x2f03   :  { %v6604_v11 = vpop.permute.xlu1 %6603 }
0x2f04   :  { %v6624_v30 = vsel %vm217_vm2, %v5608_v0, %v6604_v11 }
0x2f07   :  { %v6610_v48 = vpop.permute.xlu1 %6609 }
0x2f08   :  { %v6625_v47 = vsel %vm1559_vm3, %v6623_v51, %v6610_v48 }
0x2f0b   :  { %v6612_v1 = vpop.permute.xlu1 %6611 }
0x2f0c   :  { %v6626_v59 = vsel %vm1559_vm3, %v6624_v30, %v6612_v1 }
0x2f2d   :  { %v6515_v34 = vpop.f32.mrb[68].mxu0 }
0x2f2e   :  { %v6597_v37 = vmul.f32 %v7916_v44, %v6515_v34  ;;  %v7621_v38 = vpop.f32.mrb[69].mxu0 }
0x2f30   :  { %6617 = vrot.lane.b32.xlu0 %v6597_v37, %s8065_s17 }
0x2f31   :  { %v6591_v42 = vpop.f32.mrb[76].mxu1 }
0x2f32   :  { %v6598_v45 = vmul.f32 %v7918_v40, %v6591_v42  ;;  %v7626_v39 = vpop.f32.mrb[77].mxu1 }
0x2f34   :  { %6619 = vrot.lane.b32.xlu1 %v6598_v45, %s8065_s17 }
0x2fa2   :  { %v6618_v52 = vpop.permute.xlu0 %6617 }
0x2fa3   :  { %v6627_v58 = vsel %vm1562_vm4, %v6625_v47, %v6618_v52 }
0x2fa4   :  { %7635 = vmatprep.mubr.msk.f32.mxu0 %vm99_vm0, %v6627_v58 }
0x2fa6   :  { %v6620_v63 = vpop.permute.xlu1 %6619 }
0x2fa7   :  { %v6628_v61 = vsel %vm1562_vm4, %v6626_v59, %v6620_v63 }
0x2fa8   :  { %7636 = vmatmul.mubr.msk.f32.vlgmr.msra.gmra.mrb[70].mxu0 %vm99_vm0, %v6628_v61 }
0x307b   :  { %v7637_v33 = vpop.f32.mrb[70].mxu0 }
0x307c   :  { %v6713_v36 = vadd.f32 %v7637_v33, %v6991_v2  ;;  %v6707_v60 = vpop.f32.mrb[71].mxu0 }
0x307d   :  { %v6708_v31 = vadd.f32 %v6991_v2, %v6707_v60 }
0x307e   :  { %v6717_v5 = vadd.f32 %v6713_v36, %v8825_v32 }
0x307f   :  { %v6716_v6 = vadd.f32 %v6708_v31, %v8828_v3 }
0x3080   :  { %v6721_v24 = vsel %vm99_vm0, %v6717_v5, 0.0 }
0x3081   :  { %6722 = vadd.xlane.f32.xlu1 %v6721_v24  ;;  %v6718_v35 = vsel %vm99_vm0, %v6716_v6, 0.0 }
0x3082   :  { %6719 = vadd.xlane.f32.xlu0 %v6718_v35 }
0x310e   :  { %v6723_v7 = vpop.xlane.xlu1 %6722 }
0x310f   :  { %v6725_v8 = vmul.f32 0.03125, %v6723_v7  ;;  %v6720_v55 = vpop.xlane.xlu0 %6719 }
0x3110   :  { %v6724_v4 = vmul.f32 0.03125, %v6720_v55 }
0x3111   :  { %v6727_v9 = vsub.f32 %v6717_v5, %v6725_v8 }
0x3112   :  { %v6726_v21 = vsub.f32 %v6716_v6, %v6724_v4 }
0x3113   :  { %v6729_v15 = vmul.f32 %v6727_v9, %v6727_v9 }
0x3114   :  { %v6728_v10 = vmul.f32 %v6726_v21, %v6726_v21 }
0x3115   :  { %v6733_v16 = vsel %vm99_vm0, %v6729_v15, 0.0 }
0x3116   :  { %v6730_v12 = vsel %vm99_vm0, %v6728_v10, 0.0 }
0x3117   :  { %6731 = vadd.xlane.f32.xlu0 %v6730_v12 }
0x311b   :  { %6734 = vadd.xlane.f32.xlu0 %v6733_v16 }
0x31a4   :  { %v6732_v56 = vpop.xlane.xlu0 %6731 }
0x31a5   :  { %v6736_v53 = vmul.f32 0.03125, %v6732_v56 }
0x31a7   :  { %v6738_v26 = vadd.f32 1e-05, %v6736_v53 }
0x31a8   :  { %v6735_v27 = vpop.xlane.xlu0 %6734 }
0x31a9   :  { %7923 = vrsqrt.f32 %v6738_v26  ;;  %v6737_v54 = vmul.f32 0.03125, %v6735_v27 }
0x31ab   :  { %v6739_v28 = vadd.f32 1e-05, %v6737_v54 }
0x31ad   :  { %7925 = vrsqrt.f32 %v6739_v28 }
0x31b3   :  { %v7924_v25 = vpop.eup %7923 }
0x31b4   :  { %v6742_v22 = vmul.f32 %v7924_v25, %v6726_v21 }
0x31b6   :  { %7646 = vmatprep.mubr.msk.f32.mxu1 %vm99_vm0, %v6742_v22 }
0x31b7   :  { %v7926_v43 = vpop.eup %7925 }
0x31b8   :  { %v6743_v19 = vmul.f32 %v7926_v43, %v6727_v9 }
0x31ba   :  { %7647 = vmatmul.mubr.msk.f32.vlgmr.msra.gmra.mrb[78].mxu1 %vm99_vm0, %v6743_v19 }
0x328d   :  { %v7648_v44 = vpop.f32.mrb[78].mxu1 }
0x328e   :  { %v6828_v34 = vadd.f32 %v7648_v44, %v6994_v29  ;;  %v6822_v37 = vpop.f32.mrb[79].mxu1 }
0x328f   :  { %v6823_v38 = vadd.f32 %v6994_v29, %v6822_v37 }
0x3290   :  { %v6832_v40 = vmax.f32 %v6828_v34, 0.0 }
0x3291   :  { %v6831_v42 = vmax.f32 %v6823_v38, 0.0 }
0x3292   :  { %v6834_v45 = vadd.f32 %v6832_v40, %v8825_v32 }
0x3293   :  { %v6833_v39 = vadd.f32 %v6831_v42, %v8828_v3 }
0x3294   :  { %6836 = vst.msk [vmem:[#allocation10 + $0x8] sm:$0xff] %vm99_vm0, %v6834_v45 }
0x3295   :  { %6835 = vst.msk [vmem:[#allocation10] sm:$0xff] %vm99_vm0, %v6833_v39 }
0x3296   :  { %8026 = shalt.err (!%p8023_p8)
}
0x3297   :  { %s8027_s11 = scalar_lea.hbm %s9060_s7, 256 }
0x3298   :  { %p8028_p9 = scmp.ne.s32.totalorder %s9060_s7, %s8027_s11  ;;  %p8031_p10 = scmp.lt.u32.totalorder %s8027_s11, %s9060_s7 }
0x329a   :  { %p8033_p11 = pnand %p8031_p10, %p8028_p9 }
0x329c   :  { %8036 = shalt.err (!%p8033_p11)
}
0x329d   :  { %6848 = dma.vmem_to_hbm [thread:$0]  %s6843_s8, 256, %s9060_s7, [#allocation4], %s8047_s13, %s8047_s13, %s8048_s14  }
0x329e   :  { %8043 = dma.done.wait [#allocation4], 256  }
0x329f   :  { %8044 = vsyncadd [#allocation4], 4294967040 }
0x32a0   :  { %6852 = vsyncpa [#allocation3], 1 }
0x32a1   :  { %6853 = vsyncpa [#allocation6], 1 }
0x32a2   :  { %6854 = vsyncpa [#allocation9], 1 }
0x32a3   :  { %6855 = vsyncpa [#allocation4], 1 }

</bundles_post_ra>
